<compile_context>
chip_gen: v6e
topology: v6e:2x2x1
jax: 0.10.0
libtpu: 0.0.40
codegen_flags: <defaults>
</compile_context>

<pallas_src>
import functools

import jax
import jax.numpy as jnp
import numpy as np
from jax import lax
from jax.experimental import pallas as pl
from jax.experimental.pallas import tpu as pltpu


def _round_up(x, m):
    return (x + m - 1) // m * m


# --------------------------- hardware introspection --------------------------
@functools.lru_cache(maxsize=None)
def _tpu_hw_info():
    """Returns (per-core VMEM bytes, TensorCores reachable via 'parallel' grid axes)."""
    vmem_bytes = 64 * 1024 * 1024          # conservative default (v7x per-TC VMEM)
    n_cores = 1
    kind = ""
    try:
        kind = jax.devices()[0].device_kind.lower()
    except Exception:
        pass
    if ("v7" in kind) or ("7x" in kind):
        n_cores = 2                        # v7x: 2 TensorCores per device
    elif kind:
        vmem_bytes = 128 * 1024 * 1024     # v5e / v6e physical VMEM
    try:
        vmem_bytes = int(pltpu.get_tpu_info().vmem_capacity_bytes)
    except Exception:
        pass
    return vmem_bytes, n_cores


@functools.lru_cache(maxsize=None)
def _single_buffering_supported():
    """Probe whether pl.BlockSpec(pipeline_mode=pl.Buffered(1)) works in this JAX build."""
    try:
        def _k(x_ref, o_ref):
            o_ref[...] = x_ref[...] + 1.0

        f = pl.pallas_call(
            _k,
            out_shape=jax.ShapeDtypeStruct((8, 128), jnp.float32),
            grid=(1,),
            in_specs=[pl.BlockSpec((8, 128), lambda i: (0, 0),
                                   pipeline_mode=pl.Buffered(1))],
            out_specs=pl.BlockSpec((8, 128), lambda i: (0, 0),
                                   pipeline_mode=pl.Buffered(1)),
        )
        jax.block_until_ready(f(jnp.zeros((8, 128), jnp.float32)))
        return True
    except Exception:
        return False


# Evaluate eagerly at import (outside any jit trace).
_SINGLE_BUF_OK = _single_buffering_supported()


# --------------------------- Pallas recurrent kernel -------------------------
def _gru_recurrence_kernel(gx_ref, whh_ref, bhn_ref, out_ref, *,
                           fused, seq_out, unroll):
    """Serial part of one GRU layer for one batch tile.

    gx_ref  : (T, 3, BB, H) bf16  hoisted input projections (+ folded biases), gates r,z,n
    whh_ref : (H, 3H) bf16 if fused (H % 128 == 0) else (3, H, H) bf16, pre-transposed
    bhn_ref : (1, H) f32  b_hn (kept separate because of r * (W_hn h + b_hn))
    out_ref : (T, BB, H) if seq_out else (BB, H)
    """
    T = gx_ref.shape[0]
    BB = gx_ref.shape[2]
    H = bhn_ref.shape[1]

    # Hoisted out of the time loop (JAX does not CSE per-iteration loads/broadcasts).
    whh = whh_ref[...]                                   # bf16, VMEM-resident
    bhn = jnp.broadcast_to(bhn_ref[...], (BB, H))

    def step(t, h):
        gx_r = gx_ref[t, 0].astype(jnp.float32)
        gx_z = gx_ref[t, 1].astype(jnp.float32)
        gx_n = gx_ref[t, 2].astype(jnp.float32)
        h_bf = h.astype(jnp.bfloat16)
        if fused:
            # One MXU issue per timestep; 128-aligned lane slices are free views.
            gh = jnp.dot(h_bf, whh, preferred_element_type=jnp.float32)
            gh_r, gh_z, gh_n = gh[:, :H], gh[:, H:2 * H], gh[:, 2 * H:]
        else:
            gh_r = jnp.dot(h_bf, whh[0], preferred_element_type=jnp.float32)
            gh_z = jnp.dot(h_bf, whh[1], preferred_element_type=jnp.float32)
            gh_n = jnp.dot(h_bf, whh[2], preferred_element_type=jnp.float32)
        r = jax.nn.sigmoid(gx_r + gh_r)
        z = jax.nn.sigmoid(gx_z + gh_z)
        n = jnp.tanh(gx_n + r * (gh_n + bhn))
        h_new = n + z * (h - n)          # == (1-z)*n + z*h, one fewer vmul
        if seq_out:
            out_ref[t] = h_new.astype(out_ref.dtype)
        return h_new

    h0 = jnp.zeros((BB, H), jnp.float32)
    h_last = lax.fori_loop(0, T, step, h0, unroll=unroll)
    if not seq_out:
        out_ref[...] = h_last.astype(out_ref.dtype)


# ------------------------------ layer wrapper ---------------------------------
def gru_layer_pallas(x_tbd, w_ih, w_hh, b_ih, b_hh, *, seq_out, out_dtype):
    """One GRU layer (PyTorch weight layout, gate order r, z, n).

    x_tbd : (T, B, D) time-major, B a multiple of 16.
    Returns (T, B, H) sequence if seq_out else (B, H) last-timestep hidden.
    """
    T, B, D = x_tbd.shape
    H = w_hh.shape[1]
    assert B % 16 == 0

    w_ih = jnp.asarray(w_ih, jnp.float32)
    w_hh = jnp.asarray(w_hh, jnp.float32)
    b_ih = jnp.asarray(b_ih, jnp.float32)
    b_hh = jnp.asarray(b_hh, jnp.float32)

    # Per-gate transposed weight blocks (gate order r, z, n).
    wih_t = jnp.concatenate([w_ih[:H].T, w_ih[H:2 * H].T, w_ih[2 * H:].T], axis=1)  # (D,3H)
    whr_t, whz_t, whn_t = w_hh[:H].T, w_hh[H:2 * H].T, w_hh[2 * H:].T

    fused = (H % 128 == 0)
    if fused:
        whh_arg = jnp.concatenate([whr_t, whz_t, whn_t], axis=1).astype(jnp.bfloat16)  # (H,3H)
    else:
        whh_arg = jnp.stack([whr_t, whz_t, whn_t], axis=0).astype(jnp.bfloat16)        # (3,H,H)

    # r/z biases fully folded into the hoisted projection, b_in folded too; b_hn kept.
    bias = jnp.concatenate([b_ih[:2 * H] + b_hh[:2 * H], b_ih[2 * H:]])   # (3H,)
    bhn = b_hh[2 * H:].reshape(1, H)

    # Hoisted input projection: one (T*B, D) @ (D, 3H) bf16 GEMM (f32 accumulation),
    # independent of h -> off the serial critical path. Stored bf16, packed (T,3,B,H).
    xf = x_tbd.reshape(T * B, D).astype(jnp.bfloat16)
    gx = jnp.dot(xf, wih_t.astype(jnp.bfloat16),
                 preferred_element_type=jnp.float32) + bias
    gx = gx.astype(jnp.bfloat16).reshape(T, B, 3, H).transpose(0, 2, 1, 3)   # (T,3,B,H)

    # ---------------- batch tiling: generation / VMEM aware -------------------
    vmem_cap, n_cores = _tpu_hw_info()
    budget = int(vmem_cap * 0.7)
    out_itemsize = jnp.dtype(out_dtype).itemsize
    w_bytes = int(whh_arg.size) * 2 + 4 * H

    def tile_bytes(bb):
        n_bt = B // bb
        io_mult = 1 if (_SINGLE_BUF_OK and n_bt == 1) else 2
        w_mult = 1 if _SINGLE_BUF_OK else 2
        gx_b = 2 * T * 3 * bb * H
        out_b = (T * bb * H if seq_out else bb * H) * out_itemsize
        live = 4 * bb * H * 13                      # h, gates, gh, temporaries (rough)
        return io_mult * (gx_b + out_b) + w_mult * w_bytes + live

    candidates = [bb for bb in range(16, B + 1, 16) if B % bb == 0]
    candidates.sort(reverse=True)
    if not candidates:
        candidates = [B]
    if n_cores >= 2 and B >= 32:
        # Keep both v7x TensorCores busy on the serial recurrence.
        smaller = [bb for bb in candidates if bb < B]
        candidates = smaller or candidates
    bb = candidates[-1]
    for cand in candidates:                          # fewest, fattest tiles that fit
        if tile_bytes(cand) <= budget:
            bb = cand
            break
    n_bt = B // bb

    need = tile_bytes(bb)
    if need > 12 * 1024 * 1024:                      # v5e default scoped VMEM is 16 MiB
        vmem_limit = min(int(need * 1.5) + (4 << 20), int(vmem_cap * 0.9))
    else:
        vmem_limit = None

    # ------------------------------- specs -------------------------------------
    def spec(block, index_map, single):
        if single and _SINGLE_BUF_OK:
            return pl.BlockSpec(block, index_map, pipeline_mode=pl.Buffered(1))
        return pl.BlockSpec(block, index_map)

    io_single = (n_bt == 1)
    gx_spec = spec((T, 3, bb, H), lambda b: (0, 0, b, 0), io_single)
    if fused:
        whh_spec = spec((H, 3 * H), lambda b: (0, 0), True)
    else:
        whh_spec = spec((3, H, H), lambda b: (0, 0, 0), True)
    bhn_spec = spec((1, H), lambda b: (0, 0), True)
    if seq_out:
        out_shape = jax.ShapeDtypeStruct((T, B, H), out_dtype)
        out_spec = spec((T, bb, H), lambda b: (0, b, 0), io_single)
    else:
        # Final layer emits ONLY the last-timestep hidden state (no T-1 useless writebacks).
        out_shape = jax.ShapeDtypeStruct((B, H), out_dtype)
        out_spec = spec((bb, H), lambda b: (b, 0), io_single)

    kernel = functools.partial(_gru_recurrence_kernel, fused=fused, seq_out=seq_out,
                               unroll=True if T <= 16 else 4)

    return pl.pallas_call(
        kernel,
        out_shape=out_shape,
        grid_spec=pltpu.PrefetchScalarGridSpec(
            num_scalar_prefetch=0,
            grid=(n_bt,),
            in_specs=[gx_spec, whh_spec, bhn_spec],
            out_specs=out_spec,
        ),
        compiler_params=pltpu.CompilerParams(
            dimension_semantics=("parallel",),
            vmem_limit_bytes=vmem_limit,
        ),
    )(gx, whh_arg, bhn)


# ------------------------------- module forward -------------------------------
def question_embedding_forward(x_btd, params):
    """Reproduces QuestionEmbedding.forward: returns output[:, -1] of shape (B, H)."""
    B = x_btd.shape[0]
    # Pad batch to a multiple of 16 (bf16 sublane packing) for full-vreg occupancy.
    B_pad = _round_up(max(B, 16), 16)
    if B_pad != B:
        x_btd = jnp.pad(x_btd, ((0, B_pad - B), (0, 0), (0, 0)))
    h = jnp.transpose(x_btd, (1, 0, 2)).astype(jnp.float32)   # batch_first -> time-major
    nlayers = len(params)
    # TODO(synk): production 2-layer configs could fuse both layers in one pallas_call
    # (wavefront over t) to skip the intermediate (T,B,H) HBM round trip.
    for li, (w_ih, w_hh, b_ih, b_hh) in enumerate(params):
        last = (li == nlayers - 1)
        h = gru_layer_pallas(h, w_ih, w_hh, b_ih, b_hh,
                             seq_out=not last,
                             out_dtype=jnp.float32 if last else jnp.bfloat16)
    return h[:B]


# ---------------- pure-JAX references (for correctness check) ----------------
def _gru_layer_ref_matched(x_tbd, w_ih, w_hh, b_ih, b_hh):
    """Mirrors the kernel's bf16 rounding points exactly (bf16 operands, f32 accumulate)."""
    T, B, D = x_tbd.shape
    H = w_hh.shape[1]
    w_ih = jnp.asarray(w_ih, jnp.float32)
    w_hh = jnp.asarray(w_hh, jnp.float32)
    b_ih = jnp.asarray(b_ih, jnp.float32)
    b_hh = jnp.asarray(b_hh, jnp.float32)
    wih_t = jnp.concatenate([w_ih[:H].T, w_ih[H:2 * H].T, w_ih[2 * H:].T], axis=1)
    whh_t = jnp.concatenate([w_hh[:H].T, w_hh[H:2 * H].T, w_hh[2 * H:].T], axis=1)
    bias = jnp.concatenate([b_ih[:2 * H] + b_hh[:2 * H], b_ih[2 * H:]])
    bhn = b_hh[2 * H:]

    gx = jnp.dot(x_tbd.reshape(T * B, D).astype(jnp.bfloat16),
                 wih_t.astype(jnp.bfloat16), preferred_element_type=jnp.float32) + bias
    gx = gx.astype(jnp.bfloat16).astype(jnp.float32).reshape(T, B, 3 * H)
    whh_bf = whh_t.astype(jnp.bfloat16)

    def step(h, gx_t):
        gh = jnp.dot(h.astype(jnp.bfloat16), whh_bf, preferred_element_type=jnp.float32)
        r = jax.nn.sigmoid(gx_t[:, :H] + gh[:, :H])
        z = jax.nn.sigmoid(gx_t[:, H:2 * H] + gh[:, H:2 * H])
        n = jnp.tanh(gx_t[:, 2 * H:] + r * (gh[:, 2 * H:] + bhn))
        h_new = n + z * (h - n)
        return h_new, h_new

    _, seq = lax.scan(step, jnp.zeros((B, H), jnp.float32), gx)
    return seq


def question_embedding_forward_ref_matched(x_btd, params):
    h_seq = jnp.transpose(x_btd, (1, 0, 2)).astype(jnp.float32)
    for (w_ih, w_hh, b_ih, b_hh) in params:
        h_seq = _gru_layer_ref_matched(h_seq, w_ih, w_hh, b_ih, b_hh)
    return h_seq[-1]


def _gru_layer_ref_f32(x_tbd, w_ih, w_hh, b_ih, b_hh):
    """Straight f32 PyTorch-GRU semantics (independent sanity check)."""
    T, B, D = x_tbd.shape
    H = w_hh.shape[1]

    def step(h, x_t):
        gx = x_t @ w_ih.T + b_ih
        gh = h @ w_hh.T + b_hh
        r = jax.nn.sigmoid(gx[:, :H] + gh[:, :H])
        z = jax.nn.sigmoid(gx[:, H:2 * H] + gh[:, H:2 * H])
        n = jnp.tanh(gx[:, 2 * H:] + r * gh[:, 2 * H:])
        h_new = (1.0 - z) * n + z * h
        return h_new, h_new

    _, seq = lax.scan(step, jnp.zeros((B, H), jnp.float32), x_tbd)
    return seq


def question_embedding_forward_ref_f32(x_btd, params):
    h_seq = jnp.transpose(x_btd, (1, 0, 2)).astype(jnp.float32)
    for (w_ih, w_hh, b_ih, b_hh) in params:
        h_seq = _gru_layer_ref_f32(h_seq, w_ih, w_hh, b_ih, b_hh)
    return h_seq[-1]


# ---------------- parameter init (deterministic, PyTorch GRU shapes) ----------
def init_gru_params(key, in_dim, num_hid, nlayers):
    params = []
    k = 1.0 / np.sqrt(num_hid)
    for layer in range(nlayers):
        d = in_dim if layer == 0 else num_hid
        key, k1, k2, k3, k4 = jax.random.split(key, 5)
        w_ih = jax.random.uniform(k1, (3 * num_hid, d), jnp.float32, -k, k)
        w_hh = jax.random.uniform(k2, (3 * num_hid, num_hid), jnp.float32, -k, k)
        b_ih = jax.random.uniform(k3, (3 * num_hid,), jnp.float32, -k, k)
        b_hh = jax.random.uniform(k4, (3 * num_hid,), jnp.float32, -k, k)
        params.append((w_ih, w_hh, b_ih, b_hh))
    return params


if __name__ == "__main__":
    # Config 1: small shapes matching the module (exercises the per-gate H%128!=0 path).
    B, T, IN_DIM, NUM_HID, NLAYERS = 2, 8, 16, 32, 2
    key = jax.random.PRNGKey(0)
    key, kx = jax.random.split(key)
    x = jax.random.normal(kx, (B, T, IN_DIM), jnp.float32)   # (batch, seq, in_dim)
    params = init_gru_params(key, IN_DIM, NUM_HID, NLAYERS)

    fwd = jax.jit(question_embedding_forward)
    out = jax.block_until_ready(fwd(x, params))
    assert out.shape == (B, NUM_HID)

    ref_m = jax.block_until_ready(jax.jit(question_embedding_forward_ref_matched)(x, params))
    np.testing.assert_allclose(np.asarray(out), np.asarray(ref_m), rtol=5e-3, atol=5e-3)

    ref_f = jax.block_until_ready(jax.jit(question_embedding_forward_ref_f32)(x, params))
    np.testing.assert_allclose(np.asarray(out), np.asarray(ref_f), rtol=1e-1, atol=1e-1)

    # Config 2: H % 128 == 0 exercises the fused (BB,H)@(H,3H) recurrent-matmul path.
    B2, T2, D2, H2, L2 = 4, 6, 24, 128, 1
    key, kx2 = jax.random.split(key)
    x2 = jax.random.normal(kx2, (B2, T2, D2), jnp.float32)
    params2 = init_gru_params(key, D2, H2, L2)
    out2 = jax.block_until_ready(jax.jit(question_embedding_forward)(x2, params2))
    ref2 = jax.block_until_ready(jax.jit(question_embedding_forward_ref_matched)(x2, params2))
    assert out2.shape == (B2, H2)
    np.testing.assert_allclose(np.asarray(out2), np.asarray(ref2), rtol=5e-3, atol=5e-3)

    print("KERNEL_OK")
</pallas_src>

<mosaic_0001>
module attributes {stable_mosaic.version = 11 : i64} {
  func.func @_k(%arg0: i32, %arg1: memref<8x128xf32, #tpu.memory_space<vmem>>, %arg2: memref<8x128xf32, #tpu.memory_space<vmem>>) attributes {dimension_semantics = [#tpu.dimension_semantics<arbitrary>], iteration_bounds = array<i64: 1>, scalar_prefetch = 0 : i64, scratch_operands = 0 : i64, tpu.core_type = #tpu.core_type<tc>, window_params = [{pipeline_mode = #tpu.pipeline_mode<synchronous>, transform_indices = @transform_0, window_bounds = array<i64: 8, 128>}, {pipeline_mode = #tpu.pipeline_mode<synchronous>, transform_indices = @transform_1, window_bounds = array<i64: 8, 128>}]} {
    %c0 = arith.constant 0 : index
    %c0_0 = arith.constant 0 : index
    %0 = vector.load %arg1[%c0, %c0_0] : memref<8x128xf32, #tpu.memory_space<vmem>>, vector<8x128xf32>
    %cst = arith.constant 1.000000e+00 : f32
    %1 = vector.broadcast %cst : f32 to vector<8x128xf32>
    %2 = arith.addf %0, %1 : vector<8x128xf32>
    %c0_1 = arith.constant 0 : index
    %c0_2 = arith.constant 0 : index
    %3 = vector.load %arg2[%c0_1, %c0_2] : memref<8x128xf32, #tpu.memory_space<vmem>>, vector<8x128xf32>
    tpu.vector_store %arg2[%c0_1, %c0_2], %2 {strides = array<i32>} : memref<8x128xf32, #tpu.memory_space<vmem>>, vector<8x128xf32>,
    return
  }
  func.func @transform_0(%arg0: i32) -> (i32, i32) {
    %c0_i32 = arith.constant 0 : i32
    %c0_i32_0 = arith.constant 0 : i32
    %c0_i32_1 = arith.constant 0 : i32
    return %c0_i32, %c0_i32_0 : i32, i32
  }
  func.func @transform_1(%arg0: i32) -> (i32, i32) {
    %c0_i32 = arith.constant 0 : i32
    %c0_i32_0 = arith.constant 0 : i32
    %c0_i32_1 = arith.constant 0 : i32
    return %c0_i32, %c0_i32_0 : i32, i32
  }
}

module attributes {stable_mosaic.version = 11 : i64} {
  func.func @_gru_recurrence_kernel(%arg0: i32, %arg1: memref<8x3x16x32xbf16, #tpu.memory_space<vmem>>, %arg2: memref<3x32x32xbf16, #tpu.memory_space<vmem>>, %arg3: memref<1x32xf32, #tpu.memory_space<vmem>>, %arg4: memref<8x16x32xbf16, #tpu.memory_space<vmem>>) attributes {dimension_semantics = [#tpu.dimension_semantics<parallel>], iteration_bounds = array<i64: 1>, scalar_prefetch = 0 : i64, scratch_operands = 0 : i64, tpu.core_type = #tpu.core_type<tc>, window_params = [{transform_indices = @transform_0, window_bounds = array<i64: 8, 3, 16, 32>}, {pipeline_mode = #tpu.pipeline_mode<synchronous>, transform_indices = @transform_1, window_bounds = array<i64: 3, 32, 32>}, {pipeline_mode = #tpu.pipeline_mode<synchronous>, transform_indices = @transform_2, window_bounds = array<i64: 1, 32>}, {transform_indices = @transform_3, window_bounds = array<i64: 8, 16, 32>}]} {
    %c0 = arith.constant 0 : index
    %c0_0 = arith.constant 0 : index
    %c0_1 = arith.constant 0 : index
    %0 = vector.load %arg2[%c0, %c0_0, %c0_1] : memref<3x32x32xbf16, #tpu.memory_space<vmem>>, vector<3x32x32xbf16>
    %c0_2 = arith.constant 0 : index
    %c0_3 = arith.constant 0 : index
    %1 = vector.load %arg3[%c0_2, %c0_3] : memref<1x32xf32, #tpu.memory_space<vmem>>, vector<1x32xf32>
    %2 = vector.shape_cast %1 : vector<1x32xf32> to vector<1x32xf32>
    %3 = vector.broadcast %2 : vector<1x32xf32> to vector<16x32xf32>
    %cst = arith.constant 0.000000e+00 : f32
    %4 = vector.broadcast %cst : f32 to vector<16x32xf32>
    %c0_i32 = arith.constant 0 : i32
    %5 = arith.index_cast %c0_i32 : i32 to index
    %c0_4 = arith.constant 0 : index
    %c0_5 = arith.constant 0 : index
    %c0_6 = arith.constant 0 : index
    %6 = vector.load %arg1[%5, %c0_4, %c0_5, %c0_6] : memref<8x3x16x32xbf16, #tpu.memory_space<vmem>>, vector<1x1x16x32xbf16>
    %7 = vector.shape_cast %6 : vector<1x1x16x32xbf16> to vector<16x32xbf16>
    %8 = arith.extf %7 : vector<16x32xbf16> to vector<16x32xf32>
    %9 = arith.index_cast %c0_i32 : i32 to index
    %c1 = arith.constant 1 : index
    %c0_7 = arith.constant 0 : index
    %c0_8 = arith.constant 0 : index
    %10 = vector.load %arg1[%9, %c1, %c0_7, %c0_8] : memref<8x3x16x32xbf16, #tpu.memory_space<vmem>>, vector<1x1x16x32xbf16>
    %11 = vector.shape_cast %10 : vector<1x1x16x32xbf16> to vector<16x32xbf16>
    %12 = arith.extf %11 : vector<16x32xbf16> to vector<16x32xf32>
    %13 = arith.index_cast %c0_i32 : i32 to index
    %c2 = arith.constant 2 : index
    %c0_9 = arith.constant 0 : index
    %c0_10 = arith.constant 0 : index
    %14 = vector.load %arg1[%13, %c2, %c0_9, %c0_10] : memref<8x3x16x32xbf16, #tpu.memory_space<vmem>>, vector<1x1x16x32xbf16>
    %15 = vector.shape_cast %14 : vector<1x1x16x32xbf16> to vector<16x32xbf16>
    %16 = arith.extf %15 : vector<16x32xbf16> to vector<16x32xf32>
    %17 = arith.truncf %4 : vector<16x32xf32> to vector<16x32xbf16>
    %18 = vector.extract_strided_slice %0 {offsets = [0, 0, 0], sizes = [1, 32, 32], strides = [1, 1, 1]} : vector<3x32x32xbf16> to vector<1x32x32xbf16>
    %19 = vector.shape_cast %18 : vector<1x32x32xbf16> to vector<32x32xbf16>
    %cst_11 = arith.constant dense<0.000000e+00> : vector<16x32xf32>
    %20 = tpu.matmul %17, %19, %cst_11 {dimension_numbers = #tpu.dot_dimension_numbers<[1], [0], [0], [1], [0, 0, 1, 1], [], []>} : vector<16x32xbf16>, vector<32x32xbf16>, vector<16x32xf32> -> vector<16x32xf32>
    %21 = vector.extract_strided_slice %0 {offsets = [1, 0, 0], sizes = [1, 32, 32], strides = [1, 1, 1]} : vector<3x32x32xbf16> to vector<1x32x32xbf16>
    %22 = vector.shape_cast %21 : vector<1x32x32xbf16> to vector<32x32xbf16>
    %cst_12 = arith.constant dense<0.000000e+00> : vector<16x32xf32>
    %23 = tpu.matmul %17, %22, %cst_12 {dimension_numbers = #tpu.dot_dimension_numbers<[1], [0], [0], [1], [0, 0, 1, 1], [], []>} : vector<16x32xbf16>, vector<32x32xbf16>, vector<16x32xf32> -> vector<16x32xf32>
    %24 = vector.extract_strided_slice %0 {offsets = [2, 0, 0], sizes = [1, 32, 32], strides = [1, 1, 1]} : vector<3x32x32xbf16> to vector<1x32x32xbf16>
    %25 = vector.shape_cast %24 : vector<1x32x32xbf16> to vector<32x32xbf16>
    %cst_13 = arith.constant dense<0.000000e+00> : vector<16x32xf32>
    %26 = tpu.matmul %17, %25, %cst_13 {dimension_numbers = #tpu.dot_dimension_numbers<[1], [0], [0], [1], [0, 0, 1, 1], [], []>} : vector<16x32xbf16>, vector<32x32xbf16>, vector<16x32xf32> -> vector<16x32xf32>
    %27 = arith.addf %8, %20 : vector<16x32xf32>
    %28 = arith.negf %27 : vector<16x32xf32>
    %29 = math.exp %28 : vector<16x32xf32>
    %cst_14 = arith.constant 1.000000e+00 : f32
    %30 = vector.broadcast %cst_14 : f32 to vector<16x32xf32>
    %31 = arith.addf %30, %29 : vector<16x32xf32>
    %32 = arith.divf %30, %31 : vector<16x32xf32>
    %33 = arith.addf %12, %23 : vector<16x32xf32>
    %34 = arith.negf %33 : vector<16x32xf32>
    %35 = math.exp %34 : vector<16x32xf32>
    %cst_15 = arith.constant 1.000000e+00 : f32
    %36 = vector.broadcast %cst_15 : f32 to vector<16x32xf32>
    %37 = arith.addf %36, %35 : vector<16x32xf32>
    %38 = arith.divf %36, %37 : vector<16x32xf32>
    %39 = arith.addf %26, %3 : vector<16x32xf32>
    %40 = arith.mulf %32, %39 : vector<16x32xf32>
    %41 = arith.addf %16, %40 : vector<16x32xf32>
    %42 = math.tanh %41 : vector<16x32xf32>
    %43 = arith.subf %4, %42 : vector<16x32xf32>
    %44 = arith.mulf %38, %43 : vector<16x32xf32>
    %45 = arith.addf %42, %44 : vector<16x32xf32>
    %46 = arith.truncf %45 : vector<16x32xf32> to vector<16x32xbf16>
    %47 = arith.index_cast %c0_i32 : i32 to index
    %c0_16 = arith.constant 0 : index
    %c0_17 = arith.constant 0 : index
    %48 = vector.load %arg4[%47, %c0_16, %c0_17] : memref<8x16x32xbf16, #tpu.memory_space<vmem>>, vector<1x16x32xbf16>
    %49 = vector.shape_cast %48 : vector<1x16x32xbf16> to vector<16x32xbf16>
    %50 = vector.shape_cast %46 : vector<16x32xbf16> to vector<1x16x32xbf16>
    tpu.vector_store %arg4[%47, %c0_16, %c0_17], %50 {strides = array<i32>} : memref<8x16x32xbf16, #tpu.memory_space<vmem>>, vector<1x16x32xbf16>,
    %c1_i32 = arith.constant 1 : i32
    %51 = arith.index_cast %c1_i32 : i32 to index
    %c0_18 = arith.constant 0 : index
    %c0_19 = arith.constant 0 : index
    %c0_20 = arith.constant 0 : index
    %52 = vector.load %arg1[%51, %c0_18, %c0_19, %c0_20] : memref<8x3x16x32xbf16, #tpu.memory_space<vmem>>, vector<1x1x16x32xbf16>
    %53 = vector.shape_cast %52 : vector<1x1x16x32xbf16> to vector<16x32xbf16>
    %54 = arith.extf %53 : vector<16x32xbf16> to vector<16x32xf32>
    %55 = arith.index_cast %c1_i32 : i32 to index
    %c1_21 = arith.constant 1 : index
    %c0_22 = arith.constant 0 : index
    %c0_23 = arith.constant 0 : index
    %56 = vector.load %arg1[%55, %c1_21, %c0_22, %c0_23] : memref<8x3x16x32xbf16, #tpu.memory_space<vmem>>, vector<1x1x16x32xbf16>
    %57 = vector.shape_cast %56 : vector<1x1x16x32xbf16> to vector<16x32xbf16>
    %58 = arith.extf %57 : vector<16x32xbf16> to vector<16x32xf32>
    %59 = arith.index_cast %c1_i32 : i32 to index
    %c2_24 = arith.constant 2 : index
    %c0_25 = arith.constant 0 : index
    %c0_26 = arith.constant 0 : index
    %60 = vector.load %arg1[%59, %c2_24, %c0_25, %c0_26] : memref<8x3x16x32xbf16, #tpu.memory_space<vmem>>, vector<1x1x16x32xbf16>
    %61 = vector.shape_cast %60 : vector<1x1x16x32xbf16> to vector<16x32xbf16>
    %62 = arith.extf %61 : vector<16x32xbf16> to vector<16x32xf32>
    %63 = arith.truncf %45 : vector<16x32xf32> to vector<16x32xbf16>
    %64 = vector.extract_strided_slice %0 {offsets = [0, 0, 0], sizes = [1, 32, 32], strides = [1, 1, 1]} : vector<3x32x32xbf16> to vector<1x32x32xbf16>
    %65 = vector.shape_cast %64 : vector<1x32x32xbf16> to vector<32x32xbf16>
    %cst_27 = arith.constant dense<0.000000e+00> : vector<16x32xf32>
    %66 = tpu.matmul %63, %65, %cst_27 {dimension_numbers = #tpu.dot_dimension_numbers<[1], [0], [0], [1], [0, 0, 1, 1], [], []>} : vector<16x32xbf16>, vector<32x32xbf16>, vector<16x32xf32> -> vector<16x32xf32>
    %67 = vector.extract_strided_slice %0 {offsets = [1, 0, 0], sizes = [1, 32, 32], strides = [1, 1, 1]} : vector<3x32x32xbf16> to vector<1x32x32xbf16>
    %68 = vector.shape_cast %67 : vector<1x32x32xbf16> to vector<32x32xbf16>
    %cst_28 = arith.constant dense<0.000000e+00> : vector<16x32xf32>
    %69 = tpu.matmul %63, %68, %cst_28 {dimension_numbers = #tpu.dot_dimension_numbers<[1], [0], [0], [1], [0, 0, 1, 1], [], []>} : vector<16x32xbf16>, vector<32x32xbf16>, vector<16x32xf32> -> vector<16x32xf32>
    %70 = vector.extract_strided_slice %0 {offsets = [2, 0, 0], sizes = [1, 32, 32], strides = [1, 1, 1]} : vector<3x32x32xbf16> to vector<1x32x32xbf16>
    %71 = vector.shape_cast %70 : vector<1x32x32xbf16> to vector<32x32xbf16>
    %cst_29 = arith.constant dense<0.000000e+00> : vector<16x32xf32>
    %72 = tpu.matmul %63, %71, %cst_29 {dimension_numbers = #tpu.dot_dimension_numbers<[1], [0], [0], [1], [0, 0, 1, 1], [], []>} : vector<16x32xbf16>, vector<32x32xbf16>, vector<16x32xf32> -> vector<16x32xf32>
    %73 = arith.addf %54, %66 : vector<16x32xf32>
    %74 = arith.negf %73 : vector<16x32xf32>
    %75 = math.exp %74 : vector<16x32xf32>
    %cst_30 = arith.constant 1.000000e+00 : f32
    %76 = vector.broadcast %cst_30 : f32 to vector<16x32xf32>
    %77 = arith.addf %76, %75 : vector<16x32xf32>
    %78 = arith.divf %76, %77 : vector<16x32xf32>
    %79 = arith.addf %58, %69 : vector<16x32xf32>
    %80 = arith.negf %79 : vector<16x32xf32>
    %81 = math.exp %80 : vector<16x32xf32>
    %cst_31 = arith.constant 1.000000e+00 : f32
    %82 = vector.broadcast %cst_31 : f32 to vector<16x32xf32>
    %83 = arith.addf %82, %81 : vector<16x32xf32>
    %84 = arith.divf %82, %83 : vector<16x32xf32>
    %85 = arith.addf %72, %3 : vector<16x32xf32>
    %86 = arith.mulf %78, %85 : vector<16x32xf32>
    %87 = arith.addf %62, %86 : vector<16x32xf32>
    %88 = math.tanh %87 : vector<16x32xf32>
    %89 = arith.subf %45, %88 : vector<16x32xf32>
    %90 = arith.mulf %84, %89 : vector<16x32xf32>
    %91 = arith.addf %88, %90 : vector<16x32xf32>
    %92 = arith.truncf %91 : vector<16x32xf32> to vector<16x32xbf16>
    %93 = arith.index_cast %c1_i32 : i32 to index
    %c0_32 = arith.constant 0 : index
    %c0_33 = arith.constant 0 : index
    %94 = vector.load %arg4[%93, %c0_32, %c0_33] : memref<8x16x32xbf16, #tpu.memory_space<vmem>>, vector<1x16x32xbf16>
    %95 = vector.shape_cast %94 : vector<1x16x32xbf16> to vector<16x32xbf16>
    %96 = vector.shape_cast %92 : vector<16x32xbf16> to vector<1x16x32xbf16>
    tpu.vector_store %arg4[%93, %c0_32, %c0_33], %96 {strides = array<i32>} : memref<8x16x32xbf16, #tpu.memory_space<vmem>>, vector<1x16x32xbf16>,
    %c2_i32 = arith.constant 2 : i32
    %97 = arith.index_cast %c2_i32 : i32 to index
    %c0_34 = arith.constant 0 : index
    %c0_35 = arith.constant 0 : index
    %c0_36 = arith.constant 0 : index
    %98 = vector.load %arg1[%97, %c0_34, %c0_35, %c0_36] : memref<8x3x16x32xbf16, #tpu.memory_space<vmem>>, vector<1x1x16x32xbf16>
    %99 = vector.shape_cast %98 : vector<1x1x16x32xbf16> to vector<16x32xbf16>
    %100 = arith.extf %99 : vector<16x32xbf16> to vector<16x32xf32>
    %101 = arith.index_cast %c2_i32 : i32 to index
    %c1_37 = arith.constant 1 : index
    %c0_38 = arith.constant 0 : index
    %c0_39 = arith.constant 0 : index
    %102 = vector.load %arg1[%101, %c1_37, %c0_38, %c0_39] : memref<8x3x16x32xbf16, #tpu.memory_space<vmem>>, vector<1x1x16x32xbf16>
    %103 = vector.shape_cast %102 : vector<1x1x16x32xbf16> to vector<16x32xbf16>
    %104 = arith.extf %103 : vector<16x32xbf16> to vector<16x32xf32>
    %105 = arith.index_cast %c2_i32 : i32 to index
    %c2_40 = arith.constant 2 : index
    %c0_41 = arith.constant 0 : index
    %c0_42 = arith.constant 0 : index
    %106 = vector.load %arg1[%105, %c2_40, %c0_41, %c0_42] : memref<8x3x16x32xbf16, #tpu.memory_space<vmem>>, vector<1x1x16x32xbf16>
    %107 = vector.shape_cast %106 : vector<1x1x16x32xbf16> to vector<16x32xbf16>
    %108 = arith.extf %107 : vector<16x32xbf16> to vector<16x32xf32>
    %109 = arith.truncf %91 : vector<16x32xf32> to vector<16x32xbf16>
    %110 = vector.extract_strided_slice %0 {offsets = [0, 0, 0], sizes = [1, 32, 32], strides = [1, 1, 1]} : vector<3x32x32xbf16> to vector<1x32x32xbf16>
    %111 = vector.shape_cast %110 : vector<1x32x32xbf16> to vector<32x32xbf16>
    %cst_43 = arith.constant dense<0.000000e+00> : vector<16x32xf32>
    %112 = tpu.matmul %109, %111, %cst_43 {dimension_numbers = #tpu.dot_dimension_numbers<[1], [0], [0], [1], [0, 0, 1, 1], [], []>} : vector<16x32xbf16>, vector<32x32xbf16>, vector<16x32xf32> -> vector<16x32xf32>
    %113 = vector.extract_strided_slice %0 {offsets = [1, 0, 0], sizes = [1, 32, 32], strides = [1, 1, 1]} : vector<3x32x32xbf16> to vector<1x32x32xbf16>
    %114 = vector.shape_cast %113 : vector<1x32x32xbf16> to vector<32x32xbf16>
    %cst_44 = arith.constant dense<0.000000e+00> : vector<16x32xf32>
    %115 = tpu.matmul %109, %114, %cst_44 {dimension_numbers = #tpu.dot_dimension_numbers<[1], [0], [0], [1], [0, 0, 1, 1], [], []>} : vector<16x32xbf16>, vector<32x32xbf16>, vector<16x32xf32> -> vector<16x32xf32>
    %116 = vector.extract_strided_slice %0 {offsets = [2, 0, 0], sizes = [1, 32, 32], strides = [1, 1, 1]} : vector<3x32x32xbf16> to vector<1x32x32xbf16>
    %117 = vector.shape_cast %116 : vector<1x32x32xbf16> to vector<32x32xbf16>
    %cst_45 = arith.constant dense<0.000000e+00> : vector<16x32xf32>
    %118 = tpu.matmul %109, %117, %cst_45 {dimension_numbers = #tpu.dot_dimension_numbers<[1], [0], [0], [1], [0, 0, 1, 1], [], []>} : vector<16x32xbf16>, vector<32x32xbf16>, vector<16x32xf32> -> vector<16x32xf32>
    %119 = arith.addf %100, %112 : vector<16x32xf32>
    %120 = arith.negf %119 : vector<16x32xf32>
    %121 = math.exp %120 : vector<16x32xf32>
    %cst_46 = arith.constant 1.000000e+00 : f32
    %122 = vector.broadcast %cst_46 : f32 to vector<16x32xf32>
    %123 = arith.addf %122, %121 : vector<16x32xf32>
    %124 = arith.divf %122, %123 : vector<16x32xf32>
    %125 = arith.addf %104, %115 : vector<16x32xf32>
    %126 = arith.negf %125 : vector<16x32xf32>
    %127 = math.exp %126 : vector<16x32xf32>
    %cst_47 = arith.constant 1.000000e+00 : f32
    %128 = vector.broadcast %cst_47 : f32 to vector<16x32xf32>
    %129 = arith.addf %128, %127 : vector<16x32xf32>
    %130 = arith.divf %128, %129 : vector<16x32xf32>
    %131 = arith.addf %118, %3 : vector<16x32xf32>
    %132 = arith.mulf %124, %131 : vector<16x32xf32>
    %133 = arith.addf %108, %132 : vector<16x32xf32>
    %134 = math.tanh %133 : vector<16x32xf32>
    %135 = arith.subf %91, %134 : vector<16x32xf32>
    %136 = arith.mulf %130, %135 : vector<16x32xf32>
    %137 = arith.addf %134, %136 : vector<16x32xf32>
    %138 = arith.truncf %137 : vector<16x32xf32> to vector<16x32xbf16>
    %139 = arith.index_cast %c2_i32 : i32 to index
    %c0_48 = arith.constant 0 : index
    %c0_49 = arith.constant 0 : index
    %140 = vector.load %arg4[%139, %c0_48, %c0_49] : memref<8x16x32xbf16, #tpu.memory_space<vmem>>, vector<1x16x32xbf16>
    %141 = vector.shape_cast %140 : vector<1x16x32xbf16> to vector<16x32xbf16>
    %142 = vector.shape_cast %138 : vector<16x32xbf16> to vector<1x16x32xbf16>
    tpu.vector_store %arg4[%139, %c0_48, %c0_49], %142 {strides = array<i32>} : memref<8x16x32xbf16, #tpu.memory_space<vmem>>, vector<1x16x32xbf16>,
    %c3_i32 = arith.constant 3 : i32
    %143 = arith.index_cast %c3_i32 : i32 to index
    %c0_50 = arith.constant 0 : index
    %c0_51 = arith.constant 0 : index
    %c0_52 = arith.constant 0 : index
    %144 = vector.load %arg1[%143, %c0_50, %c0_51, %c0_52] : memref<8x3x16x32xbf16, #tpu.memory_space<vmem>>, vector<1x1x16x32xbf16>
    %145 = vector.shape_cast %144 : vector<1x1x16x32xbf16> to vector<16x32xbf16>
    %146 = arith.extf %145 : vector<16x32xbf16> to vector<16x32xf32>
    %147 = arith.index_cast %c3_i32 : i32 to index
    %c1_53 = arith.constant 1 : index
    %c0_54 = arith.constant 0 : index
    %c0_55 = arith.constant 0 : index
    %148 = vector.load %arg1[%147, %c1_53, %c0_54, %c0_55] : memref<8x3x16x32xbf16, #tpu.memory_space<vmem>>, vector<1x1x16x32xbf16>
    %149 = vector.shape_cast %148 : vector<1x1x16x32xbf16> to vector<16x32xbf16>
    %150 = arith.extf %149 : vector<16x32xbf16> to vector<16x32xf32>
    %151 = arith.index_cast %c3_i32 : i32 to index
    %c2_56 = arith.constant 2 : index
    %c0_57 = arith.constant 0 : index
    %c0_58 = arith.constant 0 : index
    %152 = vector.load %arg1[%151, %c2_56, %c0_57, %c0_58] : memref<8x3x16x32xbf16, #tpu.memory_space<vmem>>, vector<1x1x16x32xbf16>
    %153 = vector.shape_cast %152 : vector<1x1x16x32xbf16> to vector<16x32xbf16>
    %154 = arith.extf %153 : vector<16x32xbf16> to vector<16x32xf32>
    %155 = arith.truncf %137 : vector<16x32xf32> to vector<16x32xbf16>
    %156 = vector.extract_strided_slice %0 {offsets = [0, 0, 0], sizes = [1, 32, 32], strides = [1, 1, 1]} : vector<3x32x32xbf16> to vector<1x32x32xbf16>
    %157 = vector.shape_cast %156 : vector<1x32x32xbf16> to vector<32x32xbf16>
    %cst_59 = arith.constant dense<0.000000e+00> : vector<16x32xf32>
    %158 = tpu.matmul %155, %157, %cst_59 {dimension_numbers = #tpu.dot_dimension_numbers<[1], [0], [0], [1], [0, 0, 1, 1], [], []>} : vector<16x32xbf16>, vector<32x32xbf16>, vector<16x32xf32> -> vector<16x32xf32>
    %159 = vector.extract_strided_slice %0 {offsets = [1, 0, 0], sizes = [1, 32, 32], strides = [1, 1, 1]} : vector<3x32x32xbf16> to vector<1x32x32xbf16>
    %160 = vector.shape_cast %159 : vector<1x32x32xbf16> to vector<32x32xbf16>
    %cst_60 = arith.constant dense<0.000000e+00> : vector<16x32xf32>
    %161 = tpu.matmul %155, %160, %cst_60 {dimension_numbers = #tpu.dot_dimension_numbers<[1], [0], [0], [1], [0, 0, 1, 1], [], []>} : vector<16x32xbf16>, vector<32x32xbf16>, vector<16x32xf32> -> vector<16x32xf32>
    %162 = vector.extract_strided_slice %0 {offsets = [2, 0, 0], sizes = [1, 32, 32], strides = [1, 1, 1]} : vector<3x32x32xbf16> to vector<1x32x32xbf16>
    %163 = vector.shape_cast %162 : vector<1x32x32xbf16> to vector<32x32xbf16>
    %cst_61 = arith.constant dense<0.000000e+00> : vector<16x32xf32>
    %164 = tpu.matmul %155, %163, %cst_61 {dimension_numbers = #tpu.dot_dimension_numbers<[1], [0], [0], [1], [0, 0, 1, 1], [], []>} : vector<16x32xbf16>, vector<32x32xbf16>, vector<16x32xf32> -> vector<16x32xf32>
    %165 = arith.addf %146, %158 : vector<16x32xf32>
    %166 = arith.negf %165 : vector<16x32xf32>
    %167 = math.exp %166 : vector<16x32xf32>
    %cst_62 = arith.constant 1.000000e+00 : f32
    %168 = vector.broadcast %cst_62 : f32 to vector<16x32xf32>
    %169 = arith.addf %168, %167 : vector<16x32xf32>
    %170 = arith.divf %168, %169 : vector<16x32xf32>
    %171 = arith.addf %150, %161 : vector<16x32xf32>
    %172 = arith.negf %171 : vector<16x32xf32>
    %173 = math.exp %172 : vector<16x32xf32>
    %cst_63 = arith.constant 1.000000e+00 : f32
    %174 = vector.broadcast %cst_63 : f32 to vector<16x32xf32>
    %175 = arith.addf %174, %173 : vector<16x32xf32>
    %176 = arith.divf %174, %175 : vector<16x32xf32>
    %177 = arith.addf %164, %3 : vector<16x32xf32>
    %178 = arith.mulf %170, %177 : vector<16x32xf32>
    %179 = arith.addf %154, %178 : vector<16x32xf32>
    %180 = math.tanh %179 : vector<16x32xf32>
    %181 = arith.subf %137, %180 : vector<16x32xf32>
    %182 = arith.mulf %176, %181 : vector<16x32xf32>
    %183 = arith.addf %180, %182 : vector<16x32xf32>
    %184 = arith.truncf %183 : vector<16x32xf32> to vector<16x32xbf16>
    %185 = arith.index_cast %c3_i32 : i32 to index
    %c0_64 = arith.constant 0 : index
    %c0_65 = arith.constant 0 : index
    %186 = vector.load %arg4[%185, %c0_64, %c0_65] : memref<8x16x32xbf16, #tpu.memory_space<vmem>>, vector<1x16x32xbf16>
    %187 = vector.shape_cast %186 : vector<1x16x32xbf16> to vector<16x32xbf16>
    %188 = vector.shape_cast %184 : vector<16x32xbf16> to vector<1x16x32xbf16>
    tpu.vector_store %arg4[%185, %c0_64, %c0_65], %188 {strides = array<i32>} : memref<8x16x32xbf16, #tpu.memory_space<vmem>>, vector<1x16x32xbf16>,
    %c4_i32 = arith.constant 4 : i32
    %189 = arith.index_cast %c4_i32 : i32 to index
    %c0_66 = arith.constant 0 : index
    %c0_67 = arith.constant 0 : index
    %c0_68 = arith.constant 0 : index
    %190 = vector.load %arg1[%189, %c0_66, %c0_67, %c0_68] : memref<8x3x16x32xbf16, #tpu.memory_space<vmem>>, vector<1x1x16x32xbf16>
    %191 = vector.shape_cast %190 : vector<1x1x16x32xbf16> to vector<16x32xbf16>
    %192 = arith.extf %191 : vector<16x32xbf16> to vector<16x32xf32>
    %193 = arith.index_cast %c4_i32 : i32 to index
    %c1_69 = arith.constant 1 : index
    %c0_70 = arith.constant 0 : index
    %c0_71 = arith.constant 0 : index
    %194 = vector.load %arg1[%193, %c1_69, %c0_70, %c0_71] : memref<8x3x16x32xbf16, #tpu.memory_space<vmem>>, vector<1x1x16x32xbf16>
    %195 = vector.shape_cast %194 : vector<1x1x16x32xbf16> to vector<16x32xbf16>
    %196 = arith.extf %195 : vector<16x32xbf16> to vector<16x32xf32>
    %197 = arith.index_cast %c4_i32 : i32 to index
    %c2_72 = arith.constant 2 : index
    %c0_73 = arith.constant 0 : index
    %c0_74 = arith.constant 0 : index
    %198 = vector.load %arg1[%197, %c2_72, %c0_73, %c0_74] : memref<8x3x16x32xbf16, #tpu.memory_space<vmem>>, vector<1x1x16x32xbf16>
    %199 = vector.shape_cast %198 : vector<1x1x16x32xbf16> to vector<16x32xbf16>
    %200 = arith.extf %199 : vector<16x32xbf16> to vector<16x32xf32>
    %201 = arith.truncf %183 : vector<16x32xf32> to vector<16x32xbf16>
    %202 = vector.extract_strided_slice %0 {offsets = [0, 0, 0], sizes = [1, 32, 32], strides = [1, 1, 1]} : vector<3x32x32xbf16> to vector<1x32x32xbf16>
    %203 = vector.shape_cast %202 : vector<1x32x32xbf16> to vector<32x32xbf16>
    %cst_75 = arith.constant dense<0.000000e+00> : vector<16x32xf32>
    %204 = tpu.matmul %201, %203, %cst_75 {dimension_numbers = #tpu.dot_dimension_numbers<[1], [0], [0], [1], [0, 0, 1, 1], [], []>} : vector<16x32xbf16>, vector<32x32xbf16>, vector<16x32xf32> -> vector<16x32xf32>
    %205 = vector.extract_strided_slice %0 {offsets = [1, 0, 0], sizes = [1, 32, 32], strides = [1, 1, 1]} : vector<3x32x32xbf16> to vector<1x32x32xbf16>
    %206 = vector.shape_cast %205 : vector<1x32x32xbf16> to vector<32x32xbf16>
    %cst_76 = arith.constant dense<0.000000e+00> : vector<16x32xf32>
    %207 = tpu.matmul %201, %206, %cst_76 {dimension_numbers = #tpu.dot_dimension_numbers<[1], [0], [0], [1], [0, 0, 1, 1], [], []>} : vector<16x32xbf16>, vector<32x32xbf16>, vector<16x32xf32> -> vector<16x32xf32>
    %208 = vector.extract_strided_slice %0 {offsets = [2, 0, 0], sizes = [1, 32, 32], strides = [1, 1, 1]} : vector<3x32x32xbf16> to vector<1x32x32xbf16>
    %209 = vector.shape_cast %208 : vector<1x32x32xbf16> to vector<32x32xbf16>
    %cst_77 = arith.constant dense<0.000000e+00> : vector<16x32xf32>
    %210 = tpu.matmul %201, %209, %cst_77 {dimension_numbers = #tpu.dot_dimension_numbers<[1], [0], [0], [1], [0, 0, 1, 1], [], []>} : vector<16x32xbf16>, vector<32x32xbf16>, vector<16x32xf32> -> vector<16x32xf32>
    %211 = arith.addf %192, %204 : vector<16x32xf32>
    %212 = arith.negf %211 : vector<16x32xf32>
    %213 = math.exp %212 : vector<16x32xf32>
    %cst_78 = arith.constant 1.000000e+00 : f32
    %214 = vector.broadcast %cst_78 : f32 to vector<16x32xf32>
    %215 = arith.addf %214, %213 : vector<16x32xf32>
    %216 = arith.divf %214, %215 : vector<16x32xf32>
    %217 = arith.addf %196, %207 : vector<16x32xf32>
    %218 = arith.negf %217 : vector<16x32xf32>
    %219 = math.exp %218 : vector<16x32xf32>
    %cst_79 = arith.constant 1.000000e+00 : f32
    %220 = vector.broadcast %cst_79 : f32 to vector<16x32xf32>
    %221 = arith.addf %220, %219 : vector<16x32xf32>
    %222 = arith.divf %220, %221 : vector<16x32xf32>
    %223 = arith.addf %210, %3 : vector<16x32xf32>
    %224 = arith.mulf %216, %223 : vector<16x32xf32>
    %225 = arith.addf %200, %224 : vector<16x32xf32>
    %226 = math.tanh %225 : vector<16x32xf32>
    %227 = arith.subf %183, %226 : vector<16x32xf32>
    %228 = arith.mulf %222, %227 : vector<16x32xf32>
    %229 = arith.addf %226, %228 : vector<16x32xf32>
    %230 = arith.truncf %229 : vector<16x32xf32> to vector<16x32xbf16>
    %231 = arith.index_cast %c4_i32 : i32 to index
    %c0_80 = arith.constant 0 : index
    %c0_81 = arith.constant 0 : index
    %232 = vector.load %arg4[%231, %c0_80, %c0_81] : memref<8x16x32xbf16, #tpu.memory_space<vmem>>, vector<1x16x32xbf16>
    %233 = vector.shape_cast %232 : vector<1x16x32xbf16> to vector<16x32xbf16>
    %234 = vector.shape_cast %230 : vector<16x32xbf16> to vector<1x16x32xbf16>
    tpu.vector_store %arg4[%231, %c0_80, %c0_81], %234 {strides = array<i32>} : memref<8x16x32xbf16, #tpu.memory_space<vmem>>, vector<1x16x32xbf16>,
    %c5_i32 = arith.constant 5 : i32
    %235 = arith.index_cast %c5_i32 : i32 to index
    %c0_82 = arith.constant 0 : index
    %c0_83 = arith.constant 0 : index
    %c0_84 = arith.constant 0 : index
    %236 = vector.load %arg1[%235, %c0_82, %c0_83, %c0_84] : memref<8x3x16x32xbf16, #tpu.memory_space<vmem>>, vector<1x1x16x32xbf16>
    %237 = vector.shape_cast %236 : vector<1x1x16x32xbf16> to vector<16x32xbf16>
    %238 = arith.extf %237 : vector<16x32xbf16> to vector<16x32xf32>
    %239 = arith.index_cast %c5_i32 : i32 to index
    %c1_85 = arith.constant 1 : index
    %c0_86 = arith.constant 0 : index
    %c0_87 = arith.constant 0 : index
    %240 = vector.load %arg1[%239, %c1_85, %c0_86, %c0_87] : memref<8x3x16x32xbf16, #tpu.memory_space<vmem>>, vector<1x1x16x32xbf16>
    %241 = vector.shape_cast %240 : vector<1x1x16x32xbf16> to vector<16x32xbf16>
    %242 = arith.extf %241 : vector<16x32xbf16> to vector<16x32xf32>
    %243 = arith.index_cast %c5_i32 : i32 to index
    %c2_88 = arith.constant 2 : index
    %c0_89 = arith.constant 0 : index
    %c0_90 = arith.constant 0 : index
    %244 = vector.load %arg1[%243, %c2_88, %c0_89, %c0_90] : memref<8x3x16x32xbf16, #tpu.memory_space<vmem>>, vector<1x1x16x32xbf16>
    %245 = vector.shape_cast %244 : vector<1x1x16x32xbf16> to vector<16x32xbf16>
    %246 = arith.extf %245 : vector<16x32xbf16> to vector<16x32xf32>
    %247 = arith.truncf %229 : vector<16x32xf32> to vector<16x32xbf16>
    %248 = vector.extract_strided_slice %0 {offsets = [0, 0, 0], sizes = [1, 32, 32], strides = [1, 1, 1]} : vector<3x32x32xbf16> to vector<1x32x32xbf16>
    %249 = vector.shape_cast %248 : vector<1x32x32xbf16> to vector<32x32xbf16>
    %cst_91 = arith.constant dense<0.000000e+00> : vector<16x32xf32>
    %250 = tpu.matmul %247, %249, %cst_91 {dimension_numbers = #tpu.dot_dimension_numbers<[1], [0], [0], [1], [0, 0, 1, 1], [], []>} : vector<16x32xbf16>, vector<32x32xbf16>, vector<16x32xf32> -> vector<16x32xf32>
    %251 = vector.extract_strided_slice %0 {offsets = [1, 0, 0], sizes = [1, 32, 32], strides = [1, 1, 1]} : vector<3x32x32xbf16> to vector<1x32x32xbf16>
    %252 = vector.shape_cast %251 : vector<1x32x32xbf16> to vector<32x32xbf16>
    %cst_92 = arith.constant dense<0.000000e+00> : vector<16x32xf32>
    %253 = tpu.matmul %247, %252, %cst_92 {dimension_numbers = #tpu.dot_dimension_numbers<[1], [0], [0], [1], [0, 0, 1, 1], [], []>} : vector<16x32xbf16>, vector<32x32xbf16>, vector<16x32xf32> -> vector<16x32xf32>
    %254 = vector.extract_strided_slice %0 {offsets = [2, 0, 0], sizes = [1, 32, 32], strides = [1, 1, 1]} : vector<3x32x32xbf16> to vector<1x32x32xbf16>
    %255 = vector.shape_cast %254 : vector<1x32x32xbf16> to vector<32x32xbf16>
    %cst_93 = arith.constant dense<0.000000e+00> : vector<16x32xf32>
    %256 = tpu.matmul %247, %255, %cst_93 {dimension_numbers = #tpu.dot_dimension_numbers<[1], [0], [0], [1], [0, 0, 1, 1], [], []>} : vector<16x32xbf16>, vector<32x32xbf16>, vector<16x32xf32> -> vector<16x32xf32>
    %257 = arith.addf %238, %250 : vector<16x32xf32>
    %258 = arith.negf %257 : vector<16x32xf32>
    %259 = math.exp %258 : vector<16x32xf32>
    %cst_94 = arith.constant 1.000000e+00 : f32
    %260 = vector.broadcast %cst_94 : f32 to vector<16x32xf32>
    %261 = arith.addf %260, %259 : vector<16x32xf32>
    %262 = arith.divf %260, %261 : vector<16x32xf32>
    %263 = arith.addf %242, %253 : vector<16x32xf32>
    %264 = arith.negf %263 : vector<16x32xf32>
    %265 = math.exp %264 : vector<16x32xf32>
    %cst_95 = arith.constant 1.000000e+00 : f32
    %266 = vector.broadcast %cst_95 : f32 to vector<16x32xf32>
    %267 = arith.addf %266, %265 : vector<16x32xf32>
    %268 = arith.divf %266, %267 : vector<16x32xf32>
    %269 = arith.addf %256, %3 : vector<16x32xf32>
    %270 = arith.mulf %262, %269 : vector<16x32xf32>
    %271 = arith.addf %246, %270 : vector<16x32xf32>
    %272 = math.tanh %271 : vector<16x32xf32>
    %273 = arith.subf %229, %272 : vector<16x32xf32>
    %274 = arith.mulf %268, %273 : vector<16x32xf32>
    %275 = arith.addf %272, %274 : vector<16x32xf32>
    %276 = arith.truncf %275 : vector<16x32xf32> to vector<16x32xbf16>
    %277 = arith.index_cast %c5_i32 : i32 to index
    %c0_96 = arith.constant 0 : index
    %c0_97 = arith.constant 0 : index
    %278 = vector.load %arg4[%277, %c0_96, %c0_97] : memref<8x16x32xbf16, #tpu.memory_space<vmem>>, vector<1x16x32xbf16>
    %279 = vector.shape_cast %278 : vector<1x16x32xbf16> to vector<16x32xbf16>
    %280 = vector.shape_cast %276 : vector<16x32xbf16> to vector<1x16x32xbf16>
    tpu.vector_store %arg4[%277, %c0_96, %c0_97], %280 {strides = array<i32>} : memref<8x16x32xbf16, #tpu.memory_space<vmem>>, vector<1x16x32xbf16>,
    %c6_i32 = arith.constant 6 : i32
    %281 = arith.index_cast %c6_i32 : i32 to index
    %c0_98 = arith.constant 0 : index
    %c0_99 = arith.constant 0 : index
    %c0_100 = arith.constant 0 : index
    %282 = vector.load %arg1[%281, %c0_98, %c0_99, %c0_100] : memref<8x3x16x32xbf16, #tpu.memory_space<vmem>>, vector<1x1x16x32xbf16>
    %283 = vector.shape_cast %282 : vector<1x1x16x32xbf16> to vector<16x32xbf16>
    %284 = arith.extf %283 : vector<16x32xbf16> to vector<16x32xf32>
    %285 = arith.index_cast %c6_i32 : i32 to index
    %c1_101 = arith.constant 1 : index
    %c0_102 = arith.constant 0 : index
    %c0_103 = arith.constant 0 : index
    %286 = vector.load %arg1[%285, %c1_101, %c0_102, %c0_103] : memref<8x3x16x32xbf16, #tpu.memory_space<vmem>>, vector<1x1x16x32xbf16>
    %287 = vector.shape_cast %286 : vector<1x1x16x32xbf16> to vector<16x32xbf16>
    %288 = arith.extf %287 : vector<16x32xbf16> to vector<16x32xf32>
    %289 = arith.index_cast %c6_i32 : i32 to index
    %c2_104 = arith.constant 2 : index
    %c0_105 = arith.constant 0 : index
    %c0_106 = arith.constant 0 : index
    %290 = vector.load %arg1[%289, %c2_104, %c0_105, %c0_106] : memref<8x3x16x32xbf16, #tpu.memory_space<vmem>>, vector<1x1x16x32xbf16>
    %291 = vector.shape_cast %290 : vector<1x1x16x32xbf16> to vector<16x32xbf16>
    %292 = arith.extf %291 : vector<16x32xbf16> to vector<16x32xf32>
    %293 = arith.truncf %275 : vector<16x32xf32> to vector<16x32xbf16>
    %294 = vector.extract_strided_slice %0 {offsets = [0, 0, 0], sizes = [1, 32, 32], strides = [1, 1, 1]} : vector<3x32x32xbf16> to vector<1x32x32xbf16>
    %295 = vector.shape_cast %294 : vector<1x32x32xbf16> to vector<32x32xbf16>
    %cst_107 = arith.constant dense<0.000000e+00> : vector<16x32xf32>
    %296 = tpu.matmul %293, %295, %cst_107 {dimension_numbers = #tpu.dot_dimension_numbers<[1], [0], [0], [1], [0, 0, 1, 1], [], []>} : vector<16x32xbf16>, vector<32x32xbf16>, vector<16x32xf32> -> vector<16x32xf32>
    %297 = vector.extract_strided_slice %0 {offsets = [1, 0, 0], sizes = [1, 32, 32], strides = [1, 1, 1]} : vector<3x32x32xbf16> to vector<1x32x32xbf16>
    %298 = vector.shape_cast %297 : vector<1x32x32xbf16> to vector<32x32xbf16>
    %cst_108 = arith.constant dense<0.000000e+00> : vector<16x32xf32>
    %299 = tpu.matmul %293, %298, %cst_108 {dimension_numbers = #tpu.dot_dimension_numbers<[1], [0], [0], [1], [0, 0, 1, 1], [], []>} : vector<16x32xbf16>, vector<32x32xbf16>, vector<16x32xf32> -> vector<16x32xf32>
    %300 = vector.extract_strided_slice %0 {offsets = [2, 0, 0], sizes = [1, 32, 32], strides = [1, 1, 1]} : vector<3x32x32xbf16> to vector<1x32x32xbf16>
    %301 = vector.shape_cast %300 : vector<1x32x32xbf16> to vector<32x32xbf16>
    %cst_109 = arith.constant dense<0.000000e+00> : vector<16x32xf32>
    %302 = tpu.matmul %293, %301, %cst_109 {dimension_numbers = #tpu.dot_dimension_numbers<[1], [0], [0], [1], [0, 0, 1, 1], [], []>} : vector<16x32xbf16>, vector<32x32xbf16>, vector<16x32xf32> -> vector<16x32xf32>
    %303 = arith.addf %284, %296 : vector<16x32xf32>
    %304 = arith.negf %303 : vector<16x32xf32>
    %305 = math.exp %304 : vector<16x32xf32>
    %cst_110 = arith.constant 1.000000e+00 : f32
    %306 = vector.broadcast %cst_110 : f32 to vector<16x32xf32>
    %307 = arith.addf %306, %305 : vector<16x32xf32>
    %308 = arith.divf %306, %307 : vector<16x32xf32>
    %309 = arith.addf %288, %299 : vector<16x32xf32>
    %310 = arith.negf %309 : vector<16x32xf32>
    %311 = math.exp %310 : vector<16x32xf32>
    %cst_111 = arith.constant 1.000000e+00 : f32
    %312 = vector.broadcast %cst_111 : f32 to vector<16x32xf32>
    %313 = arith.addf %312, %311 : vector<16x32xf32>
    %314 = arith.divf %312, %313 : vector<16x32xf32>
    %315 = arith.addf %302, %3 : vector<16x32xf32>
    %316 = arith.mulf %308, %315 : vector<16x32xf32>
    %317 = arith.addf %292, %316 : vector<16x32xf32>
    %318 = math.tanh %317 : vector<16x32xf32>
    %319 = arith.subf %275, %318 : vector<16x32xf32>
    %320 = arith.mulf %314, %319 : vector<16x32xf32>
    %321 = arith.addf %318, %320 : vector<16x32xf32>
    %322 = arith.truncf %321 : vector<16x32xf32> to vector<16x32xbf16>
    %323 = arith.index_cast %c6_i32 : i32 to index
    %c0_112 = arith.constant 0 : index
    %c0_113 = arith.constant 0 : index
    %324 = vector.load %arg4[%323, %c0_112, %c0_113] : memref<8x16x32xbf16, #tpu.memory_space<vmem>>, vector<1x16x32xbf16>
    %325 = vector.shape_cast %324 : vector<1x16x32xbf16> to vector<16x32xbf16>
    %326 = vector.shape_cast %322 : vector<16x32xbf16> to vector<1x16x32xbf16>
    tpu.vector_store %arg4[%323, %c0_112, %c0_113], %326 {strides = array<i32>} : memref<8x16x32xbf16, #tpu.memory_space<vmem>>, vector<1x16x32xbf16>,
    %c7_i32 = arith.constant 7 : i32
    %327 = arith.index_cast %c7_i32 : i32 to index
    %c0_114 = arith.constant 0 : index
    %c0_115 = arith.constant 0 : index
    %c0_116 = arith.constant 0 : index
    %328 = vector.load %arg1[%327, %c0_114, %c0_115, %c0_116] : memref<8x3x16x32xbf16, #tpu.memory_space<vmem>>, vector<1x1x16x32xbf16>
    %329 = vector.shape_cast %328 : vector<1x1x16x32xbf16> to vector<16x32xbf16>
    %330 = arith.extf %329 : vector<16x32xbf16> to vector<16x32xf32>
    %331 = arith.index_cast %c7_i32 : i32 to index
    %c1_117 = arith.constant 1 : index
    %c0_118 = arith.constant 0 : index
    %c0_119 = arith.constant 0 : index
    %332 = vector.load %arg1[%331, %c1_117, %c0_118, %c0_119] : memref<8x3x16x32xbf16, #tpu.memory_space<vmem>>, vector<1x1x16x32xbf16>
    %333 = vector.shape_cast %332 : vector<1x1x16x32xbf16> to vector<16x32xbf16>
    %334 = arith.extf %333 : vector<16x32xbf16> to vector<16x32xf32>
    %335 = arith.index_cast %c7_i32 : i32 to index
    %c2_120 = arith.constant 2 : index
    %c0_121 = arith.constant 0 : index
    %c0_122 = arith.constant 0 : index
    %336 = vector.load %arg1[%335, %c2_120, %c0_121, %c0_122] : memref<8x3x16x32xbf16, #tpu.memory_space<vmem>>, vector<1x1x16x32xbf16>
    %337 = vector.shape_cast %336 : vector<1x1x16x32xbf16> to vector<16x32xbf16>
    %338 = arith.extf %337 : vector<16x32xbf16> to vector<16x32xf32>
    %339 = arith.truncf %321 : vector<16x32xf32> to vector<16x32xbf16>
    %340 = vector.extract_strided_slice %0 {offsets = [0, 0, 0], sizes = [1, 32, 32], strides = [1, 1, 1]} : vector<3x32x32xbf16> to vector<1x32x32xbf16>
    %341 = vector.shape_cast %340 : vector<1x32x32xbf16> to vector<32x32xbf16>
    %cst_123 = arith.constant dense<0.000000e+00> : vector<16x32xf32>
    %342 = tpu.matmul %339, %341, %cst_123 {dimension_numbers = #tpu.dot_dimension_numbers<[1], [0], [0], [1], [0, 0, 1, 1], [], []>} : vector<16x32xbf16>, vector<32x32xbf16>, vector<16x32xf32> -> vector<16x32xf32>
    %343 = vector.extract_strided_slice %0 {offsets = [1, 0, 0], sizes = [1, 32, 32], strides = [1, 1, 1]} : vector<3x32x32xbf16> to vector<1x32x32xbf16>
    %344 = vector.shape_cast %343 : vector<1x32x32xbf16> to vector<32x32xbf16>
    %cst_124 = arith.constant dense<0.000000e+00> : vector<16x32xf32>
    %345 = tpu.matmul %339, %344, %cst_124 {dimension_numbers = #tpu.dot_dimension_numbers<[1], [0], [0], [1], [0, 0, 1, 1], [], []>} : vector<16x32xbf16>, vector<32x32xbf16>, vector<16x32xf32> -> vector<16x32xf32>
    %346 = vector.extract_strided_slice %0 {offsets = [2, 0, 0], sizes = [1, 32, 32], strides = [1, 1, 1]} : vector<3x32x32xbf16> to vector<1x32x32xbf16>
    %347 = vector.shape_cast %346 : vector<1x32x32xbf16> to vector<32x32xbf16>
    %cst_125 = arith.constant dense<0.000000e+00> : vector<16x32xf32>
    %348 = tpu.matmul %339, %347, %cst_125 {dimension_numbers = #tpu.dot_dimension_numbers<[1], [0], [0], [1], [0, 0, 1, 1], [], []>} : vector<16x32xbf16>, vector<32x32xbf16>, vector<16x32xf32> -> vector<16x32xf32>
    %349 = arith.addf %330, %342 : vector<16x32xf32>
    %350 = arith.negf %349 : vector<16x32xf32>
    %351 = math.exp %350 : vector<16x32xf32>
    %cst_126 = arith.constant 1.000000e+00 : f32
    %352 = vector.broadcast %cst_126 : f32 to vector<16x32xf32>
    %353 = arith.addf %352, %351 : vector<16x32xf32>
    %354 = arith.divf %352, %353 : vector<16x32xf32>
    %355 = arith.addf %334, %345 : vector<16x32xf32>
    %356 = arith.negf %355 : vector<16x32xf32>
    %357 = math.exp %356 : vector<16x32xf32>
    %cst_127 = arith.constant 1.000000e+00 : f32
    %358 = vector.broadcast %cst_127 : f32 to vector<16x32xf32>
    %359 = arith.addf %358, %357 : vector<16x32xf32>
    %360 = arith.divf %358, %359 : vector<16x32xf32>
    %361 = arith.addf %348, %3 : vector<16x32xf32>
    %362 = arith.mulf %354, %361 : vector<16x32xf32>
    %363 = arith.addf %338, %362 : vector<16x32xf32>
    %364 = math.tanh %363 : vector<16x32xf32>
    %365 = arith.subf %321, %364 : vector<16x32xf32>
    %366 = arith.mulf %360, %365 : vector<16x32xf32>
    %367 = arith.addf %364, %366 : vector<16x32xf32>
    %368 = arith.truncf %367 : vector<16x32xf32> to vector<16x32xbf16>
    %369 = arith.index_cast %c7_i32 : i32 to index
    %c0_128 = arith.constant 0 : index
    %c0_129 = arith.constant 0 : index
    %370 = vector.load %arg4[%369, %c0_128, %c0_129] : memref<8x16x32xbf16, #tpu.memory_space<vmem>>, vector<1x16x32xbf16>
    %371 = vector.shape_cast %370 : vector<1x16x32xbf16> to vector<16x32xbf16>
    %372 = vector.shape_cast %368 : vector<16x32xbf16> to vector<1x16x32xbf16>
    tpu.vector_store %arg4[%369, %c0_128, %c0_129], %372 {strides = array<i32>} : memref<8x16x32xbf16, #tpu.memory_space<vmem>>, vector<1x16x32xbf16>,
    %c8_i32 = arith.constant 8 : i32
    return
  }
  func.func @transform_0(%arg0: i32) -> (i32, i32, i32, i32) {
    %c0_i32 = arith.constant 0 : i32
    %c0_i32_0 = arith.constant 0 : i32
    %c0_i32_1 = arith.constant 0 : i32
    %c0_i32_2 = arith.constant 0 : i32
    return %c0_i32, %c0_i32_0, %arg0, %c0_i32_1 : i32, i32, i32, i32
  }
  func.func @transform_1(%arg0: i32) -> (i32, i32, i32) {
    %c0_i32 = arith.constant 0 : i32
    %c0_i32_0 = arith.constant 0 : i32
    %c0_i32_1 = arith.constant 0 : i32
    %c0_i32_2 = arith.constant 0 : i32
    return %c0_i32, %c0_i32_0, %c0_i32_1 : i32, i32, i32
  }
  func.func @transform_2(%arg0: i32) -> (i32, i32) {
    %c0_i32 = arith.constant 0 : i32
    %c0_i32_0 = arith.constant 0 : i32
    %c0_i32_1 = arith.constant 0 : i32
    return %c0_i32, %c0_i32_0 : i32, i32
  }
  func.func @transform_3(%arg0: i32) -> (i32, i32, i32) {
    %c0_i32 = arith.constant 0 : i32
    %c0_i32_0 = arith.constant 0 : i32
    %c0_i32_1 = arith.constant 0 : i32
    return %c0_i32, %arg0, %c0_i32_0 : i32, i32, i32
  }
}

module attributes {stable_mosaic.version = 11 : i64} {
  func.func @_gru_recurrence_kernel(%arg0: i32, %arg1: memref<8x3x16x32xbf16, #tpu.memory_space<vmem>>, %arg2: memref<3x32x32xbf16, #tpu.memory_space<vmem>>, %arg3: memref<1x32xf32, #tpu.memory_space<vmem>>, %arg4: memref<16x32xf32, #tpu.memory_space<vmem>>) attributes {dimension_semantics = [#tpu.dimension_semantics<parallel>], iteration_bounds = array<i64: 1>, scalar_prefetch = 0 : i64, scratch_operands = 0 : i64, tpu.core_type = #tpu.core_type<tc>, window_params = [{transform_indices = @transform_0, window_bounds = array<i64: 8, 3, 16, 32>}, {pipeline_mode = #tpu.pipeline_mode<synchronous>, transform_indices = @transform_1, window_bounds = array<i64: 3, 32, 32>}, {pipeline_mode = #tpu.pipeline_mode<synchronous>, transform_indices = @transform_2, window_bounds = array<i64: 1, 32>}, {transform_indices = @transform_3, window_bounds = array<i64: 16, 32>}]} {
    %c0 = arith.constant 0 : index
    %c0_0 = arith.constant 0 : index
    %c0_1 = arith.constant 0 : index
    %0 = vector.load %arg2[%c0, %c0_0, %c0_1] : memref<3x32x32xbf16, #tpu.memory_space<vmem>>, vector<3x32x32xbf16>
    %c0_2 = arith.constant 0 : index
    %c0_3 = arith.constant 0 : index
    %1 = vector.load %arg3[%c0_2, %c0_3] : memref<1x32xf32, #tpu.memory_space<vmem>>, vector<1x32xf32>
    %2 = vector.shape_cast %1 : vector<1x32xf32> to vector<1x32xf32>
    %3 = vector.broadcast %2 : vector<1x32xf32> to vector<16x32xf32>
    %cst = arith.constant 0.000000e+00 : f32
    %4 = vector.broadcast %cst : f32 to vector<16x32xf32>
    %c0_i32 = arith.constant 0 : i32
    %5 = arith.index_cast %c0_i32 : i32 to index
    %c0_4 = arith.constant 0 : index
    %c0_5 = arith.constant 0 : index
    %c0_6 = arith.constant 0 : index
    %6 = vector.load %arg1[%5, %c0_4, %c0_5, %c0_6] : memref<8x3x16x32xbf16, #tpu.memory_space<vmem>>, vector<1x1x16x32xbf16>
    %7 = vector.shape_cast %6 : vector<1x1x16x32xbf16> to vector<16x32xbf16>
    %8 = arith.extf %7 : vector<16x32xbf16> to vector<16x32xf32>
    %9 = arith.index_cast %c0_i32 : i32 to index
    %c1 = arith.constant 1 : index
    %c0_7 = arith.constant 0 : index
    %c0_8 = arith.constant 0 : index
    %10 = vector.load %arg1[%9, %c1, %c0_7, %c0_8] : memref<8x3x16x32xbf16, #tpu.memory_space<vmem>>, vector<1x1x16x32xbf16>
    %11 = vector.shape_cast %10 : vector<1x1x16x32xbf16> to vector<16x32xbf16>
    %12 = arith.extf %11 : vector<16x32xbf16> to vector<16x32xf32>
    %13 = arith.index_cast %c0_i32 : i32 to index
    %c2 = arith.constant 2 : index
    %c0_9 = arith.constant 0 : index
    %c0_10 = arith.constant 0 : index
    %14 = vector.load %arg1[%13, %c2, %c0_9, %c0_10] : memref<8x3x16x32xbf16, #tpu.memory_space<vmem>>, vector<1x1x16x32xbf16>
    %15 = vector.shape_cast %14 : vector<1x1x16x32xbf16> to vector<16x32xbf16>
    %16 = arith.extf %15 : vector<16x32xbf16> to vector<16x32xf32>
    %17 = arith.truncf %4 : vector<16x32xf32> to vector<16x32xbf16>
    %18 = vector.extract_strided_slice %0 {offsets = [0, 0, 0], sizes = [1, 32, 32], strides = [1, 1, 1]} : vector<3x32x32xbf16> to vector<1x32x32xbf16>
    %19 = vector.shape_cast %18 : vector<1x32x32xbf16> to vector<32x32xbf16>
    %cst_11 = arith.constant dense<0.000000e+00> : vector<16x32xf32>
    %20 = tpu.matmul %17, %19, %cst_11 {dimension_numbers = #tpu.dot_dimension_numbers<[1], [0], [0], [1], [0, 0, 1, 1], [], []>} : vector<16x32xbf16>, vector<32x32xbf16>, vector<16x32xf32> -> vector<16x32xf32>
    %21 = vector.extract_strided_slice %0 {offsets = [1, 0, 0], sizes = [1, 32, 32], strides = [1, 1, 1]} : vector<3x32x32xbf16> to vector<1x32x32xbf16>
    %22 = vector.shape_cast %21 : vector<1x32x32xbf16> to vector<32x32xbf16>
    %cst_12 = arith.constant dense<0.000000e+00> : vector<16x32xf32>
    %23 = tpu.matmul %17, %22, %cst_12 {dimension_numbers = #tpu.dot_dimension_numbers<[1], [0], [0], [1], [0, 0, 1, 1], [], []>} : vector<16x32xbf16>, vector<32x32xbf16>, vector<16x32xf32> -> vector<16x32xf32>
    %24 = vector.extract_strided_slice %0 {offsets = [2, 0, 0], sizes = [1, 32, 32], strides = [1, 1, 1]} : vector<3x32x32xbf16> to vector<1x32x32xbf16>
    %25 = vector.shape_cast %24 : vector<1x32x32xbf16> to vector<32x32xbf16>
    %cst_13 = arith.constant dense<0.000000e+00> : vector<16x32xf32>
    %26 = tpu.matmul %17, %25, %cst_13 {dimension_numbers = #tpu.dot_dimension_numbers<[1], [0], [0], [1], [0, 0, 1, 1], [], []>} : vector<16x32xbf16>, vector<32x32xbf16>, vector<16x32xf32> -> vector<16x32xf32>
    %27 = arith.addf %8, %20 : vector<16x32xf32>
    %28 = arith.negf %27 : vector<16x32xf32>
    %29 = math.exp %28 : vector<16x32xf32>
    %cst_14 = arith.constant 1.000000e+00 : f32
    %30 = vector.broadcast %cst_14 : f32 to vector<16x32xf32>
    %31 = arith.addf %30, %29 : vector<16x32xf32>
    %32 = arith.divf %30, %31 : vector<16x32xf32>
    %33 = arith.addf %12, %23 : vector<16x32xf32>
    %34 = arith.negf %33 : vector<16x32xf32>
    %35 = math.exp %34 : vector<16x32xf32>
    %cst_15 = arith.constant 1.000000e+00 : f32
    %36 = vector.broadcast %cst_15 : f32 to vector<16x32xf32>
    %37 = arith.addf %36, %35 : vector<16x32xf32>
    %38 = arith.divf %36, %37 : vector<16x32xf32>
    %39 = arith.addf %26, %3 : vector<16x32xf32>
    %40 = arith.mulf %32, %39 : vector<16x32xf32>
    %41 = arith.addf %16, %40 : vector<16x32xf32>
    %42 = math.tanh %41 : vector<16x32xf32>
    %43 = arith.subf %4, %42 : vector<16x32xf32>
    %44 = arith.mulf %38, %43 : vector<16x32xf32>
    %45 = arith.addf %42, %44 : vector<16x32xf32>
    %c1_i32 = arith.constant 1 : i32
    %46 = arith.index_cast %c1_i32 : i32 to index
    %c0_16 = arith.constant 0 : index
    %c0_17 = arith.constant 0 : index
    %c0_18 = arith.constant 0 : index
    %47 = vector.load %arg1[%46, %c0_16, %c0_17, %c0_18] : memref<8x3x16x32xbf16, #tpu.memory_space<vmem>>, vector<1x1x16x32xbf16>
    %48 = vector.shape_cast %47 : vector<1x1x16x32xbf16> to vector<16x32xbf16>
    %49 = arith.extf %48 : vector<16x32xbf16> to vector<16x32xf32>
    %50 = arith.index_cast %c1_i32 : i32 to index
    %c1_19 = arith.constant 1 : index
    %c0_20 = arith.constant 0 : index
    %c0_21 = arith.constant 0 : index
    %51 = vector.load %arg1[%50, %c1_19, %c0_20, %c0_21] : memref<8x3x16x32xbf16, #tpu.memory_space<vmem>>, vector<1x1x16x32xbf16>
    %52 = vector.shape_cast %51 : vector<1x1x16x32xbf16> to vector<16x32xbf16>
    %53 = arith.extf %52 : vector<16x32xbf16> to vector<16x32xf32>
    %54 = arith.index_cast %c1_i32 : i32 to index
    %c2_22 = arith.constant 2 : index
    %c0_23 = arith.constant 0 : index
    %c0_24 = arith.constant 0 : index
    %55 = vector.load %arg1[%54, %c2_22, %c0_23, %c0_24] : memref<8x3x16x32xbf16, #tpu.memory_space<vmem>>, vector<1x1x16x32xbf16>
    %56 = vector.shape_cast %55 : vector<1x1x16x32xbf16> to vector<16x32xbf16>
    %57 = arith.extf %56 : vector<16x32xbf16> to vector<16x32xf32>
    %58 = arith.truncf %45 : vector<16x32xf32> to vector<16x32xbf16>
    %59 = vector.extract_strided_slice %0 {offsets = [0, 0, 0], sizes = [1, 32, 32], strides = [1, 1, 1]} : vector<3x32x32xbf16> to vector<1x32x32xbf16>
    %60 = vector.shape_cast %59 : vector<1x32x32xbf16> to vector<32x32xbf16>
    %cst_25 = arith.constant dense<0.000000e+00> : vector<16x32xf32>
    %61 = tpu.matmul %58, %60, %cst_25 {dimension_numbers = #tpu.dot_dimension_numbers<[1], [0], [0], [1], [0, 0, 1, 1], [], []>} : vector<16x32xbf16>, vector<32x32xbf16>, vector<16x32xf32> -> vector<16x32xf32>
    %62 = vector.extract_strided_slice %0 {offsets = [1, 0, 0], sizes = [1, 32, 32], strides = [1, 1, 1]} : vector<3x32x32xbf16> to vector<1x32x32xbf16>
    %63 = vector.shape_cast %62 : vector<1x32x32xbf16> to vector<32x32xbf16>
    %cst_26 = arith.constant dense<0.000000e+00> : vector<16x32xf32>
    %64 = tpu.matmul %58, %63, %cst_26 {dimension_numbers = #tpu.dot_dimension_numbers<[1], [0], [0], [1], [0, 0, 1, 1], [], []>} : vector<16x32xbf16>, vector<32x32xbf16>, vector<16x32xf32> -> vector<16x32xf32>
    %65 = vector.extract_strided_slice %0 {offsets = [2, 0, 0], sizes = [1, 32, 32], strides = [1, 1, 1]} : vector<3x32x32xbf16> to vector<1x32x32xbf16>
    %66 = vector.shape_cast %65 : vector<1x32x32xbf16> to vector<32x32xbf16>
    %cst_27 = arith.constant dense<0.000000e+00> : vector<16x32xf32>
    %67 = tpu.matmul %58, %66, %cst_27 {dimension_numbers = #tpu.dot_dimension_numbers<[1], [0], [0], [1], [0, 0, 1, 1], [], []>} : vector<16x32xbf16>, vector<32x32xbf16>, vector<16x32xf32> -> vector<16x32xf32>
    %68 = arith.addf %49, %61 : vector<16x32xf32>
    %69 = arith.negf %68 : vector<16x32xf32>
    %70 = math.exp %69 : vector<16x32xf32>
    %cst_28 = arith.constant 1.000000e+00 : f32
    %71 = vector.broadcast %cst_28 : f32 to vector<16x32xf32>
    %72 = arith.addf %71, %70 : vector<16x32xf32>
    %73 = arith.divf %71, %72 : vector<16x32xf32>
    %74 = arith.addf %53, %64 : vector<16x32xf32>
    %75 = arith.negf %74 : vector<16x32xf32>
    %76 = math.exp %75 : vector<16x32xf32>
    %cst_29 = arith.constant 1.000000e+00 : f32
    %77 = vector.broadcast %cst_29 : f32 to vector<16x32xf32>
    %78 = arith.addf %77, %76 : vector<16x32xf32>
    %79 = arith.divf %77, %78 : vector<16x32xf32>
    %80 = arith.addf %67, %3 : vector<16x32xf32>
    %81 = arith.mulf %73, %80 : vector<16x32xf32>
    %82 = arith.addf %57, %81 : vector<16x32xf32>
    %83 = math.tanh %82 : vector<16x32xf32>
    %84 = arith.subf %45, %83 : vector<16x32xf32>
    %85 = arith.mulf %79, %84 : vector<16x32xf32>
    %86 = arith.addf %83, %85 : vector<16x32xf32>
    %c2_i32 = arith.constant 2 : i32
    %87 = arith.index_cast %c2_i32 : i32 to index
    %c0_30 = arith.constant 0 : index
    %c0_31 = arith.constant 0 : index
    %c0_32 = arith.constant 0 : index
    %88 = vector.load %arg1[%87, %c0_30, %c0_31, %c0_32] : memref<8x3x16x32xbf16, #tpu.memory_space<vmem>>, vector<1x1x16x32xbf16>
    %89 = vector.shape_cast %88 : vector<1x1x16x32xbf16> to vector<16x32xbf16>
    %90 = arith.extf %89 : vector<16x32xbf16> to vector<16x32xf32>
    %91 = arith.index_cast %c2_i32 : i32 to index
    %c1_33 = arith.constant 1 : index
    %c0_34 = arith.constant 0 : index
    %c0_35 = arith.constant 0 : index
    %92 = vector.load %arg1[%91, %c1_33, %c0_34, %c0_35] : memref<8x3x16x32xbf16, #tpu.memory_space<vmem>>, vector<1x1x16x32xbf16>
    %93 = vector.shape_cast %92 : vector<1x1x16x32xbf16> to vector<16x32xbf16>
    %94 = arith.extf %93 : vector<16x32xbf16> to vector<16x32xf32>
    %95 = arith.index_cast %c2_i32 : i32 to index
    %c2_36 = arith.constant 2 : index
    %c0_37 = arith.constant 0 : index
    %c0_38 = arith.constant 0 : index
    %96 = vector.load %arg1[%95, %c2_36, %c0_37, %c0_38] : memref<8x3x16x32xbf16, #tpu.memory_space<vmem>>, vector<1x1x16x32xbf16>
    %97 = vector.shape_cast %96 : vector<1x1x16x32xbf16> to vector<16x32xbf16>
    %98 = arith.extf %97 : vector<16x32xbf16> to vector<16x32xf32>
    %99 = arith.truncf %86 : vector<16x32xf32> to vector<16x32xbf16>
    %100 = vector.extract_strided_slice %0 {offsets = [0, 0, 0], sizes = [1, 32, 32], strides = [1, 1, 1]} : vector<3x32x32xbf16> to vector<1x32x32xbf16>
    %101 = vector.shape_cast %100 : vector<1x32x32xbf16> to vector<32x32xbf16>
    %cst_39 = arith.constant dense<0.000000e+00> : vector<16x32xf32>
    %102 = tpu.matmul %99, %101, %cst_39 {dimension_numbers = #tpu.dot_dimension_numbers<[1], [0], [0], [1], [0, 0, 1, 1], [], []>} : vector<16x32xbf16>, vector<32x32xbf16>, vector<16x32xf32> -> vector<16x32xf32>
    %103 = vector.extract_strided_slice %0 {offsets = [1, 0, 0], sizes = [1, 32, 32], strides = [1, 1, 1]} : vector<3x32x32xbf16> to vector<1x32x32xbf16>
    %104 = vector.shape_cast %103 : vector<1x32x32xbf16> to vector<32x32xbf16>
    %cst_40 = arith.constant dense<0.000000e+00> : vector<16x32xf32>
    %105 = tpu.matmul %99, %104, %cst_40 {dimension_numbers = #tpu.dot_dimension_numbers<[1], [0], [0], [1], [0, 0, 1, 1], [], []>} : vector<16x32xbf16>, vector<32x32xbf16>, vector<16x32xf32> -> vector<16x32xf32>
    %106 = vector.extract_strided_slice %0 {offsets = [2, 0, 0], sizes = [1, 32, 32], strides = [1, 1, 1]} : vector<3x32x32xbf16> to vector<1x32x32xbf16>
    %107 = vector.shape_cast %106 : vector<1x32x32xbf16> to vector<32x32xbf16>
    %cst_41 = arith.constant dense<0.000000e+00> : vector<16x32xf32>
    %108 = tpu.matmul %99, %107, %cst_41 {dimension_numbers = #tpu.dot_dimension_numbers<[1], [0], [0], [1], [0, 0, 1, 1], [], []>} : vector<16x32xbf16>, vector<32x32xbf16>, vector<16x32xf32> -> vector<16x32xf32>
    %109 = arith.addf %90, %102 : vector<16x32xf32>
    %110 = arith.negf %109 : vector<16x32xf32>
    %111 = math.exp %110 : vector<16x32xf32>
    %cst_42 = arith.constant 1.000000e+00 : f32
    %112 = vector.broadcast %cst_42 : f32 to vector<16x32xf32>
    %113 = arith.addf %112, %111 : vector<16x32xf32>
    %114 = arith.divf %112, %113 : vector<16x32xf32>
    %115 = arith.addf %94, %105 : vector<16x32xf32>
    %116 = arith.negf %115 : vector<16x32xf32>
    %117 = math.exp %116 : vector<16x32xf32>
    %cst_43 = arith.constant 1.000000e+00 : f32
    %118 = vector.broadcast %cst_43 : f32 to vector<16x32xf32>
    %119 = arith.addf %118, %117 : vector<16x32xf32>
    %120 = arith.divf %118, %119 : vector<16x32xf32>
    %121 = arith.addf %108, %3 : vector<16x32xf32>
    %122 = arith.mulf %114, %121 : vector<16x32xf32>
    %123 = arith.addf %98, %122 : vector<16x32xf32>
    %124 = math.tanh %123 : vector<16x32xf32>
    %125 = arith.subf %86, %124 : vector<16x32xf32>
    %126 = arith.mulf %120, %125 : vector<16x32xf32>
    %127 = arith.addf %124, %126 : vector<16x32xf32>
    %c3_i32 = arith.constant 3 : i32
    %128 = arith.index_cast %c3_i32 : i32 to index
    %c0_44 = arith.constant 0 : index
    %c0_45 = arith.constant 0 : index
    %c0_46 = arith.constant 0 : index
    %129 = vector.load %arg1[%128, %c0_44, %c0_45, %c0_46] : memref<8x3x16x32xbf16, #tpu.memory_space<vmem>>, vector<1x1x16x32xbf16>
    %130 = vector.shape_cast %129 : vector<1x1x16x32xbf16> to vector<16x32xbf16>
    %131 = arith.extf %130 : vector<16x32xbf16> to vector<16x32xf32>
    %132 = arith.index_cast %c3_i32 : i32 to index
    %c1_47 = arith.constant 1 : index
    %c0_48 = arith.constant 0 : index
    %c0_49 = arith.constant 0 : index
    %133 = vector.load %arg1[%132, %c1_47, %c0_48, %c0_49] : memref<8x3x16x32xbf16, #tpu.memory_space<vmem>>, vector<1x1x16x32xbf16>
    %134 = vector.shape_cast %133 : vector<1x1x16x32xbf16> to vector<16x32xbf16>
    %135 = arith.extf %134 : vector<16x32xbf16> to vector<16x32xf32>
    %136 = arith.index_cast %c3_i32 : i32 to index
    %c2_50 = arith.constant 2 : index
    %c0_51 = arith.constant 0 : index
    %c0_52 = arith.constant 0 : index
    %137 = vector.load %arg1[%136, %c2_50, %c0_51, %c0_52] : memref<8x3x16x32xbf16, #tpu.memory_space<vmem>>, vector<1x1x16x32xbf16>
    %138 = vector.shape_cast %137 : vector<1x1x16x32xbf16> to vector<16x32xbf16>
    %139 = arith.extf %138 : vector<16x32xbf16> to vector<16x32xf32>
    %140 = arith.truncf %127 : vector<16x32xf32> to vector<16x32xbf16>
    %141 = vector.extract_strided_slice %0 {offsets = [0, 0, 0], sizes = [1, 32, 32], strides = [1, 1, 1]} : vector<3x32x32xbf16> to vector<1x32x32xbf16>
    %142 = vector.shape_cast %141 : vector<1x32x32xbf16> to vector<32x32xbf16>
    %cst_53 = arith.constant dense<0.000000e+00> : vector<16x32xf32>
    %143 = tpu.matmul %140, %142, %cst_53 {dimension_numbers = #tpu.dot_dimension_numbers<[1], [0], [0], [1], [0, 0, 1, 1], [], []>} : vector<16x32xbf16>, vector<32x32xbf16>, vector<16x32xf32> -> vector<16x32xf32>
    %144 = vector.extract_strided_slice %0 {offsets = [1, 0, 0], sizes = [1, 32, 32], strides = [1, 1, 1]} : vector<3x32x32xbf16> to vector<1x32x32xbf16>
    %145 = vector.shape_cast %144 : vector<1x32x32xbf16> to vector<32x32xbf16>
    %cst_54 = arith.constant dense<0.000000e+00> : vector<16x32xf32>
    %146 = tpu.matmul %140, %145, %cst_54 {dimension_numbers = #tpu.dot_dimension_numbers<[1], [0], [0], [1], [0, 0, 1, 1], [], []>} : vector<16x32xbf16>, vector<32x32xbf16>, vector<16x32xf32> -> vector<16x32xf32>
    %147 = vector.extract_strided_slice %0 {offsets = [2, 0, 0], sizes = [1, 32, 32], strides = [1, 1, 1]} : vector<3x32x32xbf16> to vector<1x32x32xbf16>
    %148 = vector.shape_cast %147 : vector<1x32x32xbf16> to vector<32x32xbf16>
    %cst_55 = arith.constant dense<0.000000e+00> : vector<16x32xf32>
    %149 = tpu.matmul %140, %148, %cst_55 {dimension_numbers = #tpu.dot_dimension_numbers<[1], [0], [0], [1], [0, 0, 1, 1], [], []>} : vector<16x32xbf16>, vector<32x32xbf16>, vector<16x32xf32> -> vector<16x32xf32>
    %150 = arith.addf %131, %143 : vector<16x32xf32>
    %151 = arith.negf %150 : vector<16x32xf32>
    %152 = math.exp %151 : vector<16x32xf32>
    %cst_56 = arith.constant 1.000000e+00 : f32
    %153 = vector.broadcast %cst_56 : f32 to vector<16x32xf32>
    %154 = arith.addf %153, %152 : vector<16x32xf32>
    %155 = arith.divf %153, %154 : vector<16x32xf32>
    %156 = arith.addf %135, %146 : vector<16x32xf32>
    %157 = arith.negf %156 : vector<16x32xf32>
    %158 = math.exp %157 : vector<16x32xf32>
    %cst_57 = arith.constant 1.000000e+00 : f32
    %159 = vector.broadcast %cst_57 : f32 to vector<16x32xf32>
    %160 = arith.addf %159, %158 : vector<16x32xf32>
    %161 = arith.divf %159, %160 : vector<16x32xf32>
    %162 = arith.addf %149, %3 : vector<16x32xf32>
    %163 = arith.mulf %155, %162 : vector<16x32xf32>
    %164 = arith.addf %139, %163 : vector<16x32xf32>
    %165 = math.tanh %164 : vector<16x32xf32>
    %166 = arith.subf %127, %165 : vector<16x32xf32>
    %167 = arith.mulf %161, %166 : vector<16x32xf32>
    %168 = arith.addf %165, %167 : vector<16x32xf32>
    %c4_i32 = arith.constant 4 : i32
    %169 = arith.index_cast %c4_i32 : i32 to index
    %c0_58 = arith.constant 0 : index
    %c0_59 = arith.constant 0 : index
    %c0_60 = arith.constant 0 : index
    %170 = vector.load %arg1[%169, %c0_58, %c0_59, %c0_60] : memref<8x3x16x32xbf16, #tpu.memory_space<vmem>>, vector<1x1x16x32xbf16>
    %171 = vector.shape_cast %170 : vector<1x1x16x32xbf16> to vector<16x32xbf16>
    %172 = arith.extf %171 : vector<16x32xbf16> to vector<16x32xf32>
    %173 = arith.index_cast %c4_i32 : i32 to index
    %c1_61 = arith.constant 1 : index
    %c0_62 = arith.constant 0 : index
    %c0_63 = arith.constant 0 : index
    %174 = vector.load %arg1[%173, %c1_61, %c0_62, %c0_63] : memref<8x3x16x32xbf16, #tpu.memory_space<vmem>>, vector<1x1x16x32xbf16>
    %175 = vector.shape_cast %174 : vector<1x1x16x32xbf16> to vector<16x32xbf16>
    %176 = arith.extf %175 : vector<16x32xbf16> to vector<16x32xf32>
    %177 = arith.index_cast %c4_i32 : i32 to index
    %c2_64 = arith.constant 2 : index
    %c0_65 = arith.constant 0 : index
    %c0_66 = arith.constant 0 : index
    %178 = vector.load %arg1[%177, %c2_64, %c0_65, %c0_66] : memref<8x3x16x32xbf16, #tpu.memory_space<vmem>>, vector<1x1x16x32xbf16>
    %179 = vector.shape_cast %178 : vector<1x1x16x32xbf16> to vector<16x32xbf16>
    %180 = arith.extf %179 : vector<16x32xbf16> to vector<16x32xf32>
    %181 = arith.truncf %168 : vector<16x32xf32> to vector<16x32xbf16>
    %182 = vector.extract_strided_slice %0 {offsets = [0, 0, 0], sizes = [1, 32, 32], strides = [1, 1, 1]} : vector<3x32x32xbf16> to vector<1x32x32xbf16>
    %183 = vector.shape_cast %182 : vector<1x32x32xbf16> to vector<32x32xbf16>
    %cst_67 = arith.constant dense<0.000000e+00> : vector<16x32xf32>
    %184 = tpu.matmul %181, %183, %cst_67 {dimension_numbers = #tpu.dot_dimension_numbers<[1], [0], [0], [1], [0, 0, 1, 1], [], []>} : vector<16x32xbf16>, vector<32x32xbf16>, vector<16x32xf32> -> vector<16x32xf32>
    %185 = vector.extract_strided_slice %0 {offsets = [1, 0, 0], sizes = [1, 32, 32], strides = [1, 1, 1]} : vector<3x32x32xbf16> to vector<1x32x32xbf16>
    %186 = vector.shape_cast %185 : vector<1x32x32xbf16> to vector<32x32xbf16>
    %cst_68 = arith.constant dense<0.000000e+00> : vector<16x32xf32>
    %187 = tpu.matmul %181, %186, %cst_68 {dimension_numbers = #tpu.dot_dimension_numbers<[1], [0], [0], [1], [0, 0, 1, 1], [], []>} : vector<16x32xbf16>, vector<32x32xbf16>, vector<16x32xf32> -> vector<16x32xf32>
    %188 = vector.extract_strided_slice %0 {offsets = [2, 0, 0], sizes = [1, 32, 32], strides = [1, 1, 1]} : vector<3x32x32xbf16> to vector<1x32x32xbf16>
    %189 = vector.shape_cast %188 : vector<1x32x32xbf16> to vector<32x32xbf16>
    %cst_69 = arith.constant dense<0.000000e+00> : vector<16x32xf32>
    %190 = tpu.matmul %181, %189, %cst_69 {dimension_numbers = #tpu.dot_dimension_numbers<[1], [0], [0], [1], [0, 0, 1, 1], [], []>} : vector<16x32xbf16>, vector<32x32xbf16>, vector<16x32xf32> -> vector<16x32xf32>
    %191 = arith.addf %172, %184 : vector<16x32xf32>
    %192 = arith.negf %191 : vector<16x32xf32>
    %193 = math.exp %192 : vector<16x32xf32>
    %cst_70 = arith.constant 1.000000e+00 : f32
    %194 = vector.broadcast %cst_70 : f32 to vector<16x32xf32>
    %195 = arith.addf %194, %193 : vector<16x32xf32>
    %196 = arith.divf %194, %195 : vector<16x32xf32>
    %197 = arith.addf %176, %187 : vector<16x32xf32>
    %198 = arith.negf %197 : vector<16x32xf32>
    %199 = math.exp %198 : vector<16x32xf32>
    %cst_71 = arith.constant 1.000000e+00 : f32
    %200 = vector.broadcast %cst_71 : f32 to vector<16x32xf32>
    %201 = arith.addf %200, %199 : vector<16x32xf32>
    %202 = arith.divf %200, %201 : vector<16x32xf32>
    %203 = arith.addf %190, %3 : vector<16x32xf32>
    %204 = arith.mulf %196, %203 : vector<16x32xf32>
    %205 = arith.addf %180, %204 : vector<16x32xf32>
    %206 = math.tanh %205 : vector<16x32xf32>
    %207 = arith.subf %168, %206 : vector<16x32xf32>
    %208 = arith.mulf %202, %207 : vector<16x32xf32>
    %209 = arith.addf %206, %208 : vector<16x32xf32>
    %c5_i32 = arith.constant 5 : i32
    %210 = arith.index_cast %c5_i32 : i32 to index
    %c0_72 = arith.constant 0 : index
    %c0_73 = arith.constant 0 : index
    %c0_74 = arith.constant 0 : index
    %211 = vector.load %arg1[%210, %c0_72, %c0_73, %c0_74] : memref<8x3x16x32xbf16, #tpu.memory_space<vmem>>, vector<1x1x16x32xbf16>
    %212 = vector.shape_cast %211 : vector<1x1x16x32xbf16> to vector<16x32xbf16>
    %213 = arith.extf %212 : vector<16x32xbf16> to vector<16x32xf32>
    %214 = arith.index_cast %c5_i32 : i32 to index
    %c1_75 = arith.constant 1 : index
    %c0_76 = arith.constant 0 : index
    %c0_77 = arith.constant 0 : index
    %215 = vector.load %arg1[%214, %c1_75, %c0_76, %c0_77] : memref<8x3x16x32xbf16, #tpu.memory_space<vmem>>, vector<1x1x16x32xbf16>
    %216 = vector.shape_cast %215 : vector<1x1x16x32xbf16> to vector<16x32xbf16>
    %217 = arith.extf %216 : vector<16x32xbf16> to vector<16x32xf32>
    %218 = arith.index_cast %c5_i32 : i32 to index
    %c2_78 = arith.constant 2 : index
    %c0_79 = arith.constant 0 : index
    %c0_80 = arith.constant 0 : index
    %219 = vector.load %arg1[%218, %c2_78, %c0_79, %c0_80] : memref<8x3x16x32xbf16, #tpu.memory_space<vmem>>, vector<1x1x16x32xbf16>
    %220 = vector.shape_cast %219 : vector<1x1x16x32xbf16> to vector<16x32xbf16>
    %221 = arith.extf %220 : vector<16x32xbf16> to vector<16x32xf32>
    %222 = arith.truncf %209 : vector<16x32xf32> to vector<16x32xbf16>
    %223 = vector.extract_strided_slice %0 {offsets = [0, 0, 0], sizes = [1, 32, 32], strides = [1, 1, 1]} : vector<3x32x32xbf16> to vector<1x32x32xbf16>
    %224 = vector.shape_cast %223 : vector<1x32x32xbf16> to vector<32x32xbf16>
    %cst_81 = arith.constant dense<0.000000e+00> : vector<16x32xf32>
    %225 = tpu.matmul %222, %224, %cst_81 {dimension_numbers = #tpu.dot_dimension_numbers<[1], [0], [0], [1], [0, 0, 1, 1], [], []>} : vector<16x32xbf16>, vector<32x32xbf16>, vector<16x32xf32> -> vector<16x32xf32>
    %226 = vector.extract_strided_slice %0 {offsets = [1, 0, 0], sizes = [1, 32, 32], strides = [1, 1, 1]} : vector<3x32x32xbf16> to vector<1x32x32xbf16>
    %227 = vector.shape_cast %226 : vector<1x32x32xbf16> to vector<32x32xbf16>
    %cst_82 = arith.constant dense<0.000000e+00> : vector<16x32xf32>
    %228 = tpu.matmul %222, %227, %cst_82 {dimension_numbers = #tpu.dot_dimension_numbers<[1], [0], [0], [1], [0, 0, 1, 1], [], []>} : vector<16x32xbf16>, vector<32x32xbf16>, vector<16x32xf32> -> vector<16x32xf32>
    %229 = vector.extract_strided_slice %0 {offsets = [2, 0, 0], sizes = [1, 32, 32], strides = [1, 1, 1]} : vector<3x32x32xbf16> to vector<1x32x32xbf16>
    %230 = vector.shape_cast %229 : vector<1x32x32xbf16> to vector<32x32xbf16>
    %cst_83 = arith.constant dense<0.000000e+00> : vector<16x32xf32>
    %231 = tpu.matmul %222, %230, %cst_83 {dimension_numbers = #tpu.dot_dimension_numbers<[1], [0], [0], [1], [0, 0, 1, 1], [], []>} : vector<16x32xbf16>, vector<32x32xbf16>, vector<16x32xf32> -> vector<16x32xf32>
    %232 = arith.addf %213, %225 : vector<16x32xf32>
    %233 = arith.negf %232 : vector<16x32xf32>
    %234 = math.exp %233 : vector<16x32xf32>
    %cst_84 = arith.constant 1.000000e+00 : f32
    %235 = vector.broadcast %cst_84 : f32 to vector<16x32xf32>
    %236 = arith.addf %235, %234 : vector<16x32xf32>
    %237 = arith.divf %235, %236 : vector<16x32xf32>
    %238 = arith.addf %217, %228 : vector<16x32xf32>
    %239 = arith.negf %238 : vector<16x32xf32>
    %240 = math.exp %239 : vector<16x32xf32>
    %cst_85 = arith.constant 1.000000e+00 : f32
    %241 = vector.broadcast %cst_85 : f32 to vector<16x32xf32>
    %242 = arith.addf %241, %240 : vector<16x32xf32>
    %243 = arith.divf %241, %242 : vector<16x32xf32>
    %244 = arith.addf %231, %3 : vector<16x32xf32>
    %245 = arith.mulf %237, %244 : vector<16x32xf32>
    %246 = arith.addf %221, %245 : vector<16x32xf32>
    %247 = math.tanh %246 : vector<16x32xf32>
    %248 = arith.subf %209, %247 : vector<16x32xf32>
    %249 = arith.mulf %243, %248 : vector<16x32xf32>
    %250 = arith.addf %247, %249 : vector<16x32xf32>
    %c6_i32 = arith.constant 6 : i32
    %251 = arith.index_cast %c6_i32 : i32 to index
    %c0_86 = arith.constant 0 : index
    %c0_87 = arith.constant 0 : index
    %c0_88 = arith.constant 0 : index
    %252 = vector.load %arg1[%251, %c0_86, %c0_87, %c0_88] : memref<8x3x16x32xbf16, #tpu.memory_space<vmem>>, vector<1x1x16x32xbf16>
    %253 = vector.shape_cast %252 : vector<1x1x16x32xbf16> to vector<16x32xbf16>
    %254 = arith.extf %253 : vector<16x32xbf16> to vector<16x32xf32>
    %255 = arith.index_cast %c6_i32 : i32 to index
    %c1_89 = arith.constant 1 : index
    %c0_90 = arith.constant 0 : index
    %c0_91 = arith.constant 0 : index
    %256 = vector.load %arg1[%255, %c1_89, %c0_90, %c0_91] : memref<8x3x16x32xbf16, #tpu.memory_space<vmem>>, vector<1x1x16x32xbf16>
    %257 = vector.shape_cast %256 : vector<1x1x16x32xbf16> to vector<16x32xbf16>
    %258 = arith.extf %257 : vector<16x32xbf16> to vector<16x32xf32>
    %259 = arith.index_cast %c6_i32 : i32 to index
    %c2_92 = arith.constant 2 : index
    %c0_93 = arith.constant 0 : index
    %c0_94 = arith.constant 0 : index
    %260 = vector.load %arg1[%259, %c2_92, %c0_93, %c0_94] : memref<8x3x16x32xbf16, #tpu.memory_space<vmem>>, vector<1x1x16x32xbf16>
    %261 = vector.shape_cast %260 : vector<1x1x16x32xbf16> to vector<16x32xbf16>
    %262 = arith.extf %261 : vector<16x32xbf16> to vector<16x32xf32>
    %263 = arith.truncf %250 : vector<16x32xf32> to vector<16x32xbf16>
    %264 = vector.extract_strided_slice %0 {offsets = [0, 0, 0], sizes = [1, 32, 32], strides = [1, 1, 1]} : vector<3x32x32xbf16> to vector<1x32x32xbf16>
    %265 = vector.shape_cast %264 : vector<1x32x32xbf16> to vector<32x32xbf16>
    %cst_95 = arith.constant dense<0.000000e+00> : vector<16x32xf32>
    %266 = tpu.matmul %263, %265, %cst_95 {dimension_numbers = #tpu.dot_dimension_numbers<[1], [0], [0], [1], [0, 0, 1, 1], [], []>} : vector<16x32xbf16>, vector<32x32xbf16>, vector<16x32xf32> -> vector<16x32xf32>
    %267 = vector.extract_strided_slice %0 {offsets = [1, 0, 0], sizes = [1, 32, 32], strides = [1, 1, 1]} : vector<3x32x32xbf16> to vector<1x32x32xbf16>
    %268 = vector.shape_cast %267 : vector<1x32x32xbf16> to vector<32x32xbf16>
    %cst_96 = arith.constant dense<0.000000e+00> : vector<16x32xf32>
    %269 = tpu.matmul %263, %268, %cst_96 {dimension_numbers = #tpu.dot_dimension_numbers<[1], [0], [0], [1], [0, 0, 1, 1], [], []>} : vector<16x32xbf16>, vector<32x32xbf16>, vector<16x32xf32> -> vector<16x32xf32>
    %270 = vector.extract_strided_slice %0 {offsets = [2, 0, 0], sizes = [1, 32, 32], strides = [1, 1, 1]} : vector<3x32x32xbf16> to vector<1x32x32xbf16>
    %271 = vector.shape_cast %270 : vector<1x32x32xbf16> to vector<32x32xbf16>
    %cst_97 = arith.constant dense<0.000000e+00> : vector<16x32xf32>
    %272 = tpu.matmul %263, %271, %cst_97 {dimension_numbers = #tpu.dot_dimension_numbers<[1], [0], [0], [1], [0, 0, 1, 1], [], []>} : vector<16x32xbf16>, vector<32x32xbf16>, vector<16x32xf32> -> vector<16x32xf32>
    %273 = arith.addf %254, %266 : vector<16x32xf32>
    %274 = arith.negf %273 : vector<16x32xf32>
    %275 = math.exp %274 : vector<16x32xf32>
    %cst_98 = arith.constant 1.000000e+00 : f32
    %276 = vector.broadcast %cst_98 : f32 to vector<16x32xf32>
    %277 = arith.addf %276, %275 : vector<16x32xf32>
    %278 = arith.divf %276, %277 : vector<16x32xf32>
    %279 = arith.addf %258, %269 : vector<16x32xf32>
    %280 = arith.negf %279 : vector<16x32xf32>
    %281 = math.exp %280 : vector<16x32xf32>
    %cst_99 = arith.constant 1.000000e+00 : f32
    %282 = vector.broadcast %cst_99 : f32 to vector<16x32xf32>
    %283 = arith.addf %282, %281 : vector<16x32xf32>
    %284 = arith.divf %282, %283 : vector<16x32xf32>
    %285 = arith.addf %272, %3 : vector<16x32xf32>
    %286 = arith.mulf %278, %285 : vector<16x32xf32>
    %287 = arith.addf %262, %286 : vector<16x32xf32>
    %288 = math.tanh %287 : vector<16x32xf32>
    %289 = arith.subf %250, %288 : vector<16x32xf32>
    %290 = arith.mulf %284, %289 : vector<16x32xf32>
    %291 = arith.addf %288, %290 : vector<16x32xf32>
    %c7_i32 = arith.constant 7 : i32
    %292 = arith.index_cast %c7_i32 : i32 to index
    %c0_100 = arith.constant 0 : index
    %c0_101 = arith.constant 0 : index
    %c0_102 = arith.constant 0 : index
    %293 = vector.load %arg1[%292, %c0_100, %c0_101, %c0_102] : memref<8x3x16x32xbf16, #tpu.memory_space<vmem>>, vector<1x1x16x32xbf16>
    %294 = vector.shape_cast %293 : vector<1x1x16x32xbf16> to vector<16x32xbf16>
    %295 = arith.extf %294 : vector<16x32xbf16> to vector<16x32xf32>
    %296 = arith.index_cast %c7_i32 : i32 to index
    %c1_103 = arith.constant 1 : index
    %c0_104 = arith.constant 0 : index
    %c0_105 = arith.constant 0 : index
    %297 = vector.load %arg1[%296, %c1_103, %c0_104, %c0_105] : memref<8x3x16x32xbf16, #tpu.memory_space<vmem>>, vector<1x1x16x32xbf16>
    %298 = vector.shape_cast %297 : vector<1x1x16x32xbf16> to vector<16x32xbf16>
    %299 = arith.extf %298 : vector<16x32xbf16> to vector<16x32xf32>
    %300 = arith.index_cast %c7_i32 : i32 to index
    %c2_106 = arith.constant 2 : index
    %c0_107 = arith.constant 0 : index
    %c0_108 = arith.constant 0 : index
    %301 = vector.load %arg1[%300, %c2_106, %c0_107, %c0_108] : memref<8x3x16x32xbf16, #tpu.memory_space<vmem>>, vector<1x1x16x32xbf16>
    %302 = vector.shape_cast %301 : vector<1x1x16x32xbf16> to vector<16x32xbf16>
    %303 = arith.extf %302 : vector<16x32xbf16> to vector<16x32xf32>
    %304 = arith.truncf %291 : vector<16x32xf32> to vector<16x32xbf16>
    %305 = vector.extract_strided_slice %0 {offsets = [0, 0, 0], sizes = [1, 32, 32], strides = [1, 1, 1]} : vector<3x32x32xbf16> to vector<1x32x32xbf16>
    %306 = vector.shape_cast %305 : vector<1x32x32xbf16> to vector<32x32xbf16>
    %cst_109 = arith.constant dense<0.000000e+00> : vector<16x32xf32>
    %307 = tpu.matmul %304, %306, %cst_109 {dimension_numbers = #tpu.dot_dimension_numbers<[1], [0], [0], [1], [0, 0, 1, 1], [], []>} : vector<16x32xbf16>, vector<32x32xbf16>, vector<16x32xf32> -> vector<16x32xf32>
    %308 = vector.extract_strided_slice %0 {offsets = [1, 0, 0], sizes = [1, 32, 32], strides = [1, 1, 1]} : vector<3x32x32xbf16> to vector<1x32x32xbf16>
    %309 = vector.shape_cast %308 : vector<1x32x32xbf16> to vector<32x32xbf16>
    %cst_110 = arith.constant dense<0.000000e+00> : vector<16x32xf32>
    %310 = tpu.matmul %304, %309, %cst_110 {dimension_numbers = #tpu.dot_dimension_numbers<[1], [0], [0], [1], [0, 0, 1, 1], [], []>} : vector<16x32xbf16>, vector<32x32xbf16>, vector<16x32xf32> -> vector<16x32xf32>
    %311 = vector.extract_strided_slice %0 {offsets = [2, 0, 0], sizes = [1, 32, 32], strides = [1, 1, 1]} : vector<3x32x32xbf16> to vector<1x32x32xbf16>
    %312 = vector.shape_cast %311 : vector<1x32x32xbf16> to vector<32x32xbf16>
    %cst_111 = arith.constant dense<0.000000e+00> : vector<16x32xf32>
    %313 = tpu.matmul %304, %312, %cst_111 {dimension_numbers = #tpu.dot_dimension_numbers<[1], [0], [0], [1], [0, 0, 1, 1], [], []>} : vector<16x32xbf16>, vector<32x32xbf16>, vector<16x32xf32> -> vector<16x32xf32>
    %314 = arith.addf %295, %307 : vector<16x32xf32>
    %315 = arith.negf %314 : vector<16x32xf32>
    %316 = math.exp %315 : vector<16x32xf32>
    %cst_112 = arith.constant 1.000000e+00 : f32
    %317 = vector.broadcast %cst_112 : f32 to vector<16x32xf32>
    %318 = arith.addf %317, %316 : vector<16x32xf32>
    %319 = arith.divf %317, %318 : vector<16x32xf32>
    %320 = arith.addf %299, %310 : vector<16x32xf32>
    %321 = arith.negf %320 : vector<16x32xf32>
    %322 = math.exp %321 : vector<16x32xf32>
    %cst_113 = arith.constant 1.000000e+00 : f32
    %323 = vector.broadcast %cst_113 : f32 to vector<16x32xf32>
    %324 = arith.addf %323, %322 : vector<16x32xf32>
    %325 = arith.divf %323, %324 : vector<16x32xf32>
    %326 = arith.addf %313, %3 : vector<16x32xf32>
    %327 = arith.mulf %319, %326 : vector<16x32xf32>
    %328 = arith.addf %303, %327 : vector<16x32xf32>
    %329 = math.tanh %328 : vector<16x32xf32>
    %330 = arith.subf %291, %329 : vector<16x32xf32>
    %331 = arith.mulf %325, %330 : vector<16x32xf32>
    %332 = arith.addf %329, %331 : vector<16x32xf32>
    %c8_i32 = arith.constant 8 : i32
    %c0_114 = arith.constant 0 : index
    %c0_115 = arith.constant 0 : index
    %333 = vector.load %arg4[%c0_114, %c0_115] : memref<16x32xf32, #tpu.memory_space<vmem>>, vector<16x32xf32>
    tpu.vector_store %arg4[%c0_114, %c0_115], %332 {strides = array<i32>} : memref<16x32xf32, #tpu.memory_space<vmem>>, vector<16x32xf32>,
    return
  }
  func.func @transform_0(%arg0: i32) -> (i32, i32, i32, i32) {
    %c0_i32 = arith.constant 0 : i32
    %c0_i32_0 = arith.constant 0 : i32
    %c0_i32_1 = arith.constant 0 : i32
    %c0_i32_2 = arith.constant 0 : i32
    return %c0_i32, %c0_i32_0, %arg0, %c0_i32_1 : i32, i32, i32, i32
  }
  func.func @transform_1(%arg0: i32) -> (i32, i32, i32) {
    %c0_i32 = arith.constant 0 : i32
    %c0_i32_0 = arith.constant 0 : i32
    %c0_i32_1 = arith.constant 0 : i32
    %c0_i32_2 = arith.constant 0 : i32
    return %c0_i32, %c0_i32_0, %c0_i32_1 : i32, i32, i32
  }
  func.func @transform_2(%arg0: i32) -> (i32, i32) {
    %c0_i32 = arith.constant 0 : i32
    %c0_i32_0 = arith.constant 0 : i32
    %c0_i32_1 = arith.constant 0 : i32
    return %c0_i32, %c0_i32_0 : i32, i32
  }
  func.func @transform_3(%arg0: i32) -> (i32, i32) {
    %c0_i32 = arith.constant 0 : i32
    %c0_i32_0 = arith.constant 0 : i32
    return %arg0, %c0_i32 : i32, i32
  }
}

</mosaic_0001>

<bundles_post_ra>
// kernel: tpu_custom_call.1
= control target key start
LH: loop header
LB: loop body
LE: loop exit
PB: predicated region body
PF: predicated region fallthrough
CT: control target
= control target key end

     0   :  { %6 = vsyncpa [#allocation3], 0  ;;  %s103_s0 = inlined_call_operand.hbm [shape: f32[8,128], index: 0, kind: input, shape index: {}]   ;;  %s104_s1 = inlined_call_operand.hbm [shape: f32[8,128], index: 1, kind: output, shape index: {}]  }
   0x1   :  { %7 = vsyncpa [#allocation4], 0  ;;  %s85_s6 = smov [#allocation2]  }
   0x2   :  { %s14_s7 = sshll.u32 %s85_s6, 4  ;;  %s15_s7 = int_to_ptr.vmem [resolvable:$true] %s14_s7 }
   0x3   :  { %s49_s8 = scalar_lea.vmem %s15_s7, 128  ;;  %p54_p1 = scmp.lt.s32.totalorder %s15_s7, %s15_s7 }
   0x4   :  { %p50_p0 = scmp.ne.s32.totalorder %s15_s7, %s49_s8  ;;  %p55_p2 = scmp.lt.s32.totalorder %s49_s8, %s49_s8 }
   0x6   :  { %p56_p3 = por %p55_p2, %p54_p1 }
   0x8   :  { %p57_p4 = pnand %p56_p3, %p50_p0 }
   0xa   :  { %60 = shalt.err (!%p57_p4)
}
   0xb   :  { %17 = dma.hbm_to_vmem [thread:$0]  %s103_s0, 128, %s15_s7, [#allocation3]  }
   0xc   :  { %81 = dma.done.wait [#allocation3], 128  }
   0xd   :  { %82 = vsyncadd [#allocation3], 4294967168  ;;  %s86_s11 = smov [#allocation5]   ;;  %v21_v0 = vld [vmem:[#allocation2] sm:$0xff] }
   0xe   :  { %s30_s12 = sshll.u32 %s86_s11, 4  ;;  %v22_v1 = vadd.f32 1.0, %v21_v0  ;;  %s31_s12 = int_to_ptr.vmem [resolvable:$true] %s30_s12 }
   0xf   :  { %s61_s13 = scalar_lea.vmem %s31_s12, 128  ;;  %p66_p6 = scmp.lt.s32.totalorder %s31_s12, %s31_s12 }
  0x10   :  { %23 = vst [vmem:[#allocation5] sm:$0xff] %v22_v1  ;;  %p62_p5 = scmp.ne.s32.totalorder %s31_s12, %s61_s13  ;;  %p67_p7 = scmp.lt.s32.totalorder %s61_s13, %s61_s13 }
  0x12   :  { %p68_p8 = por %p67_p7, %p66_p6 }
  0x14   :  { %p69_p9 = pnand %p68_p8, %p62_p5 }
  0x16   :  { %72 = shalt.err (!%p69_p9)
}
  0x17   :  { %33 = dma.vmem_to_hbm [thread:$0]  %s31_s12, 128, %s104_s1, [#allocation4]  }
  0x18   :  { %83 = dma.done.wait [#allocation4], 128  }
  0x19   :  { %84 = vsyncadd [#allocation4], 4294967168 }
  0x1a   :  { %37 = vsyncpa [#allocation3], 1 }
  0x1b   :  { %38 = vsyncpa [#allocation4], 1 }

// kernel: question_embedding_forward.2
= control target key start
LH: loop header
LB: loop body
LE: loop exit
PB: predicated region body
PF: predicated region fallthrough
CT: control target
= control target key end

     0   :  { %v2321_v0 = vmov 0.0   ;;  %vm2322_vm0 = vmmov 0   ;;  %v2323_v6 = vmov 0   ;;  %vm259_vm1 = vcmask 257024   ;;  %s2803_s1 = inlined_call_operand.vmem [shape: bf16[3,32,32], index: 1, kind: input, shape index: {}]   ;;  %s2804_s0 = inlined_call_operand.vmem [shape: bf16[8,3,16,32], index: 0, kind: input, shape index: {}]   ;;  %s2805_s2 = inlined_call_operand.vmem [shape: f32[1,32], index: 2, kind: input, shape index: {}]   ;;  %s2806_s3 = inlined_call_operand.vmem [shape: bf16[8,16,32], index: 3, kind: output, shape index: {}]  }
   0x1   :  { %1953 = vmatprep.subr.bf16.mxu0 %v2321_v0  ;;  %v2348_v1 = vld [vmem:[%s2803_s1 + $0x8] sm:$0xff]   ;;  %1957 = vmatprep.mubr.msk.bf16.mxu0 %vm2322_vm0, %v2321_v0  ;;  %v2355_v2 = vld [vmem:[%s2803_s1] sm:$0xff]   ;;  %v2364_v3 = vld [vmem:[%s2803_s1 + $0x18] sm:$0xff]   ;;  %vm60_vm2 = vcmask 261120  }
   0x2   :  { %1961 = vmatprep.subr.bf16.mxu1 %v2321_v0  ;;  %1965 = vmatprep.mubr.msk.bf16.mxu1 %vm2322_vm0, %v2321_v0  ;;  %v2371_v4 = vld [vmem:[%s2803_s1 + $0x10] sm:$0xff]   ;;  %v2378_v5 = vld [vmem:[%s2803_s1 + $0x28] sm:$0xff]   ;;  %v2387_v7 = vld [vmem:[%s2803_s1 + $0x20] sm:$0xff]  }
   0x3   :  { %1954 = vmatpush3.bf16.msra.mxu0 %v2348_v1  ;;  %1962 = vmatpush3.bf16.msra.mxu1 %v2364_v3  ;;  %v1763_v8 = vld [vmem:[%s2804_s0] sm:$0xff]   ;;  %v1858_v16 = vld [vmem:[%s2804_s0 + $0x8] sm:$0xff]   ;;  %v1859_v39 = vld [vmem:[%s2804_s0 + $0x10] sm:$0xff]  }
   0x4   :  { %1955 = vmatprep.subr.bf16.mxu0 %v2321_v0  ;;  %1963 = vmatprep.subr.bf16.mxu1 %v2321_v0  ;;  %v1764_v9 = vunpack.c.l.bf16 %v1763_v8  ;;  %v1765_v12 = vunpack.c.h.bf16 %v1763_v8  ;;  %v1768_v21 = vunpack.c.l.bf16 %v1858_v16  ;;  %v1769_v28 = vunpack.c.h.bf16 %v1858_v16  ;;  %v2415_v38 = vld [vmem:[%s2805_s2] ss:$0 sm:$0xff] }
   0x5   :  { %v1772_v42 = vunpack.c.l.bf16 %v1859_v39  ;;  %v1773_v48 = vunpack.c.h.bf16 %v1859_v39 }
   0x7   :  { %1956 = vmatpush3.bf16.msra.mxu0 %v2355_v2  ;;  %1964 = vmatpush3.bf16.msra.mxu1 %v2371_v4 }
   0x8   :  { %1969 = vmatprep.subr.bf16.mxu0 %v2321_v0  ;;  %1977 = vmatprep.subr.bf16.mxu1 %v2321_v0 }
   0xa   :  { %1958 = vmatmul.mubr.bf16.vlgmr.msra.gmra.mxu0 %v2323_v6  ;;  %1966 = vmatmul.mubr.bf16.vlgmr.msra.gmra.mxu1 %v2323_v6 }
   0xb   :  { %1970 = vmatpush3.bf16.msra.mxu0 %v2378_v5  ;;  %1973 = vmatprep.mubr.msk.bf16.mxu0 %vm2322_vm0, %v2321_v0 }
   0xc   :  { %1971 = vmatprep.subr.bf16.mxu0 %v2321_v0  ;;  %1978 = vmatpush3.bf16.msra.mxu1 %v2348_v1 }
   0xd   :  { %1981 = vmatprep.mubr.msk.bf16.mxu1 %vm2322_vm0, %v2321_v0  ;;  %1979 = vmatprep.subr.bf16.mxu1 %v2321_v0 }
   0xf   :  { %1972 = vmatpush3.bf16.msra.mxu0 %v2387_v7 }
  0x10   :  { %1985 = vmatprep.subr.bf16.mxu0 %v2321_v0  ;;  %1980 = vmatpush3.bf16.msra.mxu1 %v2355_v2 }
  0x11   :  { %1993 = vmatprep.subr.bf16.mxu1 %v2321_v0 }
  0x12   :  { %1974 = vmatmul.mubr.bf16.vlgmr.msra.gmra.mxu0 %v2323_v6 }
  0x13   :  { %1986 = vmatpush3.bf16.msra.mxu0 %v2364_v3  ;;  %1989 = vmatprep.mubr.msk.bf16.mxu0 %vm2322_vm0, %v2321_v0 }
  0x14   :  { %1987 = vmatprep.subr.bf16.mxu0 %v2321_v0 }
  0x17   :  { %1988 = vmatpush3.bf16.msra.mxu0 %v2371_v4 }
  0x18   :  { %2001 = vmatprep.subr.bf16.mxu0 %v2321_v0 }
  0xca   :  { %v98_v10 = vpop.f32.mrf.mxu0  ;;  %v151_v14 = vpop.f32.mrf.mxu1 }
  0xcb   :  { %v158_v11 = vadd.f32 %v1764_v9, %v98_v10  ;;  %v172_v26 = vadd.f32 %v1768_v21, %v151_v14  ;;  %v1860_v10 = vld [vmem:[%s2804_s0 + $0x18] sm:$0xff]   ;;  %v1861_v21 = vld [vmem:[%s2804_s0 + $0x20] sm:$0xff]  }
  0xcc   :  { %v1959_v13 = vpop.f32.mrf.mxu0  ;;  %v1967_v18 = vpop.f32.mrf.mxu1 }
  0xcd   :  { %v1619_v15 = vmul.f32 -1.442695, %v158_v11  ;;  %v1621_v30 = vmul.f32 -1.442695, %v172_v26  ;;  %v1776_v11 = vunpack.c.l.bf16 %v1860_v10  ;;  %v1780_v26 = vunpack.c.l.bf16 %v1861_v21 }
  0xce   :  { %v101_v17 = vpop.f32.mrf.mxu0  ;;  %v154_v22 = vpop.f32.mrf.mxu1 }
  0xcf   :  { %2154 = vpow2.f32 %v1619_v15  ;;  %v159_v19 = vadd.f32 %v1765_v12, %v101_v17  ;;  %v173_v32 = vadd.f32 %v1769_v28, %v154_v22  ;;  %v1777_v15 = vunpack.c.h.bf16 %v1860_v10 }
  0xd0   :  { %v1960_v20 = vpop.f32.mrf.mxu0  ;;  %v1968_v24 = vpop.f32.mrf.mxu1 }
  0xd1   :  { %v1620_v23 = vmul.f32 -1.442695, %v159_v19  ;;  %v1622_v35 = vmul.f32 -1.442695, %v173_v32 }
  0xd2   :  { %v232_v25 = vpop.f32.mrf.mxu0 }
  0xd3   :  { %2156 = vpow2.f32 %v1620_v23  ;;  %v233_v41 = vadd.f32 %v2415_v38, %v232_v25 }
  0xd4   :  { %v1975_v27 = vpop.f32.mrf.mxu0  ;;  %2158 = vpow2.f32 %v1621_v30  ;;  %v1781_v30 = vunpack.c.h.bf16 %v1861_v21 }
  0xd6   :  { %v235_v29 = vpop.f32.mrf.mxu0 }
  0xd7   :  { %v236_v49 = vadd.f32 %v2415_v38, %v235_v29 }
  0xd8   :  { %v1976_v31 = vpop.f32.mrf.mxu0 }
  0xdc   :  { %v2155_v33 = vpop.eup %2154 }
  0xdd   :  { %v166_v34 = vadd.f32 1.0, %v2155_v33 }
  0xdf   :  { %2160 = vrcp.f32 %v166_v34 }
  0xe0   :  { %v2157_v36 = vpop.eup %2156  ;;  %2162 = vpow2.f32 %v1622_v35 }
  0xe1   :  { %v167_v37 = vadd.f32 1.0, %v2157_v36  ;;  %v2159_v40 = vpop.eup %2158 }
  0xe2   :  { %v180_v44 = vadd.f32 1.0, %v2159_v40 }
  0xe3   :  { %2164 = vrcp.f32 %v167_v37 }
  0xe4   :  { %2166 = vrcp.f32 %v180_v44 }
  0xec   :  { %v2161_v43 = vpop.eup %2160 }
  0xed   :  { %v239_v45 = vmul.f32 %v2161_v43, %v233_v41  ;;  %v2163_v46 = vpop.eup %2162  ;;  %v1862_v41 = vld [vmem:[%s2804_s0 + $0x28] sm:$0xff]  }
  0xee   :  { %v181_v52 = vadd.f32 1.0, %v2163_v46  ;;  %v1784_v43 = vunpack.c.l.bf16 %v1862_v41 }
  0xef   :  { %v241_v47 = vadd.f32 %v1772_v42, %v239_v45 }
  0xf0   :  { %v2165_v50 = vpop.eup %2164 }
  0xf1   :  { %2168 = vtanh.f32 %v241_v47  ;;  %v240_v51 = vmul.f32 %v2165_v50, %v236_v49  ;;  %v2167_v54 = vpop.eup %2166  ;;  %v1785_v50 = vunpack.c.h.bf16 %v1862_v41 }
  0xf3   :  { %v242_v53 = vadd.f32 %v1773_v48, %v240_v51 }
  0xf5   :  { %2170 = vtanh.f32 %v242_v53 }
  0xf6   :  { %2172 = vrcp.f32 %v181_v52 }
  0xfe   :  { %v2169_v55 = vpop.eup %2168 }
  0xff   :  { %v245_v56 = vsub.f32 0.0, %v2169_v55 }
 0x101   :  { %v247_v57 = vmul.f32 %v2167_v54, %v245_v56 }
 0x102   :  { %v2171_v58 = vpop.eup %2170 }
 0x103   :  { %v246_v59 = vsub.f32 0.0, %v2171_v58  ;;  %v2422_v60 = vadd.f32 %v2169_v55, %v247_v57  ;;  %v2173_v61 = vpop.eup %2172 }
 0x105   :  { %v248_v62 = vmul.f32 %v2173_v61, %v246_v59  ;;  %v1746_v63 = vpack.c.bf16 %v2422_v60, %v2422_v60 }
 0x107   :  { %v2426_v6 = vadd.f32 %v2171_v58, %v248_v62  ;;  %260 = vst.msk [vmem:[%s2806_s3] sm:$0xf] %vm259_vm1, %v1746_v63 }
 0x109   :  { %v251_v8 = vpack.c.bf16 %v2426_v6, %v2422_v60  ;;  %v1747_v9 = vpack.c.bf16 %v2426_v6, %v2426_v6 }
 0x10b   :  { %261 = vst.msk [vmem:[%s2806_s3 + $0x4] sm:$0xf] %vm259_vm1, %v1747_v9  ;;  %1982 = vmatmul.mubr.msk.bf16.vlgmr.msra.gmra.mxu1 %vm60_vm2, %v251_v8  ;;  %1990 = vmatmul.mubr.msk.bf16.vlgmr.msra.gmra.mxu0 %vm60_vm2, %v251_v8 }
 0x10c   :  { %1994 = vmatpush3.bf16.msra.mxu1 %v2378_v5  ;;  %1997 = vmatprep.mubr.msk.bf16.mxu1 %vm2322_vm0, %v2321_v0 }
 0x10d   :  { %1995 = vmatprep.subr.bf16.mxu1 %v2321_v0  ;;  %2002 = vmatpush3.bf16.msra.mxu0 %v2348_v1 }
 0x10e   :  { %2003 = vmatprep.subr.bf16.mxu0 %v2321_v0  ;;  %2005 = vmatprep.mubr.msk.bf16.mxu0 %vm2322_vm0, %v2321_v0 }
 0x110   :  { %1996 = vmatpush3.bf16.msra.mxu1 %v2387_v7 }
 0x111   :  { %2009 = vmatprep.subr.bf16.mxu1 %v2321_v0  ;;  %2004 = vmatpush3.bf16.msra.mxu0 %v2355_v2 }
 0x112   :  { %2017 = vmatprep.subr.bf16.mxu0 %v2321_v0 }
 0x113   :  { %1998 = vmatmul.mubr.msk.bf16.vlgmr.msra.gmra.mxu1 %vm60_vm2, %v251_v8 }
 0x114   :  { %2010 = vmatpush3.bf16.msra.mxu1 %v2364_v3  ;;  %2013 = vmatprep.mubr.msk.bf16.mxu1 %vm2322_vm0, %v2321_v0 }
 0x115   :  { %2011 = vmatprep.subr.bf16.mxu1 %v2321_v0 }
 0x118   :  { %2012 = vmatpush3.bf16.msra.mxu1 %v2371_v4 }
 0x119   :  { %2025 = vmatprep.subr.bf16.mxu1 %v2321_v0 }
 0x1cb   :  { %v314_v12 = vpop.f32.mrf.mxu1  ;;  %v355_v13 = vpop.f32.mrf.mxu0 }
 0x1cc   :  { %v362_v14 = vadd.f32 %v1776_v11, %v314_v12  ;;  %v376_v29 = vadd.f32 %v1780_v26, %v355_v13  ;;  %v1863_v12 = vld [vmem:[%s2804_s0 + $0x30] sm:$0xff]  }
 0x1cd   :  { %v1983_v16 = vpop.f32.mrf.mxu1  ;;  %v1991_v17 = vpop.f32.mrf.mxu0  ;;  %v1788_v13 = vunpack.c.l.bf16 %v1863_v12 }
 0x1ce   :  { %v1635_v18 = vmul.f32 -1.442695, %v362_v14  ;;  %v1637_v33 = vmul.f32 -1.442695, %v376_v29  ;;  %v1789_v17 = vunpack.c.h.bf16 %v1863_v12 }
 0x1cf   :  { %v317_v19 = vpop.f32.mrf.mxu1  ;;  %v358_v20 = vpop.f32.mrf.mxu0 }
 0x1d0   :  { %2174 = vpow2.f32 %v1635_v18  ;;  %v363_v22 = vadd.f32 %v1777_v15, %v317_v19  ;;  %v377_v34 = vadd.f32 %v1781_v30, %v358_v20 }
 0x1d1   :  { %v1984_v23 = vpop.f32.mrf.mxu1  ;;  %v1992_v24 = vpop.f32.mrf.mxu0 }
 0x1d2   :  { %v1636_v25 = vmul.f32 -1.442695, %v363_v22  ;;  %v1638_v37 = vmul.f32 -1.442695, %v377_v34  ;;  %v1864_v23 = vld [vmem:[%s2804_s0 + $0x38] sm:$0xff]  }
 0x1d3   :  { %v424_v27 = vpop.f32.mrf.mxu1 }
 0x1d4   :  { %2176 = vpow2.f32 %v1636_v25  ;;  %v425_v44 = vadd.f32 %v2415_v38, %v424_v27 }
 0x1d5   :  { %v1999_v28 = vpop.f32.mrf.mxu1  ;;  %2178 = vpow2.f32 %v1637_v33 }
 0x1d6   :  { %v1792_v28 = vunpack.c.l.bf16 %v1864_v23 }
 0x1d7   :  { %v427_v31 = vpop.f32.mrf.mxu1 }
 0x1d8   :  { %v428_v51 = vadd.f32 %v2415_v38, %v427_v31 }
 0x1d9   :  { %v2000_v32 = vpop.f32.mrf.mxu1 }
 0x1da   :  { %v1793_v32 = vunpack.c.h.bf16 %v1864_v23 }
 0x1dd   :  { %v2175_v35 = vpop.eup %2174 }
 0x1de   :  { %v370_v36 = vadd.f32 1.0, %v2175_v35 }
 0x1e0   :  { %2180 = vrcp.f32 %v370_v36 }
 0x1e1   :  { %v2177_v39 = vpop.eup %2176  ;;  %2182 = vpow2.f32 %v1638_v37 }
 0x1e2   :  { %v371_v40 = vadd.f32 1.0, %v2177_v39  ;;  %v2179_v42 = vpop.eup %2178 }
 0x1e3   :  { %v384_v48 = vadd.f32 1.0, %v2179_v42 }
 0x1e4   :  { %2184 = vrcp.f32 %v371_v40 }
 0x1ed   :  { %v2181_v45 = vpop.eup %2180 }
 0x1ee   :  { %v431_v46 = vmul.f32 %v2181_v45, %v425_v44  ;;  %v2183_v47 = vpop.eup %2182 }
 0x1ef   :  { %v385_v54 = vadd.f32 1.0, %v2183_v47 }
 0x1f0   :  { %v433_v49 = vadd.f32 %v1784_v43, %v431_v46  ;;  %v1865_v43 = vld [vmem:[%s2804_s0 + $0x40] sm:$0xff]  }
 0x1f1   :  { %v2185_v52 = vpop.eup %2184  ;;  %v1796_v45 = vunpack.c.l.bf16 %v1865_v43 }
 0x1f2   :  { %2186 = vtanh.f32 %v433_v49  ;;  %v432_v53 = vmul.f32 %v2185_v52, %v428_v51  ;;  %v1797_v52 = vunpack.c.h.bf16 %v1865_v43 }
 0x1f3   :  { %2188 = vrcp.f32 %v384_v48 }
 0x1f4   :  { %v434_v55 = vadd.f32 %v1785_v50, %v432_v53 }
 0x1f6   :  { %2190 = vtanh.f32 %v434_v55 }
 0x1f7   :  { %2192 = vrcp.f32 %v385_v54 }
 0x1ff   :  { %v2187_v56 = vpop.eup %2186 }
 0x200   :  { %v437_v57 = vsub.f32 %v2422_v60, %v2187_v56  ;;  %v2189_v58 = vpop.eup %2188 }
 0x202   :  { %v439_v59 = vmul.f32 %v2189_v58, %v437_v57 }
 0x203   :  { %v2191_v61 = vpop.eup %2190 }
 0x204   :  { %v438_v62 = vsub.f32 %v2426_v6, %v2191_v61  ;;  %v2474_v63 = vadd.f32 %v2187_v56, %v439_v59  ;;  %v2193_v8 = vpop.eup %2192 }
 0x206   :  { %v440_v9 = vmul.f32 %v2193_v8, %v438_v62  ;;  %v1748_v10 = vpack.c.bf16 %v2474_v63, %v2474_v63 }
 0x208   :  { %v2478_v11 = vadd.f32 %v2191_v61, %v440_v9  ;;  %1642 = vst.msk [vmem:[%s2806_s3 + $0x8] sm:$0xf] %vm259_vm1, %v1748_v10 }
 0x20a   :  { %v443_v60 = vpack.c.bf16 %v2478_v11, %v2474_v63  ;;  %v1749_v6 = vpack.c.bf16 %v2478_v11, %v2478_v11 }
 0x20c   :  { %1643 = vst.msk [vmem:[%s2806_s3 + $0xc] sm:$0xf] %vm259_vm1, %v1749_v6  ;;  %2006 = vmatmul.mubr.msk.bf16.vlgmr.msra.gmra.mxu0 %vm60_vm2, %v443_v60  ;;  %2014 = vmatmul.mubr.msk.bf16.vlgmr.msra.gmra.mxu1 %vm60_vm2, %v443_v60 }
 0x20d   :  { %2018 = vmatpush3.bf16.msra.mxu0 %v2378_v5  ;;  %2021 = vmatprep.mubr.msk.bf16.mxu0 %vm2322_vm0, %v2321_v0 }
 0x20e   :  { %2019 = vmatprep.subr.bf16.mxu0 %v2321_v0  ;;  %2026 = vmatpush3.bf16.msra.mxu1 %v2348_v1 }
 0x20f   :  { %2027 = vmatprep.subr.bf16.mxu1 %v2321_v0  ;;  %2029 = vmatprep.mubr.msk.bf16.mxu1 %vm2322_vm0, %v2321_v0 }
 0x211   :  { %2020 = vmatpush3.bf16.msra.mxu0 %v2387_v7 }
 0x212   :  { %2033 = vmatprep.subr.bf16.mxu0 %v2321_v0  ;;  %2028 = vmatpush3.bf16.msra.mxu1 %v2355_v2 }
 0x213   :  { %2041 = vmatprep.subr.bf16.mxu1 %v2321_v0 }
 0x214   :  { %2022 = vmatmul.mubr.msk.bf16.vlgmr.msra.gmra.mxu0 %vm60_vm2, %v443_v60 }
 0x215   :  { %2034 = vmatpush3.bf16.msra.mxu0 %v2364_v3  ;;  %2037 = vmatprep.mubr.msk.bf16.mxu0 %vm2322_vm0, %v2321_v0 }
 0x216   :  { %2035 = vmatprep.subr.bf16.mxu0 %v2321_v0 }
 0x219   :  { %2036 = vmatpush3.bf16.msra.mxu0 %v2371_v4 }
 0x21a   :  { %2049 = vmatprep.subr.bf16.mxu0 %v2321_v0 }
 0x2cc   :  { %v506_v14 = vpop.f32.mrf.mxu0  ;;  %v547_v15 = vpop.f32.mrf.mxu1 }
 0x2cd   :  { %v554_v16 = vadd.f32 %v1788_v13, %v506_v14  ;;  %v568_v31 = vadd.f32 %v1792_v28, %v547_v15  ;;  %v1866_v14 = vld [vmem:[%s2804_s0 + $0x48] sm:$0xff]  }
 0x2ce   :  { %v2007_v18 = vpop.f32.mrf.mxu0  ;;  %v2015_v19 = vpop.f32.mrf.mxu1  ;;  %v1800_v15 = vunpack.c.l.bf16 %v1866_v14 }
 0x2cf   :  { %v1652_v20 = vmul.f32 -1.442695, %v554_v16  ;;  %v1654_v35 = vmul.f32 -1.442695, %v568_v31  ;;  %v1801_v19 = vunpack.c.h.bf16 %v1866_v14 }
 0x2d0   :  { %v509_v21 = vpop.f32.mrf.mxu0  ;;  %v550_v22 = vpop.f32.mrf.mxu1 }
 0x2d1   :  { %2194 = vpow2.f32 %v1652_v20  ;;  %v555_v24 = vadd.f32 %v1789_v17, %v509_v21  ;;  %v569_v36 = vadd.f32 %v1793_v32, %v550_v22 }
 0x2d2   :  { %v2008_v25 = vpop.f32.mrf.mxu0  ;;  %v2016_v26 = vpop.f32.mrf.mxu1 }
 0x2d3   :  { %v1653_v27 = vmul.f32 -1.442695, %v555_v24  ;;  %v1655_v40 = vmul.f32 -1.442695, %v569_v36  ;;  %v1867_v25 = vld [vmem:[%s2804_s0 + $0x50] sm:$0xff]  }
 0x2d4   :  { %v616_v29 = vpop.f32.mrf.mxu0 }
 0x2d5   :  { %2196 = vpow2.f32 %v1653_v27  ;;  %v617_v46 = vadd.f32 %v2415_v38, %v616_v29 }
 0x2d6   :  { %v2023_v30 = vpop.f32.mrf.mxu0  ;;  %2198 = vpow2.f32 %v1654_v35 }
 0x2d7   :  { %v1804_v30 = vunpack.c.l.bf16 %v1867_v25 }
 0x2d8   :  { %v619_v33 = vpop.f32.mrf.mxu0 }
 0x2d9   :  { %v620_v53 = vadd.f32 %v2415_v38, %v619_v33 }
 0x2da   :  { %v2024_v34 = vpop.f32.mrf.mxu0 }
 0x2db   :  { %v1805_v34 = vunpack.c.h.bf16 %v1867_v25 }
 0x2de   :  { %v2195_v37 = vpop.eup %2194 }
 0x2df   :  { %v562_v39 = vadd.f32 1.0, %v2195_v37 }
 0x2e1   :  { %2200 = vrcp.f32 %v562_v39 }
 0x2e2   :  { %v2197_v41 = vpop.eup %2196  ;;  %2202 = vpow2.f32 %v1655_v40 }
 0x2e3   :  { %v563_v42 = vadd.f32 1.0, %v2197_v41  ;;  %v2199_v44 = vpop.eup %2198 }
 0x2e4   :  { %v576_v50 = vadd.f32 1.0, %v2199_v44 }
 0x2e5   :  { %2204 = vrcp.f32 %v563_v42 }
 0x2ee   :  { %v2201_v47 = vpop.eup %2200 }
 0x2ef   :  { %v623_v48 = vmul.f32 %v2201_v47, %v617_v46  ;;  %v2203_v49 = vpop.eup %2202 }
 0x2f0   :  { %v577_v56 = vadd.f32 1.0, %v2203_v49 }
 0x2f1   :  { %v625_v51 = vadd.f32 %v1796_v45, %v623_v48  ;;  %v1868_v45 = vld [vmem:[%s2804_s0 + $0x58] sm:$0xff]  }
 0x2f2   :  { %v2205_v54 = vpop.eup %2204  ;;  %v1808_v47 = vunpack.c.l.bf16 %v1868_v45 }
 0x2f3   :  { %2206 = vtanh.f32 %v625_v51  ;;  %v624_v55 = vmul.f32 %v2205_v54, %v620_v53  ;;  %v1809_v54 = vunpack.c.h.bf16 %v1868_v45 }
 0x2f4   :  { %2208 = vrcp.f32 %v576_v50 }
 0x2f5   :  { %v626_v57 = vadd.f32 %v1797_v52, %v624_v55 }
 0x2f7   :  { %2210 = vtanh.f32 %v626_v57 }
 0x2f8   :  { %2212 = vrcp.f32 %v577_v56 }
 0x300   :  { %v2207_v58 = vpop.eup %2206 }
 0x301   :  { %v629_v59 = vsub.f32 %v2474_v63, %v2207_v58  ;;  %v2209_v61 = vpop.eup %2208 }
 0x303   :  { %v631_v62 = vmul.f32 %v2209_v61, %v629_v59 }
 0x304   :  { %v2211_v8 = vpop.eup %2210 }
 0x305   :  { %v630_v9 = vsub.f32 %v2478_v11, %v2211_v8  ;;  %v2526_v10 = vadd.f32 %v2207_v58, %v631_v62  ;;  %v2213_v60 = vpop.eup %2212 }
 0x307   :  { %v632_v6 = vmul.f32 %v2213_v60, %v630_v9  ;;  %v1750_v12 = vpack.c.bf16 %v2526_v10, %v2526_v10 }
 0x309   :  { %v2530_v13 = vadd.f32 %v2211_v8, %v632_v6  ;;  %1659 = vst.msk [vmem:[%s2806_s3 + $0x10] sm:$0xf] %vm259_vm1, %v1750_v12 }
 0x30b   :  { %v635_v63 = vpack.c.bf16 %v2530_v13, %v2526_v10  ;;  %v1751_v11 = vpack.c.bf16 %v2530_v13, %v2530_v13 }
 0x30d   :  { %1660 = vst.msk [vmem:[%s2806_s3 + $0x14] sm:$0xf] %vm259_vm1, %v1751_v11  ;;  %2030 = vmatmul.mubr.msk.bf16.vlgmr.msra.gmra.mxu1 %vm60_vm2, %v635_v63  ;;  %2038 = vmatmul.mubr.msk.bf16.vlgmr.msra.gmra.mxu0 %vm60_vm2, %v635_v63 }
 0x30e   :  { %2042 = vmatpush3.bf16.msra.mxu1 %v2378_v5  ;;  %2045 = vmatprep.mubr.msk.bf16.mxu1 %vm2322_vm0, %v2321_v0 }
 0x30f   :  { %2043 = vmatprep.subr.bf16.mxu1 %v2321_v0  ;;  %2050 = vmatpush3.bf16.msra.mxu0 %v2348_v1 }
 0x310   :  { %2051 = vmatprep.subr.bf16.mxu0 %v2321_v0  ;;  %2053 = vmatprep.mubr.msk.bf16.mxu0 %vm2322_vm0, %v2321_v0 }
 0x312   :  { %2044 = vmatpush3.bf16.msra.mxu1 %v2387_v7 }
 0x313   :  { %2057 = vmatprep.subr.bf16.mxu1 %v2321_v0  ;;  %2052 = vmatpush3.bf16.msra.mxu0 %v2355_v2 }
 0x314   :  { %2065 = vmatprep.subr.bf16.mxu0 %v2321_v0 }
 0x315   :  { %2046 = vmatmul.mubr.msk.bf16.vlgmr.msra.gmra.mxu1 %vm60_vm2, %v635_v63 }
 0x316   :  { %2058 = vmatpush3.bf16.msra.mxu1 %v2364_v3  ;;  %2061 = vmatprep.mubr.msk.bf16.mxu1 %vm2322_vm0, %v2321_v0 }
 0x317   :  { %2059 = vmatprep.subr.bf16.mxu1 %v2321_v0 }
 0x31a   :  { %2060 = vmatpush3.bf16.msra.mxu1 %v2371_v4 }
 0x31b   :  { %2073 = vmatprep.subr.bf16.mxu1 %v2321_v0 }
 0x3cd   :  { %v698_v16 = vpop.f32.mrf.mxu1  ;;  %v739_v17 = vpop.f32.mrf.mxu0 }
 0x3ce   :  { %v746_v18 = vadd.f32 %v1800_v15, %v698_v16  ;;  %v760_v33 = vadd.f32 %v1804_v30, %v739_v17  ;;  %v1869_v16 = vld [vmem:[%s2804_s0 + $0x60] sm:$0xff]  }
 0x3cf   :  { %v2031_v20 = vpop.f32.mrf.mxu1  ;;  %v2039_v21 = vpop.f32.mrf.mxu0  ;;  %v1812_v17 = vunpack.c.l.bf16 %v1869_v16 }
 0x3d0   :  { %v1669_v22 = vmul.f32 -1.442695, %v746_v18  ;;  %v1671_v37 = vmul.f32 -1.442695, %v760_v33  ;;  %v1813_v21 = vunpack.c.h.bf16 %v1869_v16 }
 0x3d1   :  { %v701_v23 = vpop.f32.mrf.mxu1  ;;  %v742_v24 = vpop.f32.mrf.mxu0 }
 0x3d2   :  { %2214 = vpow2.f32 %v1669_v22  ;;  %v747_v26 = vadd.f32 %v1801_v19, %v701_v23  ;;  %v761_v39 = vadd.f32 %v1805_v34, %v742_v24 }
 0x3d3   :  { %v2032_v27 = vpop.f32.mrf.mxu1  ;;  %v2040_v28 = vpop.f32.mrf.mxu0 }
 0x3d4   :  { %v1670_v29 = vmul.f32 -1.442695, %v747_v26  ;;  %v1672_v42 = vmul.f32 -1.442695, %v761_v39  ;;  %v1870_v27 = vld [vmem:[%s2804_s0 + $0x68] sm:$0xff]  }
 0x3d5   :  { %v808_v31 = vpop.f32.mrf.mxu1 }
 0x3d6   :  { %2216 = vpow2.f32 %v1670_v29  ;;  %v809_v48 = vadd.f32 %v2415_v38, %v808_v31 }
 0x3d7   :  { %v2047_v32 = vpop.f32.mrf.mxu1  ;;  %2218 = vpow2.f32 %v1671_v37 }
 0x3d8   :  { %v1816_v32 = vunpack.c.l.bf16 %v1870_v27 }
 0x3d9   :  { %v811_v35 = vpop.f32.mrf.mxu1 }
 0x3da   :  { %v812_v55 = vadd.f32 %v2415_v38, %v811_v35 }
 0x3db   :  { %v2048_v36 = vpop.f32.mrf.mxu1 }
 0x3dc   :  { %v1817_v36 = vunpack.c.h.bf16 %v1870_v27 }
 0x3df   :  { %v2215_v40 = vpop.eup %2214 }
 0x3e0   :  { %v754_v41 = vadd.f32 1.0, %v2215_v40 }
 0x3e2   :  { %2220 = vrcp.f32 %v754_v41 }
 0x3e3   :  { %v2217_v43 = vpop.eup %2216  ;;  %2222 = vpow2.f32 %v1672_v42 }
 0x3e4   :  { %v755_v44 = vadd.f32 1.0, %v2217_v43  ;;  %v2219_v46 = vpop.eup %2218 }
 0x3e5   :  { %v768_v52 = vadd.f32 1.0, %v2219_v46 }
 0x3e6   :  { %2224 = vrcp.f32 %v755_v44 }
 0x3ef   :  { %v2221_v49 = vpop.eup %2220 }
 0x3f0   :  { %v815_v50 = vmul.f32 %v2221_v49, %v809_v48  ;;  %v2223_v51 = vpop.eup %2222 }
 0x3f1   :  { %v769_v58 = vadd.f32 1.0, %v2223_v51 }
 0x3f2   :  { %v817_v53 = vadd.f32 %v1808_v47, %v815_v50  ;;  %v1871_v47 = vld [vmem:[%s2804_s0 + $0x70] sm:$0xff]  }
 0x3f3   :  { %v2225_v56 = vpop.eup %2224  ;;  %v1820_v49 = vunpack.c.l.bf16 %v1871_v47 }
 0x3f4   :  { %2226 = vtanh.f32 %v817_v53  ;;  %v816_v57 = vmul.f32 %v2225_v56, %v812_v55  ;;  %v1821_v56 = vunpack.c.h.bf16 %v1871_v47 }
 0x3f5   :  { %2228 = vrcp.f32 %v768_v52 }
 0x3f6   :  { %v818_v59 = vadd.f32 %v1809_v54, %v816_v57 }
 0x3f8   :  { %2230 = vtanh.f32 %v818_v59 }
 0x3f9   :  { %2232 = vrcp.f32 %v769_v58 }
 0x401   :  { %v2227_v61 = vpop.eup %2226 }
 0x402   :  { %v821_v62 = vsub.f32 %v2526_v10, %v2227_v61  ;;  %v2229_v8 = vpop.eup %2228 }
 0x404   :  { %v823_v9 = vmul.f32 %v2229_v8, %v821_v62 }
 0x405   :  { %v2231_v60 = vpop.eup %2230 }
 0x406   :  { %v822_v6 = vsub.f32 %v2530_v13, %v2231_v60  ;;  %v2578_v12 = vadd.f32 %v2227_v61, %v823_v9  ;;  %v2233_v63 = vpop.eup %2232 }
 0x408   :  { %v824_v11 = vmul.f32 %v2233_v63, %v822_v6  ;;  %v1752_v14 = vpack.c.bf16 %v2578_v12, %v2578_v12 }
 0x40a   :  { %v2582_v15 = vadd.f32 %v2231_v60, %v824_v11  ;;  %1676 = vst.msk [vmem:[%s2806_s3 + $0x18] sm:$0xf] %vm259_vm1, %v1752_v14 }
 0x40c   :  { %v827_v10 = vpack.c.bf16 %v2582_v15, %v2578_v12  ;;  %v1753_v13 = vpack.c.bf16 %v2582_v15, %v2582_v15 }
 0x40e   :  { %1677 = vst.msk [vmem:[%s2806_s3 + $0x1c] sm:$0xf] %vm259_vm1, %v1753_v13  ;;  %2054 = vmatmul.mubr.msk.bf16.vlgmr.msra.gmra.mxu0 %vm60_vm2, %v827_v10  ;;  %2062 = vmatmul.mubr.msk.bf16.vlgmr.msra.gmra.mxu1 %vm60_vm2, %v827_v10 }
 0x40f   :  { %2066 = vmatpush3.bf16.msra.mxu0 %v2378_v5  ;;  %2069 = vmatprep.mubr.msk.bf16.mxu0 %vm2322_vm0, %v2321_v0 }
 0x410   :  { %2067 = vmatprep.subr.bf16.mxu0 %v2321_v0  ;;  %2074 = vmatpush3.bf16.msra.mxu1 %v2348_v1 }
 0x411   :  { %2075 = vmatprep.subr.bf16.mxu1 %v2321_v0  ;;  %2077 = vmatprep.mubr.msk.bf16.mxu1 %vm2322_vm0, %v2321_v0 }
 0x413   :  { %2068 = vmatpush3.bf16.msra.mxu0 %v2387_v7 }
 0x414   :  { %2081 = vmatprep.subr.bf16.mxu0 %v2321_v0  ;;  %2076 = vmatpush3.bf16.msra.mxu1 %v2355_v2 }
 0x415   :  { %2089 = vmatprep.subr.bf16.mxu1 %v2321_v0 }
 0x416   :  { %2070 = vmatmul.mubr.msk.bf16.vlgmr.msra.gmra.mxu0 %vm60_vm2, %v827_v10 }
 0x417   :  { %2082 = vmatpush3.bf16.msra.mxu0 %v2364_v3  ;;  %2085 = vmatprep.mubr.msk.bf16.mxu0 %vm2322_vm0, %v2321_v0 }
 0x418   :  { %2083 = vmatprep.subr.bf16.mxu0 %v2321_v0 }
 0x41b   :  { %2084 = vmatpush3.bf16.msra.mxu0 %v2371_v4 }
 0x41c   :  { %2097 = vmatprep.subr.bf16.mxu0 %v2321_v0 }
 0x4ce   :  { %v890_v18 = vpop.f32.mrf.mxu0  ;;  %v931_v19 = vpop.f32.mrf.mxu1 }
 0x4cf   :  { %v938_v20 = vadd.f32 %v1812_v17, %v890_v18  ;;  %v952_v35 = vadd.f32 %v1816_v32, %v931_v19 }
 0x4d0   :  { %v2055_v22 = vpop.f32.mrf.mxu0  ;;  %v2063_v23 = vpop.f32.mrf.mxu1 }
 0x4d1   :  { %v1686_v24 = vmul.f32 -1.442695, %v938_v20  ;;  %v1688_v40 = vmul.f32 -1.442695, %v952_v35 }
 0x4d2   :  { %v893_v25 = vpop.f32.mrf.mxu0  ;;  %v934_v26 = vpop.f32.mrf.mxu1 }
 0x4d3   :  { %2234 = vpow2.f32 %v1686_v24  ;;  %v939_v28 = vadd.f32 %v1813_v21, %v893_v25  ;;  %v953_v41 = vadd.f32 %v1817_v36, %v934_v26 }
 0x4d4   :  { %v2056_v29 = vpop.f32.mrf.mxu0  ;;  %v2064_v30 = vpop.f32.mrf.mxu1 }
 0x4d5   :  { %v1687_v31 = vmul.f32 -1.442695, %v939_v28  ;;  %v1689_v44 = vmul.f32 -1.442695, %v953_v41 }
 0x4d6   :  { %v1000_v33 = vpop.f32.mrf.mxu0 }
 0x4d7   :  { %2236 = vpow2.f32 %v1687_v31  ;;  %v1001_v50 = vadd.f32 %v2415_v38, %v1000_v33 }
 0x4d8   :  { %v2071_v34 = vpop.f32.mrf.mxu0  ;;  %2238 = vpow2.f32 %v1688_v40 }
 0x4da   :  { %v1003_v37 = vpop.f32.mrf.mxu0 }
 0x4db   :  { %v1004_v57 = vadd.f32 %v2415_v38, %v1003_v37 }
 0x4dc   :  { %v2072_v39 = vpop.f32.mrf.mxu0 }
 0x4e0   :  { %v2235_v42 = vpop.eup %2234 }
 0x4e1   :  { %v946_v43 = vadd.f32 1.0, %v2235_v42 }
 0x4e3   :  { %2240 = vrcp.f32 %v946_v43  ;;  %v1874_v43 = vld [vmem:[%s2804_s0 + $0x88] sm:$0xff]  }
 0x4e4   :  { %v2237_v45 = vpop.eup %2236  ;;  %2242 = vpow2.f32 %v1689_v44 }
 0x4e5   :  { %v947_v46 = vadd.f32 1.0, %v2237_v45  ;;  %v2239_v48 = vpop.eup %2238  ;;  %v1832_v45 = vunpack.c.l.bf16 %v1874_v43 }
 0x4e6   :  { %v960_v54 = vadd.f32 1.0, %v2239_v48 }
 0x4e7   :  { %2244 = vrcp.f32 %v947_v46 }
 0x4f0   :  { %v2241_v51 = vpop.eup %2240 }
 0x4f1   :  { %v1007_v52 = vmul.f32 %v2241_v51, %v1001_v50  ;;  %v2243_v53 = vpop.eup %2242 }
 0x4f2   :  { %v961_v61 = vadd.f32 1.0, %v2243_v53 }
 0x4f3   :  { %v1009_v55 = vadd.f32 %v1820_v49, %v1007_v52  ;;  %v1833_v52 = vunpack.c.h.bf16 %v1874_v43 }
 0x4f4   :  { %v2245_v58 = vpop.eup %2244 }
 0x4f5   :  { %2246 = vtanh.f32 %v1009_v55  ;;  %v1008_v59 = vmul.f32 %v2245_v58, %v1004_v57 }
 0x4f6   :  { %2248 = vrcp.f32 %v960_v54 }
 0x4f7   :  { %v1010_v62 = vadd.f32 %v1821_v56, %v1008_v59 }
 0x4f9   :  { %2250 = vtanh.f32 %v1010_v62 }
 0x4fa   :  { %2252 = vrcp.f32 %v961_v61 }
 0x502   :  { %v2247_v8 = vpop.eup %2246 }
 0x503   :  { %v1013_v9 = vsub.f32 %v2578_v12, %v2247_v8  ;;  %v2249_v60 = vpop.eup %2248 }
 0x505   :  { %v1015_v6 = vmul.f32 %v2249_v60, %v1013_v9 }
 0x506   :  { %v2251_v63 = vpop.eup %2250 }
 0x507   :  { %v1014_v11 = vsub.f32 %v2582_v15, %v2251_v63  ;;  %v2630_v14 = vadd.f32 %v2247_v8, %v1015_v6  ;;  %v2253_v10 = vpop.eup %2252 }
 0x509   :  { %v1016_v13 = vmul.f32 %v2253_v10, %v1014_v11  ;;  %v1754_v16 = vpack.c.bf16 %v2630_v14, %v2630_v14 }
 0x50b   :  { %v2634_v17 = vadd.f32 %v2251_v63, %v1016_v13  ;;  %1693 = vst.msk [vmem:[%s2806_s3 + $0x20] sm:$0xf] %vm259_vm1, %v1754_v16  ;;  %v2705_v13 = vld [vmem:[%s2803_s1 + $0x28] sm:$0xff]  }
 0x50c   :  { %v2315_v16 = vld [vmem:[%s2803_s1 + $0x8] sm:$0xff]  }
 0x50d   :  { %v1019_v12 = vpack.c.bf16 %v2634_v17, %v2630_v14  ;;  %v1755_v15 = vpack.c.bf16 %v2634_v17, %v2634_v17 }
 0x50f   :  { %1694 = vst.msk [vmem:[%s2806_s3 + $0x24] sm:$0xf] %vm259_vm1, %v1755_v15  ;;  %2078 = vmatmul.mubr.msk.bf16.vlgmr.msra.gmra.mxu1 %vm60_vm2, %v1019_v12  ;;  %2086 = vmatmul.mubr.msk.bf16.vlgmr.msra.gmra.mxu0 %vm60_vm2, %v1019_v12  ;;  %v2318_v15 = vld [vmem:[%s2803_s1 + $0x18] sm:$0xff]  }
 0x510   :  { %2090 = vmatpush3.bf16.msra.mxu1 %v2378_v5  ;;  %2093 = vmatprep.mubr.msk.bf16.mxu1 %vm2322_vm0, %v2321_v0 }
 0x511   :  { %2091 = vmatprep.subr.bf16.mxu1 %v2321_v0  ;;  %2098 = vmatpush3.bf16.msra.mxu0 %v2348_v1  ;;  %v1872_v1 = vld [vmem:[%s2804_s0 + $0x78] sm:$0xff]  }
 0x512   :  { %2099 = vmatprep.subr.bf16.mxu0 %v2321_v0  ;;  %2101 = vmatprep.mubr.msk.bf16.mxu0 %vm2322_vm0, %v2321_v0  ;;  %v1825_v19 = vunpack.c.h.bf16 %v1872_v1 }
 0x514   :  { %2092 = vmatpush3.bf16.msra.mxu1 %v2387_v7 }
 0x515   :  { %2105 = vmatprep.subr.bf16.mxu1 %v2321_v0  ;;  %2100 = vmatpush3.bf16.msra.mxu0 %v2355_v2  ;;  %v1824_v2 = vunpack.c.l.bf16 %v1872_v1  ;;  %v2319_v1 = vld [vmem:[%s2803_s1 + $0x10] sm:$0xff]  }
 0x516   :  { %2113 = vmatprep.subr.bf16.mxu0 %v2321_v0 }
 0x517   :  { %2094 = vmatmul.mubr.msk.bf16.vlgmr.msra.gmra.mxu1 %vm60_vm2, %v1019_v12  ;;  %v2317_v12 = vld [vmem:[%s2803_s1] sm:$0xff]  }
 0x518   :  { %2106 = vmatpush3.bf16.msra.mxu1 %v2364_v3  ;;  %2109 = vmatprep.mubr.msk.bf16.mxu1 %vm2322_vm0, %v2321_v0 }
 0x519   :  { %2107 = vmatprep.subr.bf16.mxu1 %v2321_v0 }
 0x51c   :  { %2108 = vmatpush3.bf16.msra.mxu1 %v2371_v4  ;;  %v1873_v4 = vld [vmem:[%s2804_s0 + $0x80] sm:$0xff]  }
 0x51d   :  { %2121 = vmatprep.subr.bf16.mxu1 %v2321_v0  ;;  %v1828_v28 = vunpack.c.l.bf16 %v1873_v4  ;;  %v1829_v32 = vunpack.c.h.bf16 %v1873_v4 }
 0x5cf   :  { %v1082_v5 = vpop.f32.mrf.mxu1  ;;  %v1123_v7 = vpop.f32.mrf.mxu0 }
 0x5d0   :  { %v1130_v18 = vadd.f32 %v1824_v2, %v1082_v5  ;;  %v1144_v31 = vadd.f32 %v1828_v28, %v1123_v7  ;;  %v1875_v2 = vld [vmem:[%s2804_s0 + $0x90] sm:$0xff]  }
 0x5d1   :  { %v2079_v20 = vpop.f32.mrf.mxu1  ;;  %v2087_v3 = vpop.f32.mrf.mxu0  ;;  %v1836_v5 = vunpack.c.l.bf16 %v1875_v2 }
 0x5d2   :  { %v1703_v21 = vmul.f32 -1.442695, %v1130_v18  ;;  %v1705_v35 = vmul.f32 -1.442695, %v1144_v31  ;;  %v1837_v20 = vunpack.c.h.bf16 %v1875_v2 }
 0x5d3   :  { %v1085_v22 = vpop.f32.mrf.mxu1  ;;  %v1126_v23 = vpop.f32.mrf.mxu0 }
 0x5d4   :  { %2254 = vpow2.f32 %v1703_v21  ;;  %v1131_v24 = vadd.f32 %v1825_v19, %v1085_v22  ;;  %v1145_v36 = vadd.f32 %v1829_v32, %v1126_v23 }
 0x5d5   :  { %v2080_v25 = vpop.f32.mrf.mxu1  ;;  %v2088_v26 = vpop.f32.mrf.mxu0 }
 0x5d6   :  { %v1704_v27 = vmul.f32 -1.442695, %v1131_v24  ;;  %v1706_v40 = vmul.f32 -1.442695, %v1145_v36  ;;  %v1876_v24 = vld [vmem:[%s2804_s0 + $0x98] sm:$0xff]  }
 0x5d7   :  { %v1192_v29 = vpop.f32.mrf.mxu1 }
 0x5d8   :  { %2256 = vpow2.f32 %v1704_v27  ;;  %v1193_v46 = vadd.f32 %v2415_v38, %v1192_v29  ;;  %v1840_v29 = vunpack.c.l.bf16 %v1876_v24 }
 0x5d9   :  { %v2095_v30 = vpop.f32.mrf.mxu1  ;;  %2258 = vpow2.f32 %v1705_v35 }
 0x5db   :  { %v1195_v33 = vpop.f32.mrf.mxu1 }
 0x5dc   :  { %v1196_v53 = vadd.f32 %v2415_v38, %v1195_v33  ;;  %v1841_v33 = vunpack.c.h.bf16 %v1876_v24 }
 0x5dd   :  { %v2096_v34 = vpop.f32.mrf.mxu1 }
 0x5e1   :  { %v2255_v37 = vpop.eup %2254 }
 0x5e2   :  { %v1138_v39 = vadd.f32 1.0, %v2255_v37 }
 0x5e4   :  { %2260 = vrcp.f32 %v1138_v39 }
 0x5e5   :  { %v2257_v41 = vpop.eup %2256  ;;  %2262 = vpow2.f32 %v1706_v40 }
 0x5e6   :  { %v1139_v42 = vadd.f32 1.0, %v2257_v41  ;;  %v2259_v44 = vpop.eup %2258 }
 0x5e7   :  { %v1152_v50 = vadd.f32 1.0, %v2259_v44  ;;  %v1877_v44 = vld [vmem:[%s2804_s0 + $0xa0] sm:$0xff]  }
 0x5e8   :  { %2264 = vrcp.f32 %v1139_v42 }
 0x5f1   :  { %v2261_v47 = vpop.eup %2260 }
 0x5f2   :  { %v1199_v48 = vmul.f32 %v2261_v47, %v1193_v46  ;;  %v2263_v49 = vpop.eup %2262  ;;  %v1844_v46 = vunpack.c.l.bf16 %v1877_v44  ;;  %v2750_v47 = vld [vmem:[%s2805_s2] ss:$0 sm:$0xff] }
 0x5f3   :  { %v1153_v56 = vadd.f32 1.0, %v2263_v49 }
 0x5f4   :  { %v1201_v51 = vadd.f32 %v1832_v45, %v1199_v48 }
 0x5f5   :  { %v2265_v54 = vpop.eup %2264 }
 0x5f6   :  { %2266 = vtanh.f32 %v1201_v51  ;;  %v1200_v55 = vmul.f32 %v2265_v54, %v1196_v53  ;;  %v1845_v54 = vunpack.c.h.bf16 %v1877_v44 }
 0x5f7   :  { %2268 = vrcp.f32 %v1152_v50 }
 0x5f8   :  { %v1202_v57 = vadd.f32 %v1833_v52, %v1200_v55 }
 0x5fa   :  { %2270 = vtanh.f32 %v1202_v57 }
 0x5fb   :  { %2272 = vrcp.f32 %v1153_v56 }
 0x603   :  { %v2267_v58 = vpop.eup %2266 }
 0x604   :  { %v1205_v59 = vsub.f32 %v2630_v14, %v2267_v58  ;;  %v2269_v61 = vpop.eup %2268 }
 0x606   :  { %v1207_v62 = vmul.f32 %v2269_v61, %v1205_v59 }
 0x607   :  { %v2271_v8 = vpop.eup %2270 }
 0x608   :  { %v1206_v9 = vsub.f32 %v2634_v17, %v2271_v8  ;;  %v2682_v60 = vadd.f32 %v2267_v58, %v1207_v62  ;;  %v2273_v6 = vpop.eup %2272  ;;  %v2720_v17 = vld [vmem:[%s2803_s1 + $0x20] sm:$0xff]  }
 0x60a   :  { %v1208_v38 = vmul.f32 %v2273_v6, %v1206_v9  ;;  %v1756_v63 = vpack.c.bf16 %v2682_v60, %v2682_v60 }
 0x60c   :  { %v2686_v11 = vadd.f32 %v2271_v8, %v1208_v38  ;;  %1710 = vst.msk [vmem:[%s2806_s3 + $0x28] sm:$0xf] %vm259_vm1, %v1756_v63 }
 0x60e   :  { %v1211_v14 = vpack.c.bf16 %v2686_v11, %v2682_v60  ;;  %v1757_v10 = vpack.c.bf16 %v2686_v11, %v2686_v11 }
 0x610   :  { %1711 = vst.msk [vmem:[%s2806_s3 + $0x2c] sm:$0xf] %vm259_vm1, %v1757_v10  ;;  %2102 = vmatmul.mubr.msk.bf16.vlgmr.msra.gmra.mxu0 %vm60_vm2, %v1211_v14  ;;  %2110 = vmatmul.mubr.msk.bf16.vlgmr.msra.gmra.mxu1 %vm60_vm2, %v1211_v14 }
 0x611   :  { %2114 = vmatpush3.bf16.msra.mxu0 %v2705_v13  ;;  %2117 = vmatprep.mubr.msk.bf16.mxu0 %vm2322_vm0, %v2321_v0 }
 0x612   :  { %2115 = vmatprep.subr.bf16.mxu0 %v2321_v0  ;;  %2122 = vmatpush3.bf16.msra.mxu1 %v2315_v16 }
 0x613   :  { %2123 = vmatprep.subr.bf16.mxu1 %v2321_v0  ;;  %2125 = vmatprep.mubr.msk.bf16.mxu1 %vm2322_vm0, %v2321_v0 }
 0x615   :  { %2116 = vmatpush3.bf16.msra.mxu0 %v2720_v17 }
 0x616   :  { %2129 = vmatprep.subr.bf16.mxu0 %v2321_v0  ;;  %2124 = vmatpush3.bf16.msra.mxu1 %v2317_v12 }
 0x617   :  { %2137 = vmatprep.subr.bf16.mxu1 %v2321_v0 }
 0x618   :  { %2118 = vmatmul.mubr.msk.bf16.vlgmr.msra.gmra.mxu0 %vm60_vm2, %v1211_v14 }
 0x619   :  { %2130 = vmatpush3.bf16.msra.mxu0 %v2318_v15  ;;  %2133 = vmatprep.mubr.msk.bf16.mxu0 %vm2322_vm0, %v2321_v0  ;;  %v1878_v15 = vld [vmem:[%s2804_s0 + $0xa8] sm:$0xff]  }
 0x61a   :  { %2131 = vmatprep.subr.bf16.mxu0 %v2321_v0 }
 0x61d   :  { %2132 = vmatpush3.bf16.msra.mxu0 %v2319_v1  ;;  %v1848_v1 = vunpack.c.l.bf16 %v1878_v15 }
 0x6d0   :  { %v1274_v7 = vpop.f32.mrf.mxu0  ;;  %v1315_v18 = vpop.f32.mrf.mxu1 }
 0x6d1   :  { %v1322_v19 = vadd.f32 %v1836_v5, %v1274_v7  ;;  %v1336_v32 = vadd.f32 %v1840_v29, %v1315_v18  ;;  %v1849_v18 = vunpack.c.h.bf16 %v1878_v15 }
 0x6d2   :  { %v2103_v3 = vpop.f32.mrf.mxu0  ;;  %v2111_v21 = vpop.f32.mrf.mxu1 }
 0x6d3   :  { %v1720_v22 = vmul.f32 -1.442695, %v1322_v19  ;;  %v1722_v36 = vmul.f32 -1.442695, %v1336_v32 }
 0x6d4   :  { %v1277_v23 = vpop.f32.mrf.mxu0  ;;  %v1318_v4 = vpop.f32.mrf.mxu1 }
 0x6d5   :  { %2274 = vpow2.f32 %v1720_v22  ;;  %v1323_v25 = vadd.f32 %v1837_v20, %v1277_v23  ;;  %v1337_v37 = vadd.f32 %v1841_v33, %v1318_v4 }
 0x6d6   :  { %v2104_v26 = vpop.f32.mrf.mxu0  ;;  %v2112_v27 = vpop.f32.mrf.mxu1 }
 0x6d7   :  { %v1721_v28 = vmul.f32 -1.442695, %v1323_v25  ;;  %v1723_v41 = vmul.f32 -1.442695, %v1337_v37 }
 0x6d8   :  { %v1384_v30 = vpop.f32.mrf.mxu0 }
 0x6d9   :  { %2276 = vpow2.f32 %v1721_v28  ;;  %v1385_v48 = vadd.f32 %v2750_v47, %v1384_v30 }
 0x6da   :  { %v2119_v31 = vpop.f32.mrf.mxu0  ;;  %2278 = vpow2.f32 %v1722_v36 }
 0x6dc   :  { %v1387_v34 = vpop.f32.mrf.mxu0 }
 0x6dd   :  { %v1388_v55 = vadd.f32 %v2750_v47, %v1387_v34 }
 0x6de   :  { %v2120_v35 = vpop.f32.mrf.mxu0 }
 0x6e2   :  { %v2275_v39 = vpop.eup %2274 }
 0x6e3   :  { %v1330_v40 = vadd.f32 1.0, %v2275_v39  ;;  %v1880_v39 = vld [vmem:[%s2804_s0 + $0xb8] sm:$0xff]  }
 0x6e5   :  { %2280 = vrcp.f32 %v1330_v40 }
 0x6e6   :  { %v2277_v42 = vpop.eup %2276  ;;  %2282 = vpow2.f32 %v1723_v41  ;;  %v1856_v41 = vunpack.c.l.bf16 %v1880_v39 }
 0x6e7   :  { %v1331_v43 = vadd.f32 1.0, %v2277_v42  ;;  %v2279_v45 = vpop.eup %2278 }
 0x6e8   :  { %v1344_v52 = vadd.f32 1.0, %v2279_v45 }
 0x6e9   :  { %2284 = vrcp.f32 %v1331_v43 }
 0x6f2   :  { %v2281_v49 = vpop.eup %2280 }
 0x6f3   :  { %v1391_v50 = vmul.f32 %v2281_v49, %v1385_v48  ;;  %v2283_v51 = vpop.eup %2282  ;;  %v1857_v49 = vunpack.c.h.bf16 %v1880_v39 }
 0x6f4   :  { %v1345_v58 = vadd.f32 1.0, %v2283_v51 }
 0x6f5   :  { %v1393_v53 = vadd.f32 %v1844_v46, %v1391_v50 }
 0x6f6   :  { %v2285_v56 = vpop.eup %2284 }
 0x6f7   :  { %2286 = vtanh.f32 %v1393_v53  ;;  %v1392_v57 = vmul.f32 %v2285_v56, %v1388_v55 }
 0x6f8   :  { %2288 = vrcp.f32 %v1344_v52 }
 0x6f9   :  { %v1394_v59 = vadd.f32 %v1845_v54, %v1392_v57 }
 0x6fb   :  { %2290 = vtanh.f32 %v1394_v59 }
 0x6fc   :  { %2292 = vrcp.f32 %v1345_v58 }
 0x704   :  { %v2287_v61 = vpop.eup %2286 }
 0x705   :  { %v1397_v62 = vsub.f32 %v2682_v60, %v2287_v61  ;;  %v2289_v8 = vpop.eup %2288 }
 0x707   :  { %v1399_v9 = vmul.f32 %v2289_v8, %v1397_v62 }
 0x708   :  { %v2291_v6 = vpop.eup %2290 }
 0x709   :  { %v1398_v38 = vsub.f32 %v2686_v11, %v2291_v6  ;;  %v2756_v63 = vadd.f32 %v2287_v61, %v1399_v9  ;;  %v2293_v14 = vpop.eup %2292 }
 0x70b   :  { %v1400_v10 = vmul.f32 %v2293_v14, %v1398_v38  ;;  %v1758_v16 = vpack.c.bf16 %v2756_v63, %v2756_v63 }
 0x70d   :  { %v2760_v12 = vadd.f32 %v2291_v6, %v1400_v10  ;;  %1727 = vst.msk [vmem:[%s2806_s3 + $0x30] sm:$0xf] %vm259_vm1, %v1758_v16 }
 0x70f   :  { %v1403_v60 = vpack.c.bf16 %v2760_v12, %v2756_v63  ;;  %v1759_v11 = vpack.c.bf16 %v2760_v12, %v2760_v12 }
 0x711   :  { %1728 = vst.msk [vmem:[%s2806_s3 + $0x34] sm:$0xf] %vm259_vm1, %v1759_v11  ;;  %2126 = vmatmul.mubr.msk.bf16.vlgmr.msra.gmra.mxu1 %vm60_vm2, %v1403_v60  ;;  %2134 = vmatmul.mubr.msk.bf16.vlgmr.msra.gmra.mxu0 %vm60_vm2, %v1403_v60 }
 0x712   :  { %2138 = vmatpush3.bf16.msra.mxu1 %v2705_v13  ;;  %2141 = vmatprep.mubr.msk.bf16.mxu1 %vm2322_vm0, %v2321_v0 }
 0x713   :  { %2139 = vmatprep.subr.bf16.mxu1 %v2321_v0  ;;  %v1879_v0 = vld [vmem:[%s2804_s0 + $0xb0] sm:$0xff]  }
 0x714   :  { %v1852_v24 = vunpack.c.l.bf16 %v1879_v0  ;;  %v1853_v28 = vunpack.c.h.bf16 %v1879_v0 }
 0x716   :  { %2140 = vmatpush3.bf16.msra.mxu1 %v2720_v17 }
 0x719   :  { %2142 = vmatmul.mubr.msk.bf16.vlgmr.msra.gmra.mxu1 %vm60_vm2, %v1403_v60 }
 0x7d1   :  { %v1466_v2 = vpop.f32.mrf.mxu1  ;;  %v1507_v5 = vpop.f32.mrf.mxu0 }
 0x7d2   :  { %v1514_v7 = vadd.f32 %v1848_v1, %v1466_v2  ;;  %v1528_v27 = vadd.f32 %v1852_v24, %v1507_v5 }
 0x7d3   :  { %v2127_v19 = vpop.f32.mrf.mxu1  ;;  %v2135_v13 = vpop.f32.mrf.mxu0 }
 0x7d4   :  { %v1737_v20 = vmul.f32 -1.442695, %v1514_v7  ;;  %v1739_v31 = vmul.f32 -1.442695, %v1528_v27 }
 0x7d5   :  { %v1469_v3 = vpop.f32.mrf.mxu1  ;;  %v1510_v21 = vpop.f32.mrf.mxu0 }
 0x7d6   :  { %2294 = vpow2.f32 %v1737_v20  ;;  %v1515_v17 = vadd.f32 %v1849_v18, %v1469_v3  ;;  %v1529_v32 = vadd.f32 %v1853_v28, %v1510_v21 }
 0x7d7   :  { %v2128_v22 = vpop.f32.mrf.mxu1  ;;  %v2136_v23 = vpop.f32.mrf.mxu0 }
 0x7d8   :  { %v1738_v4 = vmul.f32 -1.442695, %v1515_v17  ;;  %v1740_v35 = vmul.f32 -1.442695, %v1529_v32 }
 0x7d9   :  { %v1576_v25 = vpop.f32.mrf.mxu1 }
 0x7da   :  { %2296 = vpow2.f32 %v1738_v4  ;;  %v1577_v42 = vadd.f32 %v2750_v47, %v1576_v25 }
 0x7db   :  { %v2143_v26 = vpop.f32.mrf.mxu1  ;;  %2298 = vpow2.f32 %v1739_v31 }
 0x7dd   :  { %v1579_v29 = vpop.f32.mrf.mxu1 }
 0x7de   :  { %v1580_v50 = vadd.f32 %v2750_v47, %v1579_v29 }
 0x7df   :  { %v2144_v30 = vpop.f32.mrf.mxu1 }
 0x7e3   :  { %v2295_v33 = vpop.eup %2294 }
 0x7e4   :  { %v1522_v34 = vadd.f32 1.0, %v2295_v33 }
 0x7e6   :  { %2300 = vrcp.f32 %v1522_v34 }
 0x7e7   :  { %v2297_v36 = vpop.eup %2296  ;;  %2302 = vpow2.f32 %v1740_v35 }
 0x7e8   :  { %v1523_v37 = vadd.f32 1.0, %v2297_v36  ;;  %v2299_v40 = vpop.eup %2298 }
 0x7e9   :  { %v1536_v46 = vadd.f32 1.0, %v2299_v40 }
 0x7ea   :  { %2304 = vrcp.f32 %v1523_v37 }
 0x7f3   :  { %v2301_v43 = vpop.eup %2300 }
 0x7f4   :  { %v1583_v44 = vmul.f32 %v2301_v43, %v1577_v42  ;;  %v2303_v45 = vpop.eup %2302 }
 0x7f5   :  { %v1537_v53 = vadd.f32 1.0, %v2303_v45 }
 0x7f6   :  { %v1585_v48 = vadd.f32 %v1856_v41, %v1583_v44 }
 0x7f7   :  { %v2305_v51 = vpop.eup %2304 }
 0x7f8   :  { %2306 = vtanh.f32 %v1585_v48  ;;  %v1584_v52 = vmul.f32 %v2305_v51, %v1580_v50 }
 0x7f9   :  { %2308 = vrcp.f32 %v1536_v46 }
 0x7fa   :  { %v1586_v54 = vadd.f32 %v1857_v49, %v1584_v52 }
 0x7fc   :  { %2310 = vtanh.f32 %v1586_v54 }
 0x7fd   :  { %2312 = vrcp.f32 %v1537_v53 }
 0x805   :  { %v2307_v55 = vpop.eup %2306 }
 0x806   :  { %v1589_v56 = vsub.f32 %v2756_v63, %v2307_v55  ;;  %v2309_v57 = vpop.eup %2308 }
 0x808   :  { %v1591_v58 = vmul.f32 %v2309_v57, %v1589_v56 }
 0x809   :  { %v2311_v59 = vpop.eup %2310 }
 0x80a   :  { %v1593_v61 = vadd.f32 %v2307_v55, %v1591_v58  ;;  %v1590_v62 = vsub.f32 %v2760_v12, %v2311_v59  ;;  %v2313_v8 = vpop.eup %2312 }
 0x80c   :  { %v1760_v9 = vpack.c.bf16 %v1593_v61, %v1593_v61  ;;  %v1592_v47 = vmul.f32 %v2313_v8, %v1590_v62 }
 0x80e   :  { %1744 = vst.msk [vmem:[%s2806_s3 + $0x38] sm:$0xf] %vm259_vm1, %v1760_v9  ;;  %v1594_v6 = vadd.f32 %v2311_v59, %v1592_v47 }
 0x810   :  { %v1761_v38 = vpack.c.bf16 %v1594_v6, %v1594_v6 }
 0x812   :  { %1745 = vst.msk [vmem:[%s2806_s3 + $0x3c] sm:$0xf] %vm259_vm1, %v1761_v38 }

// kernel: question_embedding_forward.3
= control target key start
LH: loop header
LB: loop body
LE: loop exit
PB: predicated region body
PF: predicated region fallthrough
CT: control target
= control target key end

     0   :  { %v2196_v0 = vmov 0.0   ;;  %vm2197_vm0 = vmmov 0   ;;  %v2198_v6 = vmov 0   ;;  %vm60_vm1 = vcmask 261120   ;;  %s2594_s1 = inlined_call_operand.vmem [shape: bf16[3,32,32], index: 1, kind: input, shape index: {}]   ;;  %s2595_s0 = inlined_call_operand.vmem [shape: bf16[8,3,16,32], index: 0, kind: input, shape index: {}]   ;;  %s2596_s2 = inlined_call_operand.vmem [shape: f32[1,32], index: 2, kind: input, shape index: {}]   ;;  %s2597_s3 = inlined_call_operand.vmem [shape: f32[16,32], index: 3, kind: output, shape index: {}]  }
   0x1   :  { %1828 = vmatprep.subr.bf16.mxu0 %v2196_v0  ;;  %v2223_v1 = vld [vmem:[%s2594_s1 + $0x8] sm:$0xff]   ;;  %1832 = vmatprep.mubr.msk.bf16.mxu0 %vm2197_vm0, %v2196_v0  ;;  %v2230_v2 = vld [vmem:[%s2594_s1] sm:$0xff]   ;;  %v2239_v3 = vld [vmem:[%s2594_s1 + $0x18] sm:$0xff]  }
   0x2   :  { %1836 = vmatprep.subr.bf16.mxu1 %v2196_v0  ;;  %1840 = vmatprep.mubr.msk.bf16.mxu1 %vm2197_vm0, %v2196_v0  ;;  %v2246_v4 = vld [vmem:[%s2594_s1 + $0x10] sm:$0xff]   ;;  %v2253_v5 = vld [vmem:[%s2594_s1 + $0x28] sm:$0xff]   ;;  %v2262_v7 = vld [vmem:[%s2594_s1 + $0x20] sm:$0xff]  }
   0x3   :  { %1829 = vmatpush3.bf16.msra.mxu0 %v2223_v1  ;;  %1837 = vmatpush3.bf16.msra.mxu1 %v2239_v3  ;;  %v1638_v8 = vld [vmem:[%s2595_s0] sm:$0xff]   ;;  %v1733_v19 = vld [vmem:[%s2595_s0 + $0x8] sm:$0xff]   ;;  %v1734_v39 = vld [vmem:[%s2595_s0 + $0x10] sm:$0xff]  }
   0x4   :  { %1830 = vmatprep.subr.bf16.mxu0 %v2196_v0  ;;  %1838 = vmatprep.subr.bf16.mxu1 %v2196_v0  ;;  %v1639_v9 = vunpack.c.l.bf16 %v1638_v8  ;;  %v1640_v12 = vunpack.c.h.bf16 %v1638_v8  ;;  %v1643_v23 = vunpack.c.l.bf16 %v1733_v19  ;;  %v1644_v28 = vunpack.c.h.bf16 %v1733_v19  ;;  %v2290_v38 = vld [vmem:[%s2596_s2] ss:$0 sm:$0xff]  ;;  %v1735_v8 = vld [vmem:[%s2595_s0 + $0x18] sm:$0xff]  }
   0x5   :  { %v1647_v42 = vunpack.c.l.bf16 %v1734_v39  ;;  %v1648_v48 = vunpack.c.h.bf16 %v1734_v39  ;;  %v1737_v39 = vld [vmem:[%s2595_s0 + $0x28] sm:$0xff]  }
   0x7   :  { %1831 = vmatpush3.bf16.msra.mxu0 %v2230_v2  ;;  %1839 = vmatpush3.bf16.msra.mxu1 %v2246_v4 }
   0x8   :  { %1844 = vmatprep.subr.bf16.mxu0 %v2196_v0  ;;  %1852 = vmatprep.subr.bf16.mxu1 %v2196_v0 }
   0xa   :  { %1833 = vmatmul.mubr.bf16.vlgmr.msra.gmra.mxu0 %v2198_v6  ;;  %1841 = vmatmul.mubr.bf16.vlgmr.msra.gmra.mxu1 %v2198_v6 }
   0xb   :  { %1845 = vmatpush3.bf16.msra.mxu0 %v2253_v5  ;;  %1848 = vmatprep.mubr.msk.bf16.mxu0 %vm2197_vm0, %v2196_v0 }
   0xc   :  { %1846 = vmatprep.subr.bf16.mxu0 %v2196_v0  ;;  %1853 = vmatpush3.bf16.msra.mxu1 %v2223_v1 }
   0xd   :  { %1856 = vmatprep.mubr.msk.bf16.mxu1 %vm2197_vm0, %v2196_v0  ;;  %1854 = vmatprep.subr.bf16.mxu1 %v2196_v0 }
   0xf   :  { %1847 = vmatpush3.bf16.msra.mxu0 %v2262_v7 }
  0x10   :  { %1860 = vmatprep.subr.bf16.mxu0 %v2196_v0  ;;  %1855 = vmatpush3.bf16.msra.mxu1 %v2230_v2 }
  0x11   :  { %1868 = vmatprep.subr.bf16.mxu1 %v2196_v0 }
  0x12   :  { %1849 = vmatmul.mubr.bf16.vlgmr.msra.gmra.mxu0 %v2198_v6 }
  0x13   :  { %1861 = vmatpush3.bf16.msra.mxu0 %v2239_v3  ;;  %1864 = vmatprep.mubr.msk.bf16.mxu0 %vm2197_vm0, %v2196_v0 }
  0x14   :  { %1862 = vmatprep.subr.bf16.mxu0 %v2196_v0 }
  0x17   :  { %1863 = vmatpush3.bf16.msra.mxu0 %v2246_v4 }
  0x18   :  { %1876 = vmatprep.subr.bf16.mxu0 %v2196_v0 }
  0xca   :  { %v98_v10 = vpop.f32.mrf.mxu0  ;;  %v151_v14 = vpop.f32.mrf.mxu1 }
  0xcb   :  { %v158_v11 = vadd.f32 %v1639_v9, %v98_v10  ;;  %v172_v27 = vadd.f32 %v1643_v23, %v151_v14  ;;  %v1651_v9 = vunpack.c.l.bf16 %v1735_v8 }
  0xcc   :  { %v1834_v13 = vpop.f32.mrf.mxu0  ;;  %v1842_v17 = vpop.f32.mrf.mxu1 }
  0xcd   :  { %v1540_v15 = vmul.f32 -1.442695, %v158_v11  ;;  %v1542_v31 = vmul.f32 -1.442695, %v172_v27  ;;  %v1652_v13 = vunpack.c.h.bf16 %v1735_v8 }
  0xce   :  { %v101_v16 = vpop.f32.mrf.mxu0  ;;  %v154_v21 = vpop.f32.mrf.mxu1 }
  0xcf   :  { %2029 = vpow2.f32 %v1540_v15  ;;  %v159_v18 = vadd.f32 %v1640_v12, %v101_v16  ;;  %v173_v32 = vadd.f32 %v1644_v28, %v154_v21 }
  0xd0   :  { %v1835_v20 = vpop.f32.mrf.mxu0  ;;  %v1843_v24 = vpop.f32.mrf.mxu1 }
  0xd1   :  { %v1541_v22 = vmul.f32 -1.442695, %v159_v18  ;;  %v1543_v35 = vmul.f32 -1.442695, %v173_v32 }
  0xd2   :  { %v232_v25 = vpop.f32.mrf.mxu0 }
  0xd3   :  { %2031 = vpow2.f32 %v1541_v22  ;;  %v233_v40 = vadd.f32 %v2290_v38, %v232_v25  ;;  %v1736_v22 = vld [vmem:[%s2595_s0 + $0x20] sm:$0xff]  }
  0xd4   :  { %v1850_v26 = vpop.f32.mrf.mxu0  ;;  %2033 = vpow2.f32 %v1542_v31  ;;  %v1655_v25 = vunpack.c.l.bf16 %v1736_v22  ;;  %v1656_v27 = vunpack.c.h.bf16 %v1736_v22  ;;  %v1739_v22 = vld [vmem:[%s2595_s0 + $0x38] sm:$0xff]  }
  0xd6   :  { %v235_v29 = vpop.f32.mrf.mxu0 }
  0xd7   :  { %v236_v49 = vadd.f32 %v2290_v38, %v235_v29 }
  0xd8   :  { %v1851_v30 = vpop.f32.mrf.mxu0 }
  0xdc   :  { %v2030_v33 = vpop.eup %2029 }
  0xdd   :  { %v166_v34 = vadd.f32 1.0, %v2030_v33 }
  0xdf   :  { %2035 = vrcp.f32 %v166_v34 }
  0xe0   :  { %v2032_v36 = vpop.eup %2031  ;;  %2037 = vpow2.f32 %v1543_v35 }
  0xe1   :  { %v167_v37 = vadd.f32 1.0, %v2032_v36  ;;  %v2034_v41 = vpop.eup %2033 }
  0xe2   :  { %v180_v46 = vadd.f32 1.0, %v2034_v41 }
  0xe3   :  { %2039 = vrcp.f32 %v167_v37 }
  0xec   :  { %v2036_v43 = vpop.eup %2035 }
  0xed   :  { %v239_v44 = vmul.f32 %v2036_v43, %v233_v40  ;;  %v2038_v45 = vpop.eup %2037  ;;  %v1659_v40 = vunpack.c.l.bf16 %v1737_v39 }
  0xee   :  { %v181_v52 = vadd.f32 1.0, %v2038_v45 }
  0xef   :  { %v241_v47 = vadd.f32 %v1647_v42, %v239_v44 }
  0xf0   :  { %v2040_v50 = vpop.eup %2039 }
  0xf1   :  { %2041 = vtanh.f32 %v241_v47  ;;  %v240_v51 = vmul.f32 %v2040_v50, %v236_v49  ;;  %v1660_v47 = vunpack.c.h.bf16 %v1737_v39  ;;  %v1740_v39 = vld [vmem:[%s2595_s0 + $0x40] sm:$0xff]  }
  0xf2   :  { %2043 = vrcp.f32 %v180_v46 }
  0xf3   :  { %v242_v53 = vadd.f32 %v1648_v48, %v240_v51 }
  0xf5   :  { %2045 = vtanh.f32 %v242_v53 }
  0xf6   :  { %2047 = vrcp.f32 %v181_v52 }
  0xfe   :  { %v2042_v54 = vpop.eup %2041 }
  0xff   :  { %v245_v55 = vsub.f32 0.0, %v2042_v54  ;;  %v2044_v56 = vpop.eup %2043 }
 0x101   :  { %v247_v59 = vmul.f32 %v2044_v56, %v245_v55 }
 0x102   :  { %v2046_v57 = vpop.eup %2045 }
 0x103   :  { %v246_v58 = vsub.f32 0.0, %v2046_v57  ;;  %v2048_v60 = vpop.eup %2047  ;;  %v2297_v62 = vadd.f32 %v2042_v54, %v247_v59 }
 0x105   :  { %v248_v61 = vmul.f32 %v2048_v60, %v246_v58 }
 0x107   :  { %v2299_v63 = vadd.f32 %v2046_v57, %v248_v61 }
 0x109   :  { %v266_v6 = vpack.c.bf16 %v2299_v63, %v2297_v62 }
 0x10b   :  { %1857 = vmatmul.mubr.msk.bf16.vlgmr.msra.gmra.mxu1 %vm60_vm1, %v266_v6  ;;  %1865 = vmatmul.mubr.msk.bf16.vlgmr.msra.gmra.mxu0 %vm60_vm1, %v266_v6 }
 0x10c   :  { %1869 = vmatpush3.bf16.msra.mxu1 %v2253_v5  ;;  %1872 = vmatprep.mubr.msk.bf16.mxu1 %vm2197_vm0, %v2196_v0 }
 0x10d   :  { %1870 = vmatprep.subr.bf16.mxu1 %v2196_v0  ;;  %1877 = vmatpush3.bf16.msra.mxu0 %v2223_v1 }
 0x10e   :  { %1878 = vmatprep.subr.bf16.mxu0 %v2196_v0  ;;  %1880 = vmatprep.mubr.msk.bf16.mxu0 %vm2197_vm0, %v2196_v0 }
 0x110   :  { %1871 = vmatpush3.bf16.msra.mxu1 %v2262_v7 }
 0x111   :  { %1884 = vmatprep.subr.bf16.mxu1 %v2196_v0  ;;  %1879 = vmatpush3.bf16.msra.mxu0 %v2230_v2 }
 0x112   :  { %1892 = vmatprep.subr.bf16.mxu0 %v2196_v0 }
 0x113   :  { %1873 = vmatmul.mubr.msk.bf16.vlgmr.msra.gmra.mxu1 %vm60_vm1, %v266_v6 }
 0x114   :  { %1885 = vmatpush3.bf16.msra.mxu1 %v2239_v3  ;;  %1888 = vmatprep.mubr.msk.bf16.mxu1 %vm2197_vm0, %v2196_v0 }
 0x115   :  { %1886 = vmatprep.subr.bf16.mxu1 %v2196_v0 }
 0x118   :  { %1887 = vmatpush3.bf16.msra.mxu1 %v2246_v4 }
 0x119   :  { %1900 = vmatprep.subr.bf16.mxu1 %v2196_v0 }
 0x1cb   :  { %v304_v10 = vpop.f32.mrf.mxu1  ;;  %v345_v11 = vpop.f32.mrf.mxu0 }
 0x1cc   :  { %v352_v12 = vadd.f32 %v1651_v9, %v304_v10  ;;  %v366_v29 = vadd.f32 %v1655_v25, %v345_v11  ;;  %v1667_v25 = vunpack.c.l.bf16 %v1739_v22 }
 0x1cd   :  { %v1858_v14 = vpop.f32.mrf.mxu1  ;;  %v1866_v15 = vpop.f32.mrf.mxu0 }
 0x1ce   :  { %v1554_v16 = vmul.f32 -1.442695, %v352_v12  ;;  %v1556_v33 = vmul.f32 -1.442695, %v366_v29 }
 0x1cf   :  { %v307_v17 = vpop.f32.mrf.mxu1  ;;  %v348_v18 = vpop.f32.mrf.mxu0 }
 0x1d0   :  { %2049 = vpow2.f32 %v1554_v16  ;;  %v353_v19 = vadd.f32 %v1652_v13, %v307_v17  ;;  %v367_v31 = vadd.f32 %v1656_v27, %v348_v18  ;;  %v1668_v27 = vunpack.c.h.bf16 %v1739_v22  ;;  %v1742_v22 = vld [vmem:[%s2595_s0 + $0x50] sm:$0xff]  }
 0x1d1   :  { %v1859_v20 = vpop.f32.mrf.mxu1  ;;  %v1867_v21 = vpop.f32.mrf.mxu0 }
 0x1d2   :  { %v1555_v23 = vmul.f32 -1.442695, %v353_v19  ;;  %v1557_v35 = vmul.f32 -1.442695, %v367_v31 }
 0x1d3   :  { %v414_v24 = vpop.f32.mrf.mxu1 }
 0x1d4   :  { %2051 = vpow2.f32 %v1555_v23  ;;  %v415_v41 = vadd.f32 %v2290_v38, %v414_v24 }
 0x1d5   :  { %v1874_v26 = vpop.f32.mrf.mxu1 }
 0x1d7   :  { %v417_v28 = vpop.f32.mrf.mxu1 }
 0x1d8   :  { %v418_v48 = vadd.f32 %v2290_v38, %v417_v28 }
 0x1d9   :  { %v1875_v30 = vpop.f32.mrf.mxu1 }
 0x1dd   :  { %v2050_v32 = vpop.eup %2049 }
 0x1de   :  { %v360_v34 = vadd.f32 1.0, %v2050_v32 }
 0x1e0   :  { %2053 = vrcp.f32 %v360_v34 }
 0x1e1   :  { %v2052_v36 = vpop.eup %2051  ;;  %2055 = vpow2.f32 %v1556_v33 }
 0x1e2   :  { %v361_v37 = vadd.f32 1.0, %v2052_v36  ;;  %2057 = vpow2.f32 %v1557_v35 }
 0x1e4   :  { %2059 = vrcp.f32 %v361_v37 }
 0x1ed   :  { %v2054_v42 = vpop.eup %2053 }
 0x1ee   :  { %v2056_v43 = vpop.eup %2055  ;;  %v421_v44 = vmul.f32 %v2054_v42, %v415_v41 }
 0x1ef   :  { %v2058_v45 = vpop.eup %2057  ;;  %v374_v50 = vadd.f32 1.0, %v2056_v43 }
 0x1f0   :  { %v423_v46 = vadd.f32 %v1659_v40, %v421_v44  ;;  %v375_v52 = vadd.f32 1.0, %v2058_v45  ;;  %v1671_v40 = vunpack.c.l.bf16 %v1740_v39 }
 0x1f1   :  { %v2060_v49 = vpop.eup %2059 }
 0x1f2   :  { %2061 = vtanh.f32 %v423_v46  ;;  %v422_v51 = vmul.f32 %v2060_v49, %v418_v48 }
 0x1f3   :  { %2063 = vrcp.f32 %v374_v50 }
 0x1f4   :  { %v424_v53 = vadd.f32 %v1660_v47, %v422_v51  ;;  %v1672_v47 = vunpack.c.h.bf16 %v1740_v39  ;;  %v1743_v39 = vld [vmem:[%s2595_s0 + $0x58] sm:$0xff]  }
 0x1f6   :  { %2065 = vtanh.f32 %v424_v53 }
 0x1f7   :  { %2067 = vrcp.f32 %v375_v52 }
 0x1ff   :  { %v2062_v54 = vpop.eup %2061 }
 0x200   :  { %v427_v55 = vsub.f32 %v2297_v62, %v2062_v54  ;;  %v2064_v56 = vpop.eup %2063  ;;  %v1738_v62 = vld [vmem:[%s2595_s0 + $0x30] sm:$0xff]  }
 0x201   :  { %v1664_v13 = vunpack.c.h.bf16 %v1738_v62 }
 0x202   :  { %v429_v59 = vmul.f32 %v2064_v56, %v427_v55 }
 0x203   :  { %v2066_v57 = vpop.eup %2065 }
 0x204   :  { %v428_v58 = vsub.f32 %v2299_v63, %v2066_v57  ;;  %v2068_v60 = vpop.eup %2067  ;;  %v2337_v6 = vadd.f32 %v2062_v54, %v429_v59  ;;  %v1663_v63 = vunpack.c.l.bf16 %v1738_v62 }
 0x206   :  { %v430_v61 = vmul.f32 %v2068_v60, %v428_v58 }
 0x208   :  { %v2339_v8 = vadd.f32 %v2066_v57, %v430_v61 }
 0x20a   :  { %v448_v9 = vpack.c.bf16 %v2339_v8, %v2337_v6 }
 0x20c   :  { %1881 = vmatmul.mubr.msk.bf16.vlgmr.msra.gmra.mxu0 %vm60_vm1, %v448_v9  ;;  %1889 = vmatmul.mubr.msk.bf16.vlgmr.msra.gmra.mxu1 %vm60_vm1, %v448_v9 }
 0x20d   :  { %1893 = vmatpush3.bf16.msra.mxu0 %v2253_v5  ;;  %1896 = vmatprep.mubr.msk.bf16.mxu0 %vm2197_vm0, %v2196_v0 }
 0x20e   :  { %1894 = vmatprep.subr.bf16.mxu0 %v2196_v0  ;;  %1901 = vmatpush3.bf16.msra.mxu1 %v2223_v1 }
 0x20f   :  { %1902 = vmatprep.subr.bf16.mxu1 %v2196_v0  ;;  %1904 = vmatprep.mubr.msk.bf16.mxu1 %vm2197_vm0, %v2196_v0 }
 0x211   :  { %1895 = vmatpush3.bf16.msra.mxu0 %v2262_v7 }
 0x212   :  { %1908 = vmatprep.subr.bf16.mxu0 %v2196_v0  ;;  %1903 = vmatpush3.bf16.msra.mxu1 %v2230_v2 }
 0x213   :  { %1916 = vmatprep.subr.bf16.mxu1 %v2196_v0 }
 0x214   :  { %1897 = vmatmul.mubr.msk.bf16.vlgmr.msra.gmra.mxu0 %vm60_vm1, %v448_v9 }
 0x215   :  { %1909 = vmatpush3.bf16.msra.mxu0 %v2239_v3  ;;  %1912 = vmatprep.mubr.msk.bf16.mxu0 %vm2197_vm0, %v2196_v0 }
 0x216   :  { %1910 = vmatprep.subr.bf16.mxu0 %v2196_v0 }
 0x219   :  { %1911 = vmatpush3.bf16.msra.mxu0 %v2246_v4 }
 0x21a   :  { %1924 = vmatprep.subr.bf16.mxu0 %v2196_v0 }
 0x2cc   :  { %v486_v10 = vpop.f32.mrf.mxu0  ;;  %v527_v11 = vpop.f32.mrf.mxu1 }
 0x2cd   :  { %v534_v12 = vadd.f32 %v1663_v63, %v486_v10  ;;  %v548_v29 = vadd.f32 %v1667_v25, %v527_v11  ;;  %v1679_v25 = vunpack.c.l.bf16 %v1742_v22 }
 0x2ce   :  { %v1882_v14 = vpop.f32.mrf.mxu0  ;;  %v1890_v15 = vpop.f32.mrf.mxu1 }
 0x2cf   :  { %v1567_v16 = vmul.f32 -1.442695, %v534_v12  ;;  %v1569_v33 = vmul.f32 -1.442695, %v548_v29 }
 0x2d0   :  { %v489_v17 = vpop.f32.mrf.mxu0  ;;  %v530_v18 = vpop.f32.mrf.mxu1 }
 0x2d1   :  { %2069 = vpow2.f32 %v1567_v16  ;;  %v535_v19 = vadd.f32 %v1664_v13, %v489_v17  ;;  %v549_v31 = vadd.f32 %v1668_v27, %v530_v18  ;;  %v1680_v27 = vunpack.c.h.bf16 %v1742_v22  ;;  %v1745_v22 = vld [vmem:[%s2595_s0 + $0x68] sm:$0xff]  }
 0x2d2   :  { %v1883_v20 = vpop.f32.mrf.mxu0  ;;  %v1891_v21 = vpop.f32.mrf.mxu1 }
 0x2d3   :  { %v1568_v23 = vmul.f32 -1.442695, %v535_v19  ;;  %v1570_v35 = vmul.f32 -1.442695, %v549_v31 }
 0x2d4   :  { %v596_v24 = vpop.f32.mrf.mxu0 }
 0x2d5   :  { %2071 = vpow2.f32 %v1568_v23  ;;  %v597_v41 = vadd.f32 %v2290_v38, %v596_v24 }
 0x2d6   :  { %v1898_v26 = vpop.f32.mrf.mxu0 }
 0x2d8   :  { %v599_v28 = vpop.f32.mrf.mxu0 }
 0x2d9   :  { %v600_v48 = vadd.f32 %v2290_v38, %v599_v28 }
 0x2da   :  { %v1899_v30 = vpop.f32.mrf.mxu0 }
 0x2de   :  { %v2070_v32 = vpop.eup %2069 }
 0x2df   :  { %v542_v34 = vadd.f32 1.0, %v2070_v32 }
 0x2e1   :  { %2073 = vrcp.f32 %v542_v34 }
 0x2e2   :  { %v2072_v36 = vpop.eup %2071  ;;  %2075 = vpow2.f32 %v1569_v33 }
 0x2e3   :  { %v543_v37 = vadd.f32 1.0, %v2072_v36  ;;  %2077 = vpow2.f32 %v1570_v35 }
 0x2e5   :  { %2079 = vrcp.f32 %v543_v37 }
 0x2ee   :  { %v2074_v42 = vpop.eup %2073 }
 0x2ef   :  { %v2076_v43 = vpop.eup %2075  ;;  %v603_v44 = vmul.f32 %v2074_v42, %v597_v41 }
 0x2f0   :  { %v2078_v45 = vpop.eup %2077  ;;  %v556_v50 = vadd.f32 1.0, %v2076_v43 }
 0x2f1   :  { %v605_v46 = vadd.f32 %v1671_v40, %v603_v44  ;;  %v557_v52 = vadd.f32 1.0, %v2078_v45  ;;  %v1683_v40 = vunpack.c.l.bf16 %v1743_v39 }
 0x2f2   :  { %v2080_v49 = vpop.eup %2079 }
 0x2f3   :  { %2081 = vtanh.f32 %v605_v46  ;;  %v604_v51 = vmul.f32 %v2080_v49, %v600_v48 }
 0x2f4   :  { %2083 = vrcp.f32 %v556_v50 }
 0x2f5   :  { %v606_v53 = vadd.f32 %v1672_v47, %v604_v51  ;;  %v1684_v47 = vunpack.c.h.bf16 %v1743_v39  ;;  %v1746_v39 = vld [vmem:[%s2595_s0 + $0x70] sm:$0xff]  }
 0x2f7   :  { %2085 = vtanh.f32 %v606_v53 }
 0x2f8   :  { %2087 = vrcp.f32 %v557_v52 }
 0x300   :  { %v2082_v54 = vpop.eup %2081 }
 0x301   :  { %v609_v55 = vsub.f32 %v2337_v6, %v2082_v54  ;;  %v2084_v56 = vpop.eup %2083  ;;  %v1741_v6 = vld [vmem:[%s2595_s0 + $0x48] sm:$0xff]  }
 0x302   :  { %v1676_v13 = vunpack.c.h.bf16 %v1741_v6 }
 0x303   :  { %v611_v59 = vmul.f32 %v2084_v56, %v609_v55 }
 0x304   :  { %v2086_v57 = vpop.eup %2085 }
 0x305   :  { %v610_v58 = vsub.f32 %v2339_v8, %v2086_v57  ;;  %v2088_v60 = vpop.eup %2087  ;;  %v2377_v9 = vadd.f32 %v2082_v54, %v611_v59  ;;  %v1675_v8 = vunpack.c.l.bf16 %v1741_v6 }
 0x307   :  { %v612_v61 = vmul.f32 %v2088_v60, %v610_v58 }
 0x309   :  { %v2379_v62 = vadd.f32 %v2086_v57, %v612_v61 }
 0x30b   :  { %v630_v63 = vpack.c.bf16 %v2379_v62, %v2377_v9 }
 0x30d   :  { %1905 = vmatmul.mubr.msk.bf16.vlgmr.msra.gmra.mxu1 %vm60_vm1, %v630_v63  ;;  %1913 = vmatmul.mubr.msk.bf16.vlgmr.msra.gmra.mxu0 %vm60_vm1, %v630_v63 }
 0x30e   :  { %1917 = vmatpush3.bf16.msra.mxu1 %v2253_v5  ;;  %1920 = vmatprep.mubr.msk.bf16.mxu1 %vm2197_vm0, %v2196_v0 }
 0x30f   :  { %1918 = vmatprep.subr.bf16.mxu1 %v2196_v0  ;;  %1925 = vmatpush3.bf16.msra.mxu0 %v2223_v1 }
 0x310   :  { %1926 = vmatprep.subr.bf16.mxu0 %v2196_v0  ;;  %1928 = vmatprep.mubr.msk.bf16.mxu0 %vm2197_vm0, %v2196_v0 }
 0x312   :  { %1919 = vmatpush3.bf16.msra.mxu1 %v2262_v7 }
 0x313   :  { %1932 = vmatprep.subr.bf16.mxu1 %v2196_v0  ;;  %1927 = vmatpush3.bf16.msra.mxu0 %v2230_v2 }
 0x314   :  { %1940 = vmatprep.subr.bf16.mxu0 %v2196_v0 }
 0x315   :  { %1921 = vmatmul.mubr.msk.bf16.vlgmr.msra.gmra.mxu1 %vm60_vm1, %v630_v63 }
 0x316   :  { %1933 = vmatpush3.bf16.msra.mxu1 %v2239_v3  ;;  %1936 = vmatprep.mubr.msk.bf16.mxu1 %vm2197_vm0, %v2196_v0 }
 0x317   :  { %1934 = vmatprep.subr.bf16.mxu1 %v2196_v0 }
 0x31a   :  { %1935 = vmatpush3.bf16.msra.mxu1 %v2246_v4 }
 0x31b   :  { %1948 = vmatprep.subr.bf16.mxu1 %v2196_v0 }
 0x3cd   :  { %v668_v10 = vpop.f32.mrf.mxu1  ;;  %v709_v11 = vpop.f32.mrf.mxu0 }
 0x3ce   :  { %v716_v12 = vadd.f32 %v1675_v8, %v668_v10  ;;  %v730_v29 = vadd.f32 %v1679_v25, %v709_v11  ;;  %v1691_v25 = vunpack.c.l.bf16 %v1745_v22 }
 0x3cf   :  { %v1906_v14 = vpop.f32.mrf.mxu1  ;;  %v1914_v15 = vpop.f32.mrf.mxu0 }
 0x3d0   :  { %v1580_v16 = vmul.f32 -1.442695, %v716_v12  ;;  %v1582_v33 = vmul.f32 -1.442695, %v730_v29 }
 0x3d1   :  { %v671_v17 = vpop.f32.mrf.mxu1  ;;  %v712_v18 = vpop.f32.mrf.mxu0 }
 0x3d2   :  { %2089 = vpow2.f32 %v1580_v16  ;;  %v717_v19 = vadd.f32 %v1676_v13, %v671_v17  ;;  %v731_v31 = vadd.f32 %v1680_v27, %v712_v18  ;;  %v1692_v27 = vunpack.c.h.bf16 %v1745_v22 }
 0x3d3   :  { %v1907_v20 = vpop.f32.mrf.mxu1  ;;  %v1915_v21 = vpop.f32.mrf.mxu0 }
 0x3d4   :  { %v1581_v23 = vmul.f32 -1.442695, %v717_v19  ;;  %v1583_v35 = vmul.f32 -1.442695, %v731_v31 }
 0x3d5   :  { %v778_v24 = vpop.f32.mrf.mxu1 }
 0x3d6   :  { %2091 = vpow2.f32 %v1581_v23  ;;  %v779_v41 = vadd.f32 %v2290_v38, %v778_v24 }
 0x3d7   :  { %v1922_v26 = vpop.f32.mrf.mxu1 }
 0x3d9   :  { %v781_v28 = vpop.f32.mrf.mxu1 }
 0x3da   :  { %v782_v48 = vadd.f32 %v2290_v38, %v781_v28 }
 0x3db   :  { %v1923_v30 = vpop.f32.mrf.mxu1 }
 0x3df   :  { %v2090_v32 = vpop.eup %2089 }
 0x3e0   :  { %v724_v34 = vadd.f32 1.0, %v2090_v32 }
 0x3e2   :  { %2093 = vrcp.f32 %v724_v34 }
 0x3e3   :  { %v2092_v36 = vpop.eup %2091  ;;  %2095 = vpow2.f32 %v1582_v33 }
 0x3e4   :  { %v725_v37 = vadd.f32 1.0, %v2092_v36  ;;  %2097 = vpow2.f32 %v1583_v35 }
 0x3e6   :  { %2099 = vrcp.f32 %v725_v37 }
 0x3ef   :  { %v2094_v42 = vpop.eup %2093 }
 0x3f0   :  { %v2096_v43 = vpop.eup %2095  ;;  %v785_v44 = vmul.f32 %v2094_v42, %v779_v41 }
 0x3f1   :  { %v2098_v45 = vpop.eup %2097  ;;  %v738_v50 = vadd.f32 1.0, %v2096_v43 }
 0x3f2   :  { %v787_v46 = vadd.f32 %v1683_v40, %v785_v44  ;;  %v739_v52 = vadd.f32 1.0, %v2098_v45  ;;  %v1695_v40 = vunpack.c.l.bf16 %v1746_v39 }
 0x3f3   :  { %v2100_v49 = vpop.eup %2099 }
 0x3f4   :  { %2101 = vtanh.f32 %v787_v46  ;;  %v786_v51 = vmul.f32 %v2100_v49, %v782_v48 }
 0x3f5   :  { %2103 = vrcp.f32 %v738_v50 }
 0x3f6   :  { %v788_v53 = vadd.f32 %v1684_v47, %v786_v51  ;;  %v1696_v47 = vunpack.c.h.bf16 %v1746_v39 }
 0x3f8   :  { %2105 = vtanh.f32 %v788_v53 }
 0x3f9   :  { %2107 = vrcp.f32 %v739_v52 }
 0x401   :  { %v2102_v54 = vpop.eup %2101 }
 0x402   :  { %v791_v55 = vsub.f32 %v2377_v9, %v2102_v54  ;;  %v2104_v56 = vpop.eup %2103  ;;  %v1744_v9 = vld [vmem:[%s2595_s0 + $0x60] sm:$0xff]  }
 0x403   :  { %v1688_v13 = vunpack.c.h.bf16 %v1744_v9 }
 0x404   :  { %v793_v59 = vmul.f32 %v2104_v56, %v791_v55 }
 0x405   :  { %v2106_v57 = vpop.eup %2105 }
 0x406   :  { %v792_v58 = vsub.f32 %v2379_v62, %v2106_v57  ;;  %v2108_v60 = vpop.eup %2107  ;;  %v2417_v63 = vadd.f32 %v2102_v54, %v793_v59  ;;  %v1687_v62 = vunpack.c.l.bf16 %v1744_v9 }
 0x408   :  { %v794_v61 = vmul.f32 %v2108_v60, %v792_v58 }
 0x40a   :  { %v2419_v6 = vadd.f32 %v2106_v57, %v794_v61 }
 0x40c   :  { %v812_v8 = vpack.c.bf16 %v2419_v6, %v2417_v63 }
 0x40e   :  { %1929 = vmatmul.mubr.msk.bf16.vlgmr.msra.gmra.mxu0 %vm60_vm1, %v812_v8  ;;  %1937 = vmatmul.mubr.msk.bf16.vlgmr.msra.gmra.mxu1 %vm60_vm1, %v812_v8 }
 0x40f   :  { %1941 = vmatpush3.bf16.msra.mxu0 %v2253_v5  ;;  %1944 = vmatprep.mubr.msk.bf16.mxu0 %vm2197_vm0, %v2196_v0 }
 0x410   :  { %1942 = vmatprep.subr.bf16.mxu0 %v2196_v0  ;;  %1949 = vmatpush3.bf16.msra.mxu1 %v2223_v1 }
 0x411   :  { %1950 = vmatprep.subr.bf16.mxu1 %v2196_v0  ;;  %1952 = vmatprep.mubr.msk.bf16.mxu1 %vm2197_vm0, %v2196_v0 }
 0x413   :  { %1943 = vmatpush3.bf16.msra.mxu0 %v2262_v7 }
 0x414   :  { %1956 = vmatprep.subr.bf16.mxu0 %v2196_v0  ;;  %1951 = vmatpush3.bf16.msra.mxu1 %v2230_v2 }
 0x415   :  { %1964 = vmatprep.subr.bf16.mxu1 %v2196_v0 }
 0x416   :  { %1945 = vmatmul.mubr.msk.bf16.vlgmr.msra.gmra.mxu0 %vm60_vm1, %v812_v8 }
 0x417   :  { %1957 = vmatpush3.bf16.msra.mxu0 %v2239_v3  ;;  %1960 = vmatprep.mubr.msk.bf16.mxu0 %vm2197_vm0, %v2196_v0 }
 0x418   :  { %1958 = vmatprep.subr.bf16.mxu0 %v2196_v0 }
 0x41b   :  { %1959 = vmatpush3.bf16.msra.mxu0 %v2246_v4 }
 0x41c   :  { %1972 = vmatprep.subr.bf16.mxu0 %v2196_v0 }
 0x4ce   :  { %v850_v10 = vpop.f32.mrf.mxu0  ;;  %v891_v11 = vpop.f32.mrf.mxu1 }
 0x4cf   :  { %v898_v12 = vadd.f32 %v1687_v62, %v850_v10  ;;  %v912_v29 = vadd.f32 %v1691_v25, %v891_v11 }
 0x4d0   :  { %v1930_v14 = vpop.f32.mrf.mxu0  ;;  %v1938_v15 = vpop.f32.mrf.mxu1 }
 0x4d1   :  { %v1593_v16 = vmul.f32 -1.442695, %v898_v12  ;;  %v1595_v33 = vmul.f32 -1.442695, %v912_v29 }
 0x4d2   :  { %v853_v17 = vpop.f32.mrf.mxu0  ;;  %v894_v18 = vpop.f32.mrf.mxu1 }
 0x4d3   :  { %2109 = vpow2.f32 %v1593_v16  ;;  %v899_v19 = vadd.f32 %v1688_v13, %v853_v17  ;;  %v913_v31 = vadd.f32 %v1692_v27, %v894_v18  ;;  %v1748_v16 = vld [vmem:[%s2595_s0 + $0x80] sm:$0xff]  }
 0x4d4   :  { %v1931_v20 = vpop.f32.mrf.mxu0  ;;  %v1939_v21 = vpop.f32.mrf.mxu1 }
 0x4d5   :  { %v1594_v23 = vmul.f32 -1.442695, %v899_v19  ;;  %v1596_v35 = vmul.f32 -1.442695, %v913_v31  ;;  %v1703_v19 = vunpack.c.l.bf16 %v1748_v16  ;;  %v1704_v21 = vunpack.c.h.bf16 %v1748_v16  ;;  %v1751_v16 = vld [vmem:[%s2595_s0 + $0x98] sm:$0xff]  }
 0x4d6   :  { %v960_v24 = vpop.f32.mrf.mxu0 }
 0x4d7   :  { %2111 = vpow2.f32 %v1594_v23  ;;  %v961_v41 = vadd.f32 %v2290_v38, %v960_v24 }
 0x4d8   :  { %v1946_v26 = vpop.f32.mrf.mxu0 }
 0x4da   :  { %v963_v28 = vpop.f32.mrf.mxu0 }
 0x4db   :  { %v964_v48 = vadd.f32 %v2290_v38, %v963_v28 }
 0x4dc   :  { %v1947_v30 = vpop.f32.mrf.mxu0 }
 0x4e0   :  { %v2110_v32 = vpop.eup %2109 }
 0x4e1   :  { %v906_v34 = vadd.f32 1.0, %v2110_v32  ;;  %v1749_v32 = vld [vmem:[%s2595_s0 + $0x88] sm:$0xff]  }
 0x4e3   :  { %2113 = vrcp.f32 %v906_v34 }
 0x4e4   :  { %v2112_v36 = vpop.eup %2111  ;;  %2115 = vpow2.f32 %v1595_v33  ;;  %v1707_v33 = vunpack.c.l.bf16 %v1749_v32 }
 0x4e5   :  { %v907_v37 = vadd.f32 1.0, %v2112_v36  ;;  %2117 = vpow2.f32 %v1596_v35 }
 0x4e7   :  { %2119 = vrcp.f32 %v907_v37 }
 0x4f0   :  { %v2114_v42 = vpop.eup %2113 }
 0x4f1   :  { %v2116_v43 = vpop.eup %2115  ;;  %v967_v44 = vmul.f32 %v2114_v42, %v961_v41  ;;  %v1708_v41 = vunpack.c.h.bf16 %v1749_v32  ;;  %v1752_v32 = vld [vmem:[%s2595_s0 + $0xa0] sm:$0xff]  }
 0x4f2   :  { %v2118_v45 = vpop.eup %2117  ;;  %v920_v50 = vadd.f32 1.0, %v2116_v43 }
 0x4f3   :  { %v969_v46 = vadd.f32 %v1695_v40, %v967_v44  ;;  %v921_v52 = vadd.f32 1.0, %v2118_v45 }
 0x4f4   :  { %v2120_v49 = vpop.eup %2119 }
 0x4f5   :  { %2121 = vtanh.f32 %v969_v46  ;;  %v968_v51 = vmul.f32 %v2120_v49, %v964_v48 }
 0x4f6   :  { %2123 = vrcp.f32 %v920_v50 }
 0x4f7   :  { %v970_v53 = vadd.f32 %v1696_v47, %v968_v51 }
 0x4f9   :  { %2125 = vtanh.f32 %v970_v53 }
 0x4fa   :  { %2127 = vrcp.f32 %v921_v52 }
 0x502   :  { %v2122_v54 = vpop.eup %2121 }
 0x503   :  { %v973_v55 = vsub.f32 %v2417_v63, %v2122_v54  ;;  %v2124_v56 = vpop.eup %2123 }
 0x505   :  { %v975_v59 = vmul.f32 %v2124_v56, %v973_v55 }
 0x506   :  { %v2126_v57 = vpop.eup %2125 }
 0x507   :  { %v974_v58 = vsub.f32 %v2419_v6, %v2126_v57  ;;  %v2128_v60 = vpop.eup %2127  ;;  %v2457_v8 = vadd.f32 %v2122_v54, %v975_v59  ;;  %v2508_v59 = vld [vmem:[%s2594_s1 + $0x28] sm:$0xff]  }
 0x509   :  { %v976_v61 = vmul.f32 %v2128_v60, %v974_v58  ;;  %v2190_v60 = vld [vmem:[%s2594_s1 + $0x8] sm:$0xff]  }
 0x50b   :  { %v2459_v9 = vadd.f32 %v2126_v57, %v976_v61  ;;  %v2523_v61 = vld [vmem:[%s2594_s1 + $0x20] sm:$0xff]  }
 0x50d   :  { %v994_v62 = vpack.c.bf16 %v2459_v9, %v2457_v8 }
 0x50f   :  { %1953 = vmatmul.mubr.msk.bf16.vlgmr.msra.gmra.mxu1 %vm60_vm1, %v994_v62  ;;  %1961 = vmatmul.mubr.msk.bf16.vlgmr.msra.gmra.mxu0 %vm60_vm1, %v994_v62 }
 0x510   :  { %1965 = vmatpush3.bf16.msra.mxu1 %v2253_v5  ;;  %1968 = vmatprep.mubr.msk.bf16.mxu1 %vm2197_vm0, %v2196_v0 }
 0x511   :  { %1966 = vmatprep.subr.bf16.mxu1 %v2196_v0  ;;  %1973 = vmatpush3.bf16.msra.mxu0 %v2223_v1  ;;  %v1747_v1 = vld [vmem:[%s2595_s0 + $0x78] sm:$0xff]  }
 0x512   :  { %1974 = vmatprep.subr.bf16.mxu0 %v2196_v0  ;;  %1976 = vmatprep.mubr.msk.bf16.mxu0 %vm2197_vm0, %v2196_v0  ;;  %v1700_v6 = vunpack.c.h.bf16 %v1747_v1 }
 0x514   :  { %1967 = vmatpush3.bf16.msra.mxu1 %v2262_v7 }
 0x515   :  { %1980 = vmatprep.subr.bf16.mxu1 %v2196_v0  ;;  %1975 = vmatpush3.bf16.msra.mxu0 %v2230_v2  ;;  %v1699_v2 = vunpack.c.l.bf16 %v1747_v1  ;;  %v1750_v1 = vld [vmem:[%s2595_s0 + $0x90] sm:$0xff]  }
 0x516   :  { %1988 = vmatprep.subr.bf16.mxu0 %v2196_v0 }
 0x517   :  { %1969 = vmatmul.mubr.msk.bf16.vlgmr.msra.gmra.mxu1 %vm60_vm1, %v994_v62  ;;  %v2194_v62 = vld [vmem:[%s2594_s1 + $0x10] sm:$0xff]  }
 0x518   :  { %1981 = vmatpush3.bf16.msra.mxu1 %v2239_v3  ;;  %1984 = vmatprep.mubr.msk.bf16.mxu1 %vm2197_vm0, %v2196_v0 }
 0x519   :  { %1982 = vmatprep.subr.bf16.mxu1 %v2196_v0 }
 0x51c   :  { %1983 = vmatpush3.bf16.msra.mxu1 %v2246_v4 }
 0x51d   :  { %1996 = vmatprep.subr.bf16.mxu1 %v2196_v0 }
 0x5cf   :  { %v1032_v5 = vpop.f32.mrf.mxu1  ;;  %v1073_v7 = vpop.f32.mrf.mxu0 }
 0x5d0   :  { %v1080_v63 = vadd.f32 %v1699_v2, %v1032_v5  ;;  %v1094_v23 = vadd.f32 %v1703_v19, %v1073_v7  ;;  %v1711_v2 = vunpack.c.l.bf16 %v1750_v1  ;;  %v1715_v19 = vunpack.c.l.bf16 %v1751_v16 }
 0x5d1   :  { %v1954_v10 = vpop.f32.mrf.mxu1  ;;  %v1962_v3 = vpop.f32.mrf.mxu0 }
 0x5d2   :  { %v1606_v11 = vmul.f32 -1.442695, %v1080_v63  ;;  %v1608_v27 = vmul.f32 -1.442695, %v1094_v23 }
 0x5d3   :  { %v1035_v12 = vpop.f32.mrf.mxu1  ;;  %v1076_v13 = vpop.f32.mrf.mxu0 }
 0x5d4   :  { %2129 = vpow2.f32 %v1606_v11  ;;  %v1081_v14 = vadd.f32 %v1700_v6, %v1035_v12  ;;  %v1095_v25 = vadd.f32 %v1704_v21, %v1076_v13  ;;  %v1712_v6 = vunpack.c.h.bf16 %v1750_v1 }
 0x5d5   :  { %v1955_v15 = vpop.f32.mrf.mxu1  ;;  %v1963_v4 = vpop.f32.mrf.mxu0  ;;  %v1716_v21 = vunpack.c.h.bf16 %v1751_v16 }
 0x5d6   :  { %v1607_v17 = vmul.f32 -1.442695, %v1081_v14  ;;  %v1609_v29 = vmul.f32 -1.442695, %v1095_v25 }
 0x5d7   :  { %v1142_v18 = vpop.f32.mrf.mxu1 }
 0x5d8   :  { %2131 = vpow2.f32 %v1607_v17  ;;  %v1143_v34 = vadd.f32 %v2290_v38, %v1142_v18 }
 0x5d9   :  { %v1970_v20 = vpop.f32.mrf.mxu1 }
 0x5db   :  { %v1145_v22 = vpop.f32.mrf.mxu1 }
 0x5dc   :  { %v1146_v42 = vadd.f32 %v2290_v38, %v1145_v22 }
 0x5dd   :  { %v1971_v24 = vpop.f32.mrf.mxu1 }
 0x5e1   :  { %v2130_v26 = vpop.eup %2129 }
 0x5e2   :  { %v1088_v28 = vadd.f32 1.0, %v2130_v26 }
 0x5e4   :  { %2133 = vrcp.f32 %v1088_v28 }
 0x5e5   :  { %v2132_v30 = vpop.eup %2131  ;;  %2135 = vpow2.f32 %v1608_v27 }
 0x5e6   :  { %v1089_v31 = vadd.f32 1.0, %v2132_v30  ;;  %2137 = vpow2.f32 %v1609_v29 }
 0x5e8   :  { %2139 = vrcp.f32 %v1089_v31 }
 0x5f1   :  { %v2134_v35 = vpop.eup %2133 }
 0x5f2   :  { %v2136_v36 = vpop.eup %2135  ;;  %v1149_v37 = vmul.f32 %v2134_v35, %v1143_v34 }
 0x5f3   :  { %v2138_v39 = vpop.eup %2137  ;;  %v1102_v44 = vadd.f32 1.0, %v2136_v36 }
 0x5f4   :  { %v1151_v40 = vadd.f32 %v1707_v33, %v1149_v37  ;;  %v1103_v46 = vadd.f32 1.0, %v2138_v39  ;;  %v1719_v33 = vunpack.c.l.bf16 %v1752_v32 }
 0x5f5   :  { %v2140_v43 = vpop.eup %2139 }
 0x5f6   :  { %2141 = vtanh.f32 %v1151_v40  ;;  %v1150_v45 = vmul.f32 %v2140_v43, %v1146_v42  ;;  %v2554_v42 = vld [vmem:[%s2596_s2] ss:$0 sm:$0xff] }
 0x5f7   :  { %2143 = vrcp.f32 %v1102_v44 }
 0x5f8   :  { %v1152_v47 = vadd.f32 %v1708_v41, %v1150_v45  ;;  %v1720_v41 = vunpack.c.h.bf16 %v1752_v32 }
 0x5fa   :  { %2145 = vtanh.f32 %v1152_v47 }
 0x5fb   :  { %2147 = vrcp.f32 %v1103_v46 }
 0x603   :  { %v2142_v48 = vpop.eup %2141 }
 0x604   :  { %v1155_v49 = vsub.f32 %v2457_v8, %v2142_v48  ;;  %v2144_v50 = vpop.eup %2143  ;;  %v2192_v8 = vld [vmem:[%s2594_s1] sm:$0xff]  }
 0x606   :  { %v1157_v53 = vmul.f32 %v2144_v50, %v1155_v49 }
 0x607   :  { %v2146_v51 = vpop.eup %2145 }
 0x608   :  { %v1156_v52 = vsub.f32 %v2459_v9, %v2146_v51  ;;  %v2148_v54 = vpop.eup %2147  ;;  %v2497_v56 = vadd.f32 %v2142_v48, %v1157_v53  ;;  %v2193_v9 = vld [vmem:[%s2594_s1 + $0x18] sm:$0xff]  }
 0x60a   :  { %v1158_v55 = vmul.f32 %v2148_v54, %v1156_v52 }
 0x60c   :  { %v2499_v57 = vadd.f32 %v2146_v51, %v1158_v55 }
 0x60e   :  { %v1176_v58 = vpack.c.bf16 %v2499_v57, %v2497_v56 }
 0x610   :  { %1977 = vmatmul.mubr.msk.bf16.vlgmr.msra.gmra.mxu0 %vm60_vm1, %v1176_v58  ;;  %1985 = vmatmul.mubr.msk.bf16.vlgmr.msra.gmra.mxu1 %vm60_vm1, %v1176_v58 }
 0x611   :  { %1989 = vmatpush3.bf16.msra.mxu0 %v2508_v59  ;;  %1992 = vmatprep.mubr.msk.bf16.mxu0 %vm2197_vm0, %v2196_v0 }
 0x612   :  { %1990 = vmatprep.subr.bf16.mxu0 %v2196_v0  ;;  %1997 = vmatpush3.bf16.msra.mxu1 %v2190_v60 }
 0x613   :  { %1998 = vmatprep.subr.bf16.mxu1 %v2196_v0  ;;  %2000 = vmatprep.mubr.msk.bf16.mxu1 %vm2197_vm0, %v2196_v0 }
 0x615   :  { %1991 = vmatpush3.bf16.msra.mxu0 %v2523_v61 }
 0x616   :  { %2004 = vmatprep.subr.bf16.mxu0 %v2196_v0  ;;  %1999 = vmatpush3.bf16.msra.mxu1 %v2192_v8 }
 0x617   :  { %2012 = vmatprep.subr.bf16.mxu1 %v2196_v0 }
 0x618   :  { %1993 = vmatmul.mubr.msk.bf16.vlgmr.msra.gmra.mxu0 %vm60_vm1, %v1176_v58 }
 0x619   :  { %2005 = vmatpush3.bf16.msra.mxu0 %v2193_v9  ;;  %2008 = vmatprep.mubr.msk.bf16.mxu0 %vm2197_vm0, %v2196_v0 }
 0x61a   :  { %2006 = vmatprep.subr.bf16.mxu0 %v2196_v0 }
 0x61d   :  { %2007 = vmatpush3.bf16.msra.mxu0 %v2194_v62 }
 0x6d0   :  { %v1214_v5 = vpop.f32.mrf.mxu0  ;;  %v1255_v7 = vpop.f32.mrf.mxu1 }
 0x6d1   :  { %v1262_v63 = vadd.f32 %v1711_v2, %v1214_v5  ;;  %v1276_v23 = vadd.f32 %v1715_v19, %v1255_v7 }
 0x6d2   :  { %v1978_v10 = vpop.f32.mrf.mxu0  ;;  %v1986_v3 = vpop.f32.mrf.mxu1 }
 0x6d3   :  { %v1619_v11 = vmul.f32 -1.442695, %v1262_v63  ;;  %v1621_v27 = vmul.f32 -1.442695, %v1276_v23 }
 0x6d4   :  { %v1217_v12 = vpop.f32.mrf.mxu0  ;;  %v1258_v13 = vpop.f32.mrf.mxu1 }
 0x6d5   :  { %2149 = vpow2.f32 %v1619_v11  ;;  %v1263_v14 = vadd.f32 %v1712_v6, %v1217_v12  ;;  %v1277_v25 = vadd.f32 %v1716_v21, %v1258_v13 }
 0x6d6   :  { %v1979_v15 = vpop.f32.mrf.mxu0  ;;  %v1987_v4 = vpop.f32.mrf.mxu1 }
 0x6d7   :  { %v1620_v17 = vmul.f32 -1.442695, %v1263_v14  ;;  %v1622_v29 = vmul.f32 -1.442695, %v1277_v25  ;;  %v1755_v25 = vld [vmem:[%s2595_s0 + $0xb8] sm:$0xff]  }
 0x6d8   :  { %v1324_v18 = vpop.f32.mrf.mxu0 }
 0x6d9   :  { %2151 = vpow2.f32 %v1620_v17  ;;  %v1325_v34 = vadd.f32 %v2290_v38, %v1324_v18 }
 0x6da   :  { %v1994_v20 = vpop.f32.mrf.mxu0 }
 0x6dc   :  { %v1327_v22 = vpop.f32.mrf.mxu0 }
 0x6dd   :  { %v1328_v43 = vadd.f32 %v2554_v42, %v1327_v22 }
 0x6de   :  { %v1995_v24 = vpop.f32.mrf.mxu0 }
 0x6e2   :  { %v2150_v26 = vpop.eup %2149 }
 0x6e3   :  { %v1270_v28 = vadd.f32 1.0, %v2150_v26 }
 0x6e5   :  { %2153 = vrcp.f32 %v1270_v28 }
 0x6e6   :  { %v2152_v30 = vpop.eup %2151  ;;  %2155 = vpow2.f32 %v1621_v27  ;;  %v1731_v27 = vunpack.c.l.bf16 %v1755_v25 }
 0x6e7   :  { %v1271_v31 = vadd.f32 1.0, %v2152_v30  ;;  %2157 = vpow2.f32 %v1622_v29 }
 0x6e9   :  { %2159 = vrcp.f32 %v1271_v31 }
 0x6f2   :  { %v2154_v35 = vpop.eup %2153 }
 0x6f3   :  { %v2156_v36 = vpop.eup %2155  ;;  %v1331_v37 = vmul.f32 %v2154_v35, %v1325_v34  ;;  %v1732_v34 = vunpack.c.h.bf16 %v1755_v25 }
 0x6f4   :  { %v2158_v39 = vpop.eup %2157  ;;  %v1284_v45 = vadd.f32 1.0, %v2156_v36 }
 0x6f5   :  { %v1333_v40 = vadd.f32 %v1719_v33, %v1331_v37  ;;  %v1285_v47 = vadd.f32 1.0, %v2158_v39 }
 0x6f6   :  { %v2160_v44 = vpop.eup %2159 }
 0x6f7   :  { %2161 = vtanh.f32 %v1333_v40  ;;  %v1332_v46 = vmul.f32 %v2160_v44, %v1328_v43 }
 0x6f8   :  { %2163 = vrcp.f32 %v1284_v45 }
 0x6f9   :  { %v1334_v48 = vadd.f32 %v1720_v41, %v1332_v46 }
 0x6fb   :  { %2165 = vtanh.f32 %v1334_v48 }
 0x6fc   :  { %2167 = vrcp.f32 %v1285_v47 }
 0x704   :  { %v2162_v38 = vpop.eup %2161 }
 0x705   :  { %v1337_v49 = vsub.f32 %v2497_v56, %v2162_v38  ;;  %v2164_v50 = vpop.eup %2163  ;;  %v1753_v56 = vld [vmem:[%s2595_s0 + $0xa8] sm:$0xff]  }
 0x706   :  { %v1724_v2 = vunpack.c.h.bf16 %v1753_v56 }
 0x707   :  { %v1339_v53 = vmul.f32 %v2164_v50, %v1337_v49 }
 0x708   :  { %v2166_v51 = vpop.eup %2165 }
 0x709   :  { %v1338_v52 = vsub.f32 %v2499_v57, %v2166_v51  ;;  %v2168_v54 = vpop.eup %2167  ;;  %v2559_v58 = vadd.f32 %v2162_v38, %v1339_v53  ;;  %v1723_v57 = vunpack.c.l.bf16 %v1753_v56 }
 0x70b   :  { %v1340_v55 = vmul.f32 %v2168_v54, %v1338_v52 }
 0x70d   :  { %v2561_v60 = vadd.f32 %v2166_v51, %v1340_v55 }
 0x70f   :  { %v1358_v8 = vpack.c.bf16 %v2561_v60, %v2559_v58 }
 0x711   :  { %2001 = vmatmul.mubr.msk.bf16.vlgmr.msra.gmra.mxu1 %vm60_vm1, %v1358_v8  ;;  %2009 = vmatmul.mubr.msk.bf16.vlgmr.msra.gmra.mxu0 %vm60_vm1, %v1358_v8 }
 0x712   :  { %2013 = vmatpush3.bf16.msra.mxu1 %v2508_v59  ;;  %2016 = vmatprep.mubr.msk.bf16.mxu1 %vm2197_vm0, %v2196_v0 }
 0x713   :  { %2014 = vmatprep.subr.bf16.mxu1 %v2196_v0  ;;  %v1754_v0 = vld [vmem:[%s2595_s0 + $0xb0] sm:$0xff]  }
 0x714   :  { %v1727_v12 = vunpack.c.l.bf16 %v1754_v0  ;;  %v1728_v4 = vunpack.c.h.bf16 %v1754_v0 }
 0x716   :  { %2015 = vmatpush3.bf16.msra.mxu1 %v2523_v61 }
 0x719   :  { %2017 = vmatmul.mubr.msk.bf16.vlgmr.msra.gmra.mxu1 %vm60_vm1, %v1358_v8 }
 0x7d1   :  { %v1396_v9 = vpop.f32.mrf.mxu1  ;;  %v1437_v62 = vpop.f32.mrf.mxu0 }
 0x7d2   :  { %v1444_v1 = vadd.f32 %v1723_v57, %v1396_v9  ;;  %v1458_v15 = vadd.f32 %v1727_v12, %v1437_v62 }
 0x7d3   :  { %v2002_v5 = vpop.f32.mrf.mxu1  ;;  %v2010_v59 = vpop.f32.mrf.mxu0 }
 0x7d4   :  { %v1632_v7 = vmul.f32 -1.442695, %v1444_v1  ;;  %v1634_v18 = vmul.f32 -1.442695, %v1458_v15 }
 0x7d5   :  { %v1399_v63 = vpop.f32.mrf.mxu1  ;;  %v1440_v6 = vpop.f32.mrf.mxu0 }
 0x7d6   :  { %2169 = vpow2.f32 %v1632_v7  ;;  %v1445_v61 = vadd.f32 %v1724_v2, %v1399_v63  ;;  %v1459_v19 = vadd.f32 %v1728_v4, %v1440_v6 }
 0x7d7   :  { %v2003_v10 = vpop.f32.mrf.mxu1  ;;  %v2011_v3 = vpop.f32.mrf.mxu0 }
 0x7d8   :  { %v1633_v11 = vmul.f32 -1.442695, %v1445_v61  ;;  %v1635_v22 = vmul.f32 -1.442695, %v1459_v19 }
 0x7d9   :  { %v1506_v13 = vpop.f32.mrf.mxu1 }
 0x7da   :  { %2171 = vpow2.f32 %v1633_v11  ;;  %v1507_v28 = vadd.f32 %v2554_v42, %v1506_v13 }
 0x7db   :  { %v2018_v14 = vpop.f32.mrf.mxu1  ;;  %2173 = vpow2.f32 %v1634_v18 }
 0x7dd   :  { %v1509_v16 = vpop.f32.mrf.mxu1 }
 0x7de   :  { %v1510_v35 = vadd.f32 %v2554_v42, %v1509_v16 }
 0x7df   :  { %v2019_v17 = vpop.f32.mrf.mxu1 }
 0x7e3   :  { %v2170_v20 = vpop.eup %2169 }
 0x7e4   :  { %v1452_v21 = vadd.f32 1.0, %v2170_v20 }
 0x7e6   :  { %2175 = vrcp.f32 %v1452_v21 }
 0x7e7   :  { %v2172_v23 = vpop.eup %2171  ;;  %2177 = vpow2.f32 %v1635_v22 }
 0x7e8   :  { %v1453_v24 = vadd.f32 1.0, %v2172_v23  ;;  %v2174_v26 = vpop.eup %2173 }
 0x7e9   :  { %v1466_v32 = vadd.f32 1.0, %v2174_v26 }
 0x7ea   :  { %2179 = vrcp.f32 %v1453_v24 }
 0x7f3   :  { %v2176_v29 = vpop.eup %2175 }
 0x7f4   :  { %v1513_v30 = vmul.f32 %v2176_v29, %v1507_v28  ;;  %v2178_v31 = vpop.eup %2177 }
 0x7f5   :  { %v1467_v39 = vadd.f32 1.0, %v2178_v31 }
 0x7f6   :  { %v1515_v33 = vadd.f32 %v1731_v27, %v1513_v30 }
 0x7f7   :  { %v2180_v36 = vpop.eup %2179 }
 0x7f8   :  { %2181 = vtanh.f32 %v1515_v33  ;;  %v1514_v37 = vmul.f32 %v2180_v36, %v1510_v35 }
 0x7f9   :  { %2183 = vrcp.f32 %v1466_v32 }
 0x7fa   :  { %v1516_v40 = vadd.f32 %v1732_v34, %v1514_v37 }
 0x7fc   :  { %2185 = vtanh.f32 %v1516_v40 }
 0x7fd   :  { %2187 = vrcp.f32 %v1467_v39 }
 0x805   :  { %v2182_v41 = vpop.eup %2181 }
 0x806   :  { %v1519_v43 = vsub.f32 %v2559_v58, %v2182_v41  ;;  %v2184_v44 = vpop.eup %2183 }
 0x808   :  { %v1521_v45 = vmul.f32 %v2184_v44, %v1519_v43 }
 0x809   :  { %v2186_v46 = vpop.eup %2185 }
 0x80a   :  { %v1523_v47 = vadd.f32 %v2182_v41, %v1521_v45  ;;  %v1520_v48 = vsub.f32 %v2561_v60, %v2186_v46  ;;  %v2188_v38 = vpop.eup %2187 }
 0x80c   :  { %1525 = vst.msk [vmem:[%s2597_s3] sm:$0xff] %vm60_vm1, %v1523_v47  ;;  %v1522_v42 = vmul.f32 %v2188_v38, %v1520_v48 }
 0x80e   :  { %v1524_v49 = vadd.f32 %v2186_v46, %v1522_v42 }
 0x810   :  { %1526 = vst.msk [vmem:[%s2597_s3 + $0x8] sm:$0xff] %vm60_vm1, %v1524_v49 }

</bundles_post_ra>
